<compile_context>
chip_gen: v7x
topology: tpu7x:2x2x1
jax: 0.10.0
libtpu: 0.0.40
codegen_flags: <defaults>
</compile_context>

<pallas_src>
import functools

import jax
import jax.numpy as jnp
import numpy as np
from jax.experimental import pallas as pl
from jax.experimental.pallas import tpu as pltpu

EPS = 1e-3      # matches BatchNorm2d(eps=0.001)
# NEG stands in for MaxPool2d's -inf padding.  This is exact because cv1 ends in a
# ReLU (h >= 0), so any finite negative sentinel never wins a max.  Revisit if the
# activation ever changes (SiLU / identity).
NEG = -1e30
PAD = 8         # scratch halo width: >= 2 required by the 5x5 pool; 8 keeps the
                # interior store and the right column strip sublane(8)-aligned.
LANES = 128


def _round_up(x, m):
    return (x + m - 1) // m * m


def _fold_bn(gamma, beta, mean, var):
    scale = gamma / jnp.sqrt(var + EPS)
    bias = beta - mean * scale
    return scale, bias


# ----------------------------- kernel --------------------------------------- #

def spp_kernel(x_ref, w1_ref, b1_ref, w2_ref, b2_ref, o_ref, pad_ref, *, H, W):
    """Fused SPP for one batch element (NHWC plane resident in VMEM).

    x_ref:  (1, H, W, Cp)            bf16 input plane, channels zero-padded to Cp
    w1_ref: (Cp, Hp)                 bf16 cv1 1x1 weights (BN scale folded, zero-padded)
    b1_ref: (1, Hp)                  f32 cv1 folded BN bias
    w2_ref: (4, Hp, Cp)              bf16 cv2 1x1 weights (BN folded), one slab per branch
    b2_ref: (1, Cp)                  f32 cv2 folded BN bias
    o_ref:  (1, H, W, Cp)            f32 output plane
    pad_ref:(H+2*PAD, W+2*PAD, Hp)   f32 scratch: NEG-haloed hidden plane
    """
    Cp = x_ref.shape[-1]
    Hp = w1_ref.shape[-1]

    # ---- cv1: 1x1 conv as a bf16 matmul (f32 accumulate) + bias + ReLU ----
    x2 = x_ref[0].reshape(H * W, Cp)
    h = jnp.dot(x2, w1_ref[...], preferred_element_type=jnp.float32)
    h = jnp.maximum(h + b1_ref[...], 0.0)                       # (H*W, Hp) f32

    # ---- halo-only NEG fill (done every grid step: megacore-safe) ----
    row_strip = jnp.full((2, W + 2 * PAD, Hp), NEG, jnp.float32)
    pad_ref[PAD - 2:PAD] = row_strip                            # top 2 halo rows
    pad_ref[PAD + H:PAD + H + 2] = row_strip                    # bottom 2 halo rows
    col_strip = jnp.full((H, PAD, Hp), NEG, jnp.float32)
    pad_ref[PAD:PAD + H, 0:PAD] = col_strip                     # left columns (aligned)
    pad_ref[PAD:PAD + H, PAD + W:PAD + W + PAD] = col_strip     # right columns (aligned)

    # interior store: column offset PAD=8, width W % 8 == 0 -> unmasked, tile-aligned
    pad_ref[PAD:PAD + H, PAD:PAD + W, :] = h.reshape(H, W, Hp)

    r0 = PAD - 2            # first row the pools read
    c0 = PAD - 2            # first column the pools read
    RH = H + 4              # only the rows the H pass consumes

    def pool5():
        # 5x5 / stride-1 / pad-2 max pool of the interior, separable:
        # W pass (shifted loads along the sublane dim), then H pass (leading dim).
        cm = pad_ref[r0:r0 + RH, c0:c0 + W, :]
        for d in range(1, 5):
            cm = jnp.maximum(cm, pad_ref[r0:r0 + RH, c0 + d:c0 + d + W, :])
        out = cm[0:H]
        for d in range(1, 5):
            out = jnp.maximum(out, cm[d:d + H])
        return out                                              # (H, W, Hp) f32

    # Cascaded 5x5 pools reproduce the 5 / 9 / 13 pools exactly (SPP == SPPF).
    m5 = pool5()
    pad_ref[PAD:PAD + H, PAD:PAD + W, :] = m5
    m9 = pool5()
    pad_ref[PAD:PAD + H, PAD:PAD + W, :] = m9
    m13 = pool5()

    # ---- cv2 on concat([h, m5, m9, m13]): 4 bf16 matmuls, f32 accumulate ----
    # (kept adjacent so the adds can be absorbed into the MXU result path on v7x)
    bf = jnp.bfloat16
    acc = jnp.dot(h.astype(bf), w2_ref[0], preferred_element_type=jnp.float32)
    acc = acc + jnp.dot(m5.reshape(H * W, Hp).astype(bf), w2_ref[1],
                        preferred_element_type=jnp.float32)
    acc = acc + jnp.dot(m9.reshape(H * W, Hp).astype(bf), w2_ref[2],
                        preferred_element_type=jnp.float32)
    acc = acc + jnp.dot(m13.reshape(H * W, Hp).astype(bf), w2_ref[3],
                        preferred_element_type=jnp.float32)
    y = jnp.maximum(acc + b2_ref[...], 0.0)
    o_ref[...] = y.reshape(1, H, W, Cp)


# ----------------------------- wrappers -------------------------------------- #

def spp_forward_nhwc(x_nhwc, params):
    """Fused SPP on an NHWC input (preferred entry point: no layout transposes)."""
    N, H, W, Cin = x_nhwc.shape
    hidden = params["w1"].shape[1]
    assert W % 8 == 0, "W must be a multiple of 8 for sublane-aligned stores"
    # TODO(synk): support W % 8 != 0 via a masked right edge / width padding.

    Cp = _round_up(Cin, LANES)
    Hp = _round_up(hidden, LANES)

    s1, c1 = _fold_bn(params["g1"], params["b1"], params["m1"], params["v1"])
    s2, c2 = _fold_bn(params["g2"], params["b2"], params["m2"], params["v2"])

    # Fold BN scale into the conv weights (f32), zero-pad channels, cast to bf16.
    w1s = params["w1"] * s1[None, :]                               # (Cin, hidden)
    w2s = (params["w2"] * s2[None, :]).reshape(4, hidden, Cin)     # (4, hidden, Cin)
    w1p = jnp.pad(w1s, ((0, Cp - Cin), (0, Hp - hidden))).astype(jnp.bfloat16)
    w2p = jnp.pad(w2s, ((0, 0), (0, Hp - hidden), (0, Cp - Cin))).astype(jnp.bfloat16)
    b1p = jnp.pad(c1, (0, Hp - hidden)).reshape(1, Hp).astype(jnp.float32)
    b2p = jnp.pad(c2, (0, Cp - Cin)).reshape(1, Cp).astype(jnp.float32)

    xp = jnp.pad(x_nhwc, ((0, 0), (0, 0), (0, 0), (0, Cp - Cin))).astype(jnp.bfloat16)

    # VMEM budget: double-buffered in/out tiles + weights + scratch, with headroom.
    in_tile = H * W * Cp * 2
    out_tile = H * W * Cp * 4
    wbytes = Cp * Hp * 2 + Hp * 4 + 4 * Hp * Cp * 2 + Cp * 4
    scratch_bytes = (H + 2 * PAD) * (W + 2 * PAD) * Hp * 4
    budget = 2 * (in_tile + out_tile + wbytes) + scratch_bytes
    vmem_limit = int(min(max(32 << 20, 2 * budget), 64 << 20))

    y = pl.pallas_call(
        functools.partial(spp_kernel, H=H, W=W),
        out_shape=jax.ShapeDtypeStruct((N, H, W, Cp), jnp.float32),
        grid=(N,),
        in_specs=[
            pl.BlockSpec((1, H, W, Cp), lambda n: (n, 0, 0, 0)),
            pl.BlockSpec((Cp, Hp), lambda n: (0, 0)),
            pl.BlockSpec((1, Hp), lambda n: (0, 0)),
            pl.BlockSpec((4, Hp, Cp), lambda n: (0, 0, 0)),
            pl.BlockSpec((1, Cp), lambda n: (0, 0)),
        ],
        out_specs=pl.BlockSpec((1, H, W, Cp), lambda n: (n, 0, 0, 0)),
        scratch_shapes=[pltpu.VMEM((H + 2 * PAD, W + 2 * PAD, Hp), jnp.float32)],
        compiler_params=pltpu.CompilerParams(
            dimension_semantics=("parallel",),
            vmem_limit_bytes=vmem_limit,
        ),
    )(xp, w1p, b1p, w2p, b2p)

    return y[..., :Cin]                                            # drop channel pad


def spp_forward(x_nchw, params):
    """NCHW wrapper matching the PyTorch interface.  The two transposes are an extra
    HBM pass each; keep the surrounding model NHWC and call spp_forward_nhwc directly
    in production."""
    x = jnp.transpose(x_nchw, (0, 2, 3, 1))                        # NHWC
    y = spp_forward_nhwc(x, params)
    return jnp.transpose(y, (0, 3, 1, 2))                          # back to NCHW


# ----------------------------- reference ------------------------------------ #

def spp_reference(x_nchw, params):
    """Pure-JAX reference (lax.conv + lax.reduce_window).  Uses the same bf16 operand
    quantization as the kernel's MXU path with f32 accumulation, so the comparison
    tolerance can stay tight."""
    s1, c1 = _fold_bn(params["g1"], params["b1"], params["m1"], params["v1"])
    s2, c2 = _fold_bn(params["g2"], params["b2"], params["m2"], params["v2"])

    w1 = jnp.transpose(params["w1"] * s1[None, :])                 # (hidden, Cin)
    w1 = w1.astype(jnp.bfloat16)[:, :, None, None]
    h = jax.lax.conv_general_dilated(
        x_nchw.astype(jnp.bfloat16), w1, window_strides=(1, 1),
        padding=((0, 0), (0, 0)), dimension_numbers=("NCHW", "OIHW", "NCHW"),
        preferred_element_type=jnp.float32)
    h = jnp.maximum(h + c1[None, :, None, None], 0.0)

    branches = [h]
    for k in (5, 9, 13):
        p = k // 2
        branches.append(jax.lax.reduce_window(
            h, -jnp.inf, jax.lax.max,
            window_dimensions=(1, 1, k, k), window_strides=(1, 1, 1, 1),
            padding=((0, 0), (0, 0), (p, p), (p, p))))
    cat = jnp.concatenate(branches, axis=1)                        # (N, 4*hidden, H, W)

    w2 = jnp.transpose(params["w2"] * s2[None, :])                 # (Cin, 4*hidden)
    w2 = w2.astype(jnp.bfloat16)[:, :, None, None]
    y = jax.lax.conv_general_dilated(
        cat.astype(jnp.bfloat16), w2, window_strides=(1, 1),
        padding=((0, 0), (0, 0)), dimension_numbers=("NCHW", "OIHW", "NCHW"),
        preferred_element_type=jnp.float32)
    y = jnp.maximum(y + c2[None, :, None, None], 0.0)
    return y


# ----------------------------- main ----------------------------------------- #

if __name__ == "__main__":
    N, Cin, H, W = 2, 8, 16, 16
    hidden = Cin // 2                  # SPP: hidden = in_channels // 2
    cat_ch = 4 * hidden                # cv2 input channels

    key = jax.random.PRNGKey(0)
    ks = jax.random.split(key, 11)

    params = {
        # cv1.conv.weight (hidden, Cin, 1, 1) stored as (Cin, hidden)
        "w1": jax.random.normal(ks[0], (Cin, hidden), jnp.float32) * 0.2,
        # cv2.conv.weight (Cin, 4*hidden, 1, 1) stored as (4*hidden, Cin);
        # rows grouped in concat order: [cv1-out, pool5, pool9, pool13]
        "w2": jax.random.normal(ks[1], (cat_ch, Cin), jnp.float32) * 0.2,
        # BatchNorm (inference) params for cv1 / cv2
        "g1": 1.0 + 0.1 * jax.random.normal(ks[2], (hidden,), jnp.float32),
        "b1": 0.1 * jax.random.normal(ks[3], (hidden,), jnp.float32),
        "m1": 0.1 * jax.random.normal(ks[4], (hidden,), jnp.float32),
        "v1": 0.9 + 0.1 * jnp.abs(jax.random.normal(ks[5], (hidden,), jnp.float32)),
        "g2": 1.0 + 0.1 * jax.random.normal(ks[6], (Cin,), jnp.float32),
        "b2": 0.1 * jax.random.normal(ks[7], (Cin,), jnp.float32),
        "m2": 0.1 * jax.random.normal(ks[8], (Cin,), jnp.float32),
        "v2": 0.9 + 0.1 * jnp.abs(jax.random.normal(ks[9], (Cin,), jnp.float32)),
    }

    x = jax.random.normal(ks[10], (N, Cin, H, W), jnp.float32)

    out = jax.block_until_ready(spp_forward(x, params))
    ref = jax.block_until_ready(spp_reference(x, params))
    # Both sides use bf16 operands with f32 accumulation; residual differences are
    # f32 summation-order only.
    np.testing.assert_allclose(np.asarray(out), np.asarray(ref), rtol=2e-3, atol=2e-3)

    print("KERNEL_OK")
</pallas_src>

<mosaic_0001>
module attributes {stable_mosaic.version = 11 : i64} {
  func.func @spp_kernel(%arg0: i32, %arg1: memref<1x16x16x128xbf16, #tpu.memory_space<vmem>>, %arg2: memref<128x128xbf16, #tpu.memory_space<vmem>>, %arg3: memref<1x128xf32, #tpu.memory_space<vmem>>, %arg4: memref<4x128x128xbf16, #tpu.memory_space<vmem>>, %arg5: memref<1x128xf32, #tpu.memory_space<vmem>>, %arg6: memref<1x16x16x128xf32, #tpu.memory_space<vmem>>, %arg7: memref<32x32x128xf32, #tpu.memory_space<vmem>>) attributes {dimension_semantics = [#tpu.dimension_semantics<parallel>], iteration_bounds = array<i64: 2>, scalar_prefetch = 0 : i64, scratch_operands = 1 : i64, tpu.core_type = #tpu.core_type<tc>, window_params = [{transform_indices = @transform_0, window_bounds = array<i64: 1, 16, 16, 128>}, {pipeline_mode = #tpu.pipeline_mode<synchronous>, transform_indices = @transform_1, window_bounds = array<i64: 128, 128>}, {pipeline_mode = #tpu.pipeline_mode<synchronous>, transform_indices = @transform_2, window_bounds = array<i64: 1, 128>}, {pipeline_mode = #tpu.pipeline_mode<synchronous>, transform_indices = @transform_3, window_bounds = array<i64: 4, 128, 128>}, {pipeline_mode = #tpu.pipeline_mode<synchronous>, transform_indices = @transform_4, window_bounds = array<i64: 1, 128>}, {transform_indices = @transform_5, window_bounds = array<i64: 1, 16, 16, 128>}]} {
    %c0 = arith.constant 0 : index
    %c0_0 = arith.constant 0 : index
    %c0_1 = arith.constant 0 : index
    %c0_2 = arith.constant 0 : index
    %0 = vector.load %arg1[%c0, %c0_0, %c0_1, %c0_2] : memref<1x16x16x128xbf16, #tpu.memory_space<vmem>>, vector<1x16x16x128xbf16>
    %1 = vector.shape_cast %0 : vector<1x16x16x128xbf16> to vector<16x16x128xbf16>
    %2 = vector.shape_cast %1 : vector<16x16x128xbf16> to vector<256x128xbf16>
    %c0_3 = arith.constant 0 : index
    %c0_4 = arith.constant 0 : index
    %3 = vector.load %arg2[%c0_3, %c0_4] : memref<128x128xbf16, #tpu.memory_space<vmem>>, vector<128x128xbf16>
    %cst = arith.constant dense<0.000000e+00> : vector<256x128xf32>
    %4 = tpu.matmul %2, %3, %cst {dimension_numbers = #tpu.dot_dimension_numbers<[1], [0], [0], [1], [0, 0, 1, 1], [], []>} : vector<256x128xbf16>, vector<128x128xbf16>, vector<256x128xf32> -> vector<256x128xf32>
    %c0_5 = arith.constant 0 : index
    %c0_6 = arith.constant 0 : index
    %5 = vector.load %arg3[%c0_5, %c0_6] : memref<1x128xf32, #tpu.memory_space<vmem>>, vector<1x128xf32>
    %6 = vector.broadcast %5 : vector<1x128xf32> to vector<256x128xf32>
    %7 = arith.addf %4, %6 : vector<256x128xf32>
    %cst_7 = arith.constant 0.000000e+00 : f32
    %8 = vector.broadcast %cst_7 : f32 to vector<256x128xf32>
    %9 = arith.maximumf %7, %8 : vector<256x128xf32>
    %cst_8 = arith.constant -1.000000e+30 : f32
    %10 = vector.broadcast %cst_8 : f32 to vector<2x32x128xf32>
    %c6 = arith.constant 6 : index
    %c0_9 = arith.constant 0 : index
    %c0_10 = arith.constant 0 : index
    %11 = vector.load %arg7[%c6, %c0_9, %c0_10] : memref<32x32x128xf32, #tpu.memory_space<vmem>>, vector<2x32x128xf32>
    tpu.vector_store %arg7[%c6, %c0_9, %c0_10], %10 {strides = array<i32>} : memref<32x32x128xf32, #tpu.memory_space<vmem>>, vector<2x32x128xf32>,
    %c24 = arith.constant 24 : index
    %c0_11 = arith.constant 0 : index
    %c0_12 = arith.constant 0 : index
    %12 = vector.load %arg7[%c24, %c0_11, %c0_12] : memref<32x32x128xf32, #tpu.memory_space<vmem>>, vector<2x32x128xf32>
    tpu.vector_store %arg7[%c24, %c0_11, %c0_12], %10 {strides = array<i32>} : memref<32x32x128xf32, #tpu.memory_space<vmem>>, vector<2x32x128xf32>,
    %cst_13 = arith.constant -1.000000e+30 : f32
    %13 = vector.broadcast %cst_13 : f32 to vector<16x8x128xf32>
    %c8 = arith.constant 8 : index
    %c0_14 = arith.constant 0 : index
    %c0_15 = arith.constant 0 : index
    %14 = vector.load %arg7[%c8, %c0_14, %c0_15] : memref<32x32x128xf32, #tpu.memory_space<vmem>>, vector<16x8x128xf32>
    tpu.vector_store %arg7[%c8, %c0_14, %c0_15], %13 {strides = array<i32>} : memref<32x32x128xf32, #tpu.memory_space<vmem>>, vector<16x8x128xf32>,
    %c8_16 = arith.constant 8 : index
    %c24_17 = arith.constant 24 : index
    %c0_18 = arith.constant 0 : index
    %15 = vector.load %arg7[%c8_16, %c24_17, %c0_18] : memref<32x32x128xf32, #tpu.memory_space<vmem>>, vector<16x8x128xf32>
    tpu.vector_store %arg7[%c8_16, %c24_17, %c0_18], %13 {strides = array<i32>} : memref<32x32x128xf32, #tpu.memory_space<vmem>>, vector<16x8x128xf32>,
    %16 = vector.shape_cast %9 : vector<256x128xf32> to vector<16x16x128xf32>
    %c8_19 = arith.constant 8 : index
    %c8_20 = arith.constant 8 : index
    %c0_21 = arith.constant 0 : index
    %17 = vector.load %arg7[%c8_19, %c8_20, %c0_21] : memref<32x32x128xf32, #tpu.memory_space<vmem>>, vector<16x16x128xf32>
    tpu.vector_store %arg7[%c8_19, %c8_20, %c0_21], %16 {strides = array<i32>} : memref<32x32x128xf32, #tpu.memory_space<vmem>>, vector<16x16x128xf32>,
    %c6_22 = arith.constant 6 : index
    %c6_23 = arith.constant 6 : index
    %c0_24 = arith.constant 0 : index
    %18 = vector.load %arg7[%c6_22, %c6_23, %c0_24] : memref<32x32x128xf32, #tpu.memory_space<vmem>>, vector<20x16x128xf32>
    %c6_25 = arith.constant 6 : index
    %c7 = arith.constant 7 : index
    %c0_26 = arith.constant 0 : index
    %19 = vector.load %arg7[%c6_25, %c7, %c0_26] : memref<32x32x128xf32, #tpu.memory_space<vmem>>, vector<20x16x128xf32>
    %20 = arith.maximumf %18, %19 : vector<20x16x128xf32>
    %c6_27 = arith.constant 6 : index
    %c8_28 = arith.constant 8 : index
    %c0_29 = arith.constant 0 : index
    %21 = vector.load %arg7[%c6_27, %c8_28, %c0_29] : memref<32x32x128xf32, #tpu.memory_space<vmem>>, vector<20x16x128xf32>
    %22 = arith.maximumf %20, %21 : vector<20x16x128xf32>
    %c6_30 = arith.constant 6 : index
    %c9 = arith.constant 9 : index
    %c0_31 = arith.constant 0 : index
    %23 = vector.load %arg7[%c6_30, %c9, %c0_31] : memref<32x32x128xf32, #tpu.memory_space<vmem>>, vector<20x16x128xf32>
    %24 = arith.maximumf %22, %23 : vector<20x16x128xf32>
    %c6_32 = arith.constant 6 : index
    %c10 = arith.constant 10 : index
    %c0_33 = arith.constant 0 : index
    %25 = vector.load %arg7[%c6_32, %c10, %c0_33] : memref<32x32x128xf32, #tpu.memory_space<vmem>>, vector<20x16x128xf32>
    %26 = arith.maximumf %24, %25 : vector<20x16x128xf32>
    %27 = vector.extract_strided_slice %26 {offsets = [0, 0, 0], sizes = [16, 16, 128], strides = [1, 1, 1]} : vector<20x16x128xf32> to vector<16x16x128xf32>
    %28 = vector.extract_strided_slice %26 {offsets = [1, 0, 0], sizes = [16, 16, 128], strides = [1, 1, 1]} : vector<20x16x128xf32> to vector<16x16x128xf32>
    %29 = arith.maximumf %27, %28 : vector<16x16x128xf32>
    %30 = vector.extract_strided_slice %26 {offsets = [2, 0, 0], sizes = [16, 16, 128], strides = [1, 1, 1]} : vector<20x16x128xf32> to vector<16x16x128xf32>
    %31 = arith.maximumf %29, %30 : vector<16x16x128xf32>
    %32 = vector.extract_strided_slice %26 {offsets = [3, 0, 0], sizes = [16, 16, 128], strides = [1, 1, 1]} : vector<20x16x128xf32> to vector<16x16x128xf32>
    %33 = arith.maximumf %31, %32 : vector<16x16x128xf32>
    %34 = vector.extract_strided_slice %26 {offsets = [4, 0, 0], sizes = [16, 16, 128], strides = [1, 1, 1]} : vector<20x16x128xf32> to vector<16x16x128xf32>
    %35 = arith.maximumf %33, %34 : vector<16x16x128xf32>
    %c8_34 = arith.constant 8 : index
    %c8_35 = arith.constant 8 : index
    %c0_36 = arith.constant 0 : index
    %36 = vector.load %arg7[%c8_34, %c8_35, %c0_36] : memref<32x32x128xf32, #tpu.memory_space<vmem>>, vector<16x16x128xf32>
    tpu.vector_store %arg7[%c8_34, %c8_35, %c0_36], %35 {strides = array<i32>} : memref<32x32x128xf32, #tpu.memory_space<vmem>>, vector<16x16x128xf32>,
    %c6_37 = arith.constant 6 : index
    %c6_38 = arith.constant 6 : index
    %c0_39 = arith.constant 0 : index
    %37 = vector.load %arg7[%c6_37, %c6_38, %c0_39] : memref<32x32x128xf32, #tpu.memory_space<vmem>>, vector<20x16x128xf32>
    %c6_40 = arith.constant 6 : index
    %c7_41 = arith.constant 7 : index
    %c0_42 = arith.constant 0 : index
    %38 = vector.load %arg7[%c6_40, %c7_41, %c0_42] : memref<32x32x128xf32, #tpu.memory_space<vmem>>, vector<20x16x128xf32>
    %39 = arith.maximumf %37, %38 : vector<20x16x128xf32>
    %c6_43 = arith.constant 6 : index
    %c8_44 = arith.constant 8 : index
    %c0_45 = arith.constant 0 : index
    %40 = vector.load %arg7[%c6_43, %c8_44, %c0_45] : memref<32x32x128xf32, #tpu.memory_space<vmem>>, vector<20x16x128xf32>
    %41 = arith.maximumf %39, %40 : vector<20x16x128xf32>
    %c6_46 = arith.constant 6 : index
    %c9_47 = arith.constant 9 : index
    %c0_48 = arith.constant 0 : index
    %42 = vector.load %arg7[%c6_46, %c9_47, %c0_48] : memref<32x32x128xf32, #tpu.memory_space<vmem>>, vector<20x16x128xf32>
    %43 = arith.maximumf %41, %42 : vector<20x16x128xf32>
    %c6_49 = arith.constant 6 : index
    %c10_50 = arith.constant 10 : index
    %c0_51 = arith.constant 0 : index
    %44 = vector.load %arg7[%c6_49, %c10_50, %c0_51] : memref<32x32x128xf32, #tpu.memory_space<vmem>>, vector<20x16x128xf32>
    %45 = arith.maximumf %43, %44 : vector<20x16x128xf32>
    %46 = vector.extract_strided_slice %45 {offsets = [0, 0, 0], sizes = [16, 16, 128], strides = [1, 1, 1]} : vector<20x16x128xf32> to vector<16x16x128xf32>
    %47 = vector.extract_strided_slice %45 {offsets = [1, 0, 0], sizes = [16, 16, 128], strides = [1, 1, 1]} : vector<20x16x128xf32> to vector<16x16x128xf32>
    %48 = arith.maximumf %46, %47 : vector<16x16x128xf32>
    %49 = vector.extract_strided_slice %45 {offsets = [2, 0, 0], sizes = [16, 16, 128], strides = [1, 1, 1]} : vector<20x16x128xf32> to vector<16x16x128xf32>
    %50 = arith.maximumf %48, %49 : vector<16x16x128xf32>
    %51 = vector.extract_strided_slice %45 {offsets = [3, 0, 0], sizes = [16, 16, 128], strides = [1, 1, 1]} : vector<20x16x128xf32> to vector<16x16x128xf32>
    %52 = arith.maximumf %50, %51 : vector<16x16x128xf32>
    %53 = vector.extract_strided_slice %45 {offsets = [4, 0, 0], sizes = [16, 16, 128], strides = [1, 1, 1]} : vector<20x16x128xf32> to vector<16x16x128xf32>
    %54 = arith.maximumf %52, %53 : vector<16x16x128xf32>
    %c8_52 = arith.constant 8 : index
    %c8_53 = arith.constant 8 : index
    %c0_54 = arith.constant 0 : index
    %55 = vector.load %arg7[%c8_52, %c8_53, %c0_54] : memref<32x32x128xf32, #tpu.memory_space<vmem>>, vector<16x16x128xf32>
    tpu.vector_store %arg7[%c8_52, %c8_53, %c0_54], %54 {strides = array<i32>} : memref<32x32x128xf32, #tpu.memory_space<vmem>>, vector<16x16x128xf32>,
    %c6_55 = arith.constant 6 : index
    %c6_56 = arith.constant 6 : index
    %c0_57 = arith.constant 0 : index
    %56 = vector.load %arg7[%c6_55, %c6_56, %c0_57] : memref<32x32x128xf32, #tpu.memory_space<vmem>>, vector<20x16x128xf32>
    %c6_58 = arith.constant 6 : index
    %c7_59 = arith.constant 7 : index
    %c0_60 = arith.constant 0 : index
    %57 = vector.load %arg7[%c6_58, %c7_59, %c0_60] : memref<32x32x128xf32, #tpu.memory_space<vmem>>, vector<20x16x128xf32>
    %58 = arith.maximumf %56, %57 : vector<20x16x128xf32>
    %c6_61 = arith.constant 6 : index
    %c8_62 = arith.constant 8 : index
    %c0_63 = arith.constant 0 : index
    %59 = vector.load %arg7[%c6_61, %c8_62, %c0_63] : memref<32x32x128xf32, #tpu.memory_space<vmem>>, vector<20x16x128xf32>
    %60 = arith.maximumf %58, %59 : vector<20x16x128xf32>
    %c6_64 = arith.constant 6 : index
    %c9_65 = arith.constant 9 : index
    %c0_66 = arith.constant 0 : index
    %61 = vector.load %arg7[%c6_64, %c9_65, %c0_66] : memref<32x32x128xf32, #tpu.memory_space<vmem>>, vector<20x16x128xf32>
    %62 = arith.maximumf %60, %61 : vector<20x16x128xf32>
    %c6_67 = arith.constant 6 : index
    %c10_68 = arith.constant 10 : index
    %c0_69 = arith.constant 0 : index
    %63 = vector.load %arg7[%c6_67, %c10_68, %c0_69] : memref<32x32x128xf32, #tpu.memory_space<vmem>>, vector<20x16x128xf32>
    %64 = arith.maximumf %62, %63 : vector<20x16x128xf32>
    %65 = vector.extract_strided_slice %64 {offsets = [0, 0, 0], sizes = [16, 16, 128], strides = [1, 1, 1]} : vector<20x16x128xf32> to vector<16x16x128xf32>
    %66 = vector.extract_strided_slice %64 {offsets = [1, 0, 0], sizes = [16, 16, 128], strides = [1, 1, 1]} : vector<20x16x128xf32> to vector<16x16x128xf32>
    %67 = arith.maximumf %65, %66 : vector<16x16x128xf32>
    %68 = vector.extract_strided_slice %64 {offsets = [2, 0, 0], sizes = [16, 16, 128], strides = [1, 1, 1]} : vector<20x16x128xf32> to vector<16x16x128xf32>
    %69 = arith.maximumf %67, %68 : vector<16x16x128xf32>
    %70 = vector.extract_strided_slice %64 {offsets = [3, 0, 0], sizes = [16, 16, 128], strides = [1, 1, 1]} : vector<20x16x128xf32> to vector<16x16x128xf32>
    %71 = arith.maximumf %69, %70 : vector<16x16x128xf32>
    %72 = vector.extract_strided_slice %64 {offsets = [4, 0, 0], sizes = [16, 16, 128], strides = [1, 1, 1]} : vector<20x16x128xf32> to vector<16x16x128xf32>
    %73 = arith.maximumf %71, %72 : vector<16x16x128xf32>
    %74 = arith.truncf %9 : vector<256x128xf32> to vector<256x128xbf16>
    %c0_70 = arith.constant 0 : index
    %c0_71 = arith.constant 0 : index
    %c0_72 = arith.constant 0 : index
    %75 = vector.load %arg4[%c0_70, %c0_71, %c0_72] : memref<4x128x128xbf16, #tpu.memory_space<vmem>>, vector<1x128x128xbf16>
    %76 = vector.shape_cast %75 : vector<1x128x128xbf16> to vector<128x128xbf16>
    %cst_73 = arith.constant dense<0.000000e+00> : vector<256x128xf32>
    %77 = tpu.matmul %74, %76, %cst_73 {dimension_numbers = #tpu.dot_dimension_numbers<[1], [0], [0], [1], [0, 0, 1, 1], [], []>} : vector<256x128xbf16>, vector<128x128xbf16>, vector<256x128xf32> -> vector<256x128xf32>
    %78 = vector.shape_cast %35 : vector<16x16x128xf32> to vector<256x128xf32>
    %79 = arith.truncf %78 : vector<256x128xf32> to vector<256x128xbf16>
    %c1 = arith.constant 1 : index
    %c0_74 = arith.constant 0 : index
    %c0_75 = arith.constant 0 : index
    %80 = vector.load %arg4[%c1, %c0_74, %c0_75] : memref<4x128x128xbf16, #tpu.memory_space<vmem>>, vector<1x128x128xbf16>
    %81 = vector.shape_cast %80 : vector<1x128x128xbf16> to vector<128x128xbf16>
    %cst_76 = arith.constant dense<0.000000e+00> : vector<256x128xf32>
    %82 = tpu.matmul %79, %81, %cst_76 {dimension_numbers = #tpu.dot_dimension_numbers<[1], [0], [0], [1], [0, 0, 1, 1], [], []>} : vector<256x128xbf16>, vector<128x128xbf16>, vector<256x128xf32> -> vector<256x128xf32>
    %83 = arith.addf %77, %82 : vector<256x128xf32>
    %84 = vector.shape_cast %54 : vector<16x16x128xf32> to vector<256x128xf32>
    %85 = arith.truncf %84 : vector<256x128xf32> to vector<256x128xbf16>
    %c2 = arith.constant 2 : index
    %c0_77 = arith.constant 0 : index
    %c0_78 = arith.constant 0 : index
    %86 = vector.load %arg4[%c2, %c0_77, %c0_78] : memref<4x128x128xbf16, #tpu.memory_space<vmem>>, vector<1x128x128xbf16>
    %87 = vector.shape_cast %86 : vector<1x128x128xbf16> to vector<128x128xbf16>
    %cst_79 = arith.constant dense<0.000000e+00> : vector<256x128xf32>
    %88 = tpu.matmul %85, %87, %cst_79 {dimension_numbers = #tpu.dot_dimension_numbers<[1], [0], [0], [1], [0, 0, 1, 1], [], []>} : vector<256x128xbf16>, vector<128x128xbf16>, vector<256x128xf32> -> vector<256x128xf32>
    %89 = arith.addf %83, %88 : vector<256x128xf32>
    %90 = vector.shape_cast %73 : vector<16x16x128xf32> to vector<256x128xf32>
    %91 = arith.truncf %90 : vector<256x128xf32> to vector<256x128xbf16>
    %c3 = arith.constant 3 : index
    %c0_80 = arith.constant 0 : index
    %c0_81 = arith.constant 0 : index
    %92 = vector.load %arg4[%c3, %c0_80, %c0_81] : memref<4x128x128xbf16, #tpu.memory_space<vmem>>, vector<1x128x128xbf16>
    %93 = vector.shape_cast %92 : vector<1x128x128xbf16> to vector<128x128xbf16>
    %cst_82 = arith.constant dense<0.000000e+00> : vector<256x128xf32>
    %94 = tpu.matmul %91, %93, %cst_82 {dimension_numbers = #tpu.dot_dimension_numbers<[1], [0], [0], [1], [0, 0, 1, 1], [], []>} : vector<256x128xbf16>, vector<128x128xbf16>, vector<256x128xf32> -> vector<256x128xf32>
    %95 = arith.addf %89, %94 : vector<256x128xf32>
    %c0_83 = arith.constant 0 : index
    %c0_84 = arith.constant 0 : index
    %96 = vector.load %arg5[%c0_83, %c0_84] : memref<1x128xf32, #tpu.memory_space<vmem>>, vector<1x128xf32>
    %97 = vector.broadcast %96 : vector<1x128xf32> to vector<256x128xf32>
    %98 = arith.addf %95, %97 : vector<256x128xf32>
    %cst_85 = arith.constant 0.000000e+00 : f32
    %99 = vector.broadcast %cst_85 : f32 to vector<256x128xf32>
    %100 = arith.maximumf %98, %99 : vector<256x128xf32>
    %101 = vector.shape_cast %100 : vector<256x128xf32> to vector<1x16x16x128xf32>
    %c0_86 = arith.constant 0 : index
    %c0_87 = arith.constant 0 : index
    %c0_88 = arith.constant 0 : index
    %c0_89 = arith.constant 0 : index
    %102 = vector.load %arg6[%c0_86, %c0_87, %c0_88, %c0_89] : memref<1x16x16x128xf32, #tpu.memory_space<vmem>>, vector<1x16x16x128xf32>
    tpu.vector_store %arg6[%c0_86, %c0_87, %c0_88, %c0_89], %101 {strides = array<i32>} : memref<1x16x16x128xf32, #tpu.memory_space<vmem>>, vector<1x16x16x128xf32>,
    return
  }
  func.func @transform_0(%arg0: i32) -> (i32, i32, i32, i32) {
    %c0_i32 = arith.constant 0 : i32
    %c0_i32_0 = arith.constant 0 : i32
    %c0_i32_1 = arith.constant 0 : i32
    %c0_i32_2 = arith.constant 0 : i32
    return %arg0, %c0_i32, %c0_i32_0, %c0_i32_1 : i32, i32, i32, i32
  }
  func.func @transform_1(%arg0: i32) -> (i32, i32) {
    %c0_i32 = arith.constant 0 : i32
    %c0_i32_0 = arith.constant 0 : i32
    %c0_i32_1 = arith.constant 0 : i32
    return %c0_i32, %c0_i32_0 : i32, i32
  }
  func.func @transform_2(%arg0: i32) -> (i32, i32) {
    %c0_i32 = arith.constant 0 : i32
    %c0_i32_0 = arith.constant 0 : i32
    %c0_i32_1 = arith.constant 0 : i32
    return %c0_i32, %c0_i32_0 : i32, i32
  }
  func.func @transform_3(%arg0: i32) -> (i32, i32, i32) {
    %c0_i32 = arith.constant 0 : i32
    %c0_i32_0 = arith.constant 0 : i32
    %c0_i32_1 = arith.constant 0 : i32
    %c0_i32_2 = arith.constant 0 : i32
    return %c0_i32, %c0_i32_0, %c0_i32_1 : i32, i32, i32
  }
  func.func @transform_4(%arg0: i32) -> (i32, i32) {
    %c0_i32 = arith.constant 0 : i32
    %c0_i32_0 = arith.constant 0 : i32
    %c0_i32_1 = arith.constant 0 : i32
    return %c0_i32, %c0_i32_0 : i32, i32
  }
  func.func @transform_5(%arg0: i32) -> (i32, i32, i32, i32) {
    %c0_i32 = arith.constant 0 : i32
    %c0_i32_0 = arith.constant 0 : i32
    %c0_i32_1 = arith.constant 0 : i32
    %c0_i32_2 = arith.constant 0 : i32
    return %arg0, %c0_i32, %c0_i32_0, %c0_i32_1 : i32, i32, i32, i32
  }
}

</mosaic_0001>

<bundles_post_ra>
// kernel: tpu_custom_call.1
= control target key start
LH: loop header
LB: loop body
LE: loop exit
PB: predicated region body
PF: predicated region fallthrough
CT: control target
= control target key end

     0   :  { %10 = vsyncpa [#allocation4], 0  ;;  %s6026_s0 = inlined_call_operand.hbm [shape: bf16[2,16,16,128], index: 0, kind: input, shape index: {}]   ;;  %s6027_s1 = inlined_call_operand.hbm [shape: bf16[128,128], index: 1, kind: input, shape index: {}]   ;;  %s6028_s2 = inlined_call_operand.vmem [shape: f32[1,128], index: 2, kind: input, shape index: {}]   ;;  %s6029_s3 = inlined_call_operand.hbm [shape: bf16[4,128,128], index: 3, kind: input, shape index: {}]   ;;  %s6030_s4 = inlined_call_operand.vmem [shape: f32[1,128], index: 4, kind: input, shape index: {}]   ;;  %s6031_s5 = inlined_call_operand.hbm [shape: f32[2,16,16,128], index: 5, kind: output, shape index: {}]  }
   0x1   :  { %12 = vsyncpa [#allocation4 + $0x1], 0 }
   0x2   :  { %13 = vsyncpa [#allocation7], 0 }
   0x3   :  { %14 = vsyncpa [#allocation5], 0 }
   0x4   :  { %16 = vsyncpa [#allocation5 + $0x1], 0  ;;  %s4394_s18 = smov 0   ;;  %s4396_s19 = smov 0  }
   0x5   :  { %s4398_s20 = smov 0   ;;  %s4400_s21 = smov 0  }
   0x6 LB: > { %s4415_s22 = sadd.s32 4294967295, %s4353_s21   ;;  %s3516_s23 = sadd.s32 4294967294, %s4353_s21   ;;  %s4353_s21 = sphi %s4400_s21, %s6159_s21   ;;  %s4349_s20 = sphi %s4398_s20, %s6158_s20   ;;  %s4345_s19 = sphi %s4396_s19, %s6157_s19   ;;  %s4341_s18 = sphi %s4394_s18, %s6156_s18  }
   0x7   : > { %p42_p0 = scmp.ne.s32.totalorder %s4345_s19, %s4341_s18  ;;  %p6032_p1 = scmp.eq.s32.totalorder %s4415_s22, 0 }
   0x8   : > { %p156_p3 = scmp.eq.s32.totalorder %s3516_s23, 1  ;;  %p3517_p5 = scmp.ge.s32.totalorder %s4353_s21, 1 }
   0x9   : > { %p4424_p4 = por %p6032_p1, %p42_p0  ;;  %p163_p7 = scmp.lt.s32.totalorder %s4353_s21, 3 }
   0xa   : > { %p4429_p6 = por %p156_p3, %p42_p0  ;;  %s4355_s27 = smov [#allocation6]  }
   0xb   : > { %s6067_s24 = scalar_select %p4424_p4, 1, 0 }
   0xc   : > { %s6068_s25 = scalar_select %p4429_p6, 1, 0 }
   0xd   : > { %p4434_p8 = pnand %p3517_p5, %p163_p7  ;;  %s175_s28 = sshll.u32 %s4355_s27, 4  ;;  %s4438_s28 = int_to_ptr.vmem [resolvable:$true] %s175_s28 }
   0xe   : > { %s4356_s30 = smov [#allocation8]   ;;  %s4197_s9 = scalar_lea.hbm %s6027_s1, 1024 }
   0xf   : > { %p4078_p9 = pneg %p4434_p8  ;;  %s191_s6 = sshll.u32 %s4356_s30, 4  ;;  %s4449_s6 = int_to_ptr.vmem [resolvable:$true] %s191_s6 }
  0x10   : > { %p4198_p12 = scmp.ne.s32.totalorder %s6027_s1, %s4197_s9  ;;  %p4204_p5 = scmp.lt.u32.totalorder %s4197_s9, %s6027_s1 }
  0x11   : > { %p4445_p11 = pnand %p4078_p9, %p6032_p1 }
  0x13   : > { %p4199_p13 = pneg %p4445_p11 }
  0x15   : > { %p4200_p0 = pnand %p4199_p13, %p4198_p12 }
  0x17   : > { %p4201_p3 = pneg %p4200_p0 }
  0x19   : > { %p4206_p7 = pnand %p4204_p5, %p4201_p3 }
  0x1b   : > { %4209 = shalt.err (!%p4206_p7)
}
  0x1c   : > { %s4210_s14 = scalar_lea.vmem %s4438_s28, 1024  ;;  %p4218_p2 = scmp.lt.s32.totalorder %s4438_s28, %s4438_s28 }
  0x1d   : > { %p4211_p9 = scmp.ne.s32.totalorder %s4438_s28, %s4210_s14  ;;  %p4219_p12 = scmp.lt.s32.totalorder %s4210_s14, %s4210_s14 }
  0x1f   : > { %p4213_p10 = pnand %p4211_p9, %p4199_p13  ;;  %p4220_p0 = por %p4219_p12, %p4218_p2 }
  0x21   : > { %p4214_p1 = pneg %p4213_p10 }
  0x23   : > { %p4221_p6 = pnand %p4220_p0, %p4214_p1 }
  0x25   : > { %4224 = shalt.err (!%p4221_p6)
}
  0x26   : > { %s4357_s15 = smov 64   ;;  %s4358_s16 = smov 4  }
  0x27   : > { %4081 = dma.hbm_to_vmem [thread:$0]  (!%p4445_p11), %s6027_s1, 1024, %s4438_s28, [#allocation7], %s4357_s15, %s4357_s15, %s4358_s16  }
  0x28   : > { %s4225_s7 = scalar_lea.hbm %s6029_s3, 4096 }
  0x29   : > { %p4226_p1 = scmp.ne.s32.totalorder %s6029_s3, %s4225_s7  ;;  %p4232_p10 = scmp.lt.u32.totalorder %s4225_s7, %s6029_s3 }
  0x2b   : > { %p4228_p2 = pnand %p4226_p1, %p4199_p13 }
  0x2d   : > { %p4229_p6 = pneg %p4228_p2 }
  0x2f   : > { %p4234_p3 = pnand %p4232_p10, %p4229_p6 }
  0x31   : > { %4237 = shalt.err (!%p4234_p3)
}
  0x32   : > { %s4238_s28 = scalar_lea.vmem %s4449_s6, 4096  ;;  %p4246_p12 = scmp.lt.s32.totalorder %s4449_s6, %s4449_s6 }
  0x33   : > { %p4239_p5 = scmp.ne.s32.totalorder %s4449_s6, %s4238_s28  ;;  %p4247_p0 = scmp.lt.s32.totalorder %s4238_s28, %s4238_s28 }
  0x35   : > { %p4241_p7 = pnand %p4239_p5, %p4199_p13  ;;  %p4248_p1 = por %p4247_p0, %p4246_p12 }
  0x37   : > { %p4242_p9 = pneg %p4241_p7 }
  0x39   : > { %p4249_p2 = pnand %p4248_p1, %p4242_p9 }
  0x3b   : > { %4252 = shalt.err (!%p4249_p2)
}
  0x3c   : > { %4084 = dma.hbm_to_vmem [thread:$0]  (!%p4445_p11), %s6029_s3, 4096, %s4449_s6, [#allocation7], %s4357_s15, %s4357_s15, %s4358_s16  }
  0x3d   : > { %s4510_s29 = sadd.s32 1, %s4353_s21   ;;  %s29_s14 = sadd.s32 1, %s4349_s20 }
  0x3e   : > { %s26_s17 = ssub.s32 %s4353_s21, %s4510_s29  ;;  %p36_p13 = scmp.ne.s32.totalorder %s4349_s20, %s4345_s19 }
  0x3f   : > { %p27_p6 = scmp.eq.s32.totalorder %s26_s17, 0  ;;  %p37_p10 = scmp.eq.s32.totalorder %s4353_s21, 0 }
  0x40   : > { %p6071_p3 = scmp.eq.s32.totalorder %s4415_s22, 1  ;;  %p4095_p7 = scmp.lt.s32.totalorder %s4353_s21, 2 }
  0x41   : > { %s4526_s27 = scalar_select %p27_p6, %s4349_s20, %s29_s14  }
  0x42   : > { %p4520_p5 = por %p6071_p3, %p36_p13  ;;  %p38_p9 = por %p37_p10, %p36_p13 }
  0x43   : > { %s208_s30 = sand.u32 1, %s4349_s20   ;;  %s3592_s6 = sshll.u32 %s4353_s21, 11 }
  0x44   : > { %s6072_s23 = scalar_select %p4520_p5, 1, 0 }
  0x45   : > { %s3521_s7 = sshll.u32 %s208_s30, 7  ;;  %s4533_s10 = scalar_lea.hbm %s6026_s0, %s3592_s6 }
  0x46   : > { %s212_s11 = scalar_lea.vmem [#allocation3], %s3521_s7  ;;  %p4537_p11 = pnand %p4095_p7, %p38_p9 }
  0x47   : > { %s219_s28 = sshll.u32 %s212_s11, 4  ;;  %s4541_s13 = scalar_lea.sflag [#allocation4], %s208_s30  ;;  %s4535_s28 = int_to_ptr.vmem [resolvable:$true] %s219_s28 }
  0x48   : > { %s4253_s14 = scalar_lea.hbm %s4533_s10, 2048  ;;  %p4255_p0 = pneg %p4537_p11 }
  0x49   : > { %p4254_p12 = scmp.ne.s32.totalorder %s4533_s10, %s4253_s14  ;;  %s4258_s6 = scalar_lea.hbm %s6026_s0, 4096 }
  0x4a   : > { %p4259_p13 = scmp.lt.u32.totalorder %s4533_s10, %s6026_s0  ;;  %p4260_p6 = scmp.lt.u32.totalorder %s4258_s6, %s4253_s14 }
  0x4b   : > { %p4256_p1 = pnand %p4255_p0, %p4254_p12  ;;  %p4262_p3 = scmp.lt.u32.totalorder %s4253_s14, %s4533_s10 }
  0x4c   : > { %p4261_p10 = por %p4260_p6, %p4259_p13 }
  0x4d   : > { %p4257_p2 = pneg %p4256_p1 }
  0x4e   : > { %p4263_p7 = por %p4262_p3, %p4261_p10 }
  0x50   : > { %p4264_p9 = pnand %p4263_p7, %p4257_p2 }
  0x52   : > { %4267 = shalt.err (!%p4264_p9)
}
  0x53   : > { %s4268_s30 = scalar_lea.vmem %s4535_s28, 2048  ;;  %s4359_s11 = smov [#allocation3]  }
  0x54   : > { %p4269_p12 = scmp.ne.s32.totalorder %s4535_s28, %s4268_s30  ;;  %s4273_s17 = sshll.u32 %s4359_s11, 4  ;;  %s4274_s17 = int_to_ptr.vmem [resolvable:$false] %s4273_s17 }
  0x55   : > { %s4275_s7 = scalar_lea.vmem %s4274_s17, 4096  ;;  %p4276_p4 = scmp.lt.s32.totalorder %s4535_s28, %s4274_s17 }
  0x56   : > { %p4271_p1 = pnand %p4269_p12, %p4255_p0  ;;  %p4277_p13 = scmp.lt.s32.totalorder %s4275_s7, %s4268_s30 }
  0x58   : > { %p4272_p5 = pneg %p4271_p1  ;;  %p4278_p6 = por %p4277_p13, %p4276_p4 }
  0x5a   : > { %p4279_p10 = pnand %p4278_p6, %p4272_p5 }
  0x5c   : > { %4282 = shalt.err (!%p4279_p10)
}
  0x5d   : > { %4088 = dma.hbm_to_vmem [thread:$0]  (!%p4537_p11), %s4533_s10, 2048, %s4535_s28, %s4541_s13, %s4357_s15, %s4357_s15, %s4358_s16  }
  0x5e   : > { %231 = sbr.rel (%p4434_p8) target bundleno = 859 (0x35b), region = 40 }
  0x65   : > { %s4575_s14 = sand.u32 1, %s4345_s19   ;;  %p6074_p4 = scmp.ne.s32.totalorder %s6067_s24, 0 }
  0x66   : > { %s3525_s6 = sshll.u32 %s4575_s14, 7  ;;  %s234_s8 = scalar_lea.sflag [#allocation4], %s4575_s14 }
  0x67   : > { %s4579_s9 = scalar_lea.vmem [#allocation3], %s3525_s6 }
  0x68   : > { %4328 = dma.done.wait (%p6074_p4), %s234_s8, 2048  }
  0x69   : > { %4330 = vsyncadd (%p6074_p4), %s234_s8, 4294965248  ;;  %p6075_p5 = scmp.eq.s32.totalorder %s4415_s22, 0 }
  0x6b   : > { %4332 = dma.done.wait (%p6075_p5), [#allocation7], 5120   ;;  %p6076_p8 = pmov %p6075_p5 }
  0x6c   : > { %v4138_v0 = vld [vmem:[#allocation6] sm:$0xff]   ;;  %v4139_v1 = vld [vmem:[#allocation6 + $0x8] sm:$0xff]   ;;  %v4140_v2 = vld [vmem:[#allocation6 + $0x10] sm:$0xff]   ;;  %v4360_v25 = vmov -1e+30   ;;  %s3528_s10 = sshll.u32 %s4575_s14, 8 }
  0x6d   : > { %4334 = vsyncadd (%p6076_p8), [#allocation7], 4294962176  ;;  %3714 = vmatprep.subr.bf16.mxu0 %v4138_v0  ;;  %v4141_v3 = vld [vmem:[#allocation6 + $0x18] sm:$0xff]   ;;  %v4146_v4 = vld [vmem:[%s4579_s9] sm:$0xff]   ;;  %666 = vst [vmem:[#allocation2 + $0xc0] sm:$0xff] %v4360_v25  ;;  %s5893_s28 = scalar_lea.vmem [#allocation9], %s3528_s10 }
  0x6e   : > { %3715 = vmatpush3.bf16.msra.mxu0 %v4138_v0  ;;  %3730 = vmatprep.mubr.bf16.mxu0 %v4146_v4  ;;  %v4142_v5 = vld [vmem:[#allocation6 + $0x20] sm:$0xff]   ;;  %v4143_v6 = vld [vmem:[#allocation6 + $0x28] sm:$0xff]   ;;  %v4144_v7 = vld [vmem:[#allocation6 + $0x30] sm:$0xff]   ;;  %667 = vst [vmem:[#allocation2 + $0xc8] sm:$0xff] %v4360_v25  ;;  %s3593_s12 = sshll.u32 %s4415_s22, 12  ;;  %s3424_s13 = sshll.u32 %s5893_s28, 4  ;;  %s5979_s13 = int_to_ptr.vmem [resolvable:$true] %s3424_s13 }
  0x6f   : > { %3716 = vmatprep.subr.bf16.mxu0 %v4139_v1  ;;  %v4145_v8 = vld [vmem:[#allocation6 + $0x38] sm:$0xff]   ;;  %v4147_v9 = vld [vmem:[%s4579_s9 + $0x8] sm:$0xff]   ;;  %v4148_v10 = vld [vmem:[%s4579_s9 + $0x10] sm:$0xff]   ;;  %668 = vst [vmem:[#allocation2 + $0xd0] sm:$0xff] %v4360_v25  ;;  %s5977_s17 = scalar_lea.hbm %s6031_s5, %s3593_s12  ;;  %s3411_s22 = scalar_lea.sflag [#allocation5], %s4575_s14 }
  0x70   : > { %v4149_v11 = vld [vmem:[%s4579_s9 + $0x18] sm:$0xff]   ;;  %v4150_v12 = vld [vmem:[%s4579_s9 + $0x20] sm:$0xff]   ;;  %v4151_v13 = vld [vmem:[%s4579_s9 + $0x28] sm:$0xff]   ;;  %669 = vst [vmem:[#allocation2 + $0xd8] sm:$0xff] %v4360_v25  ;;  %s4283_s7 = scalar_lea.vmem %s5979_s13, 4096  ;;  %p6153_p0 = scmp.ne.s32.totalorder %s6072_s23, 0 }
  0x71   : > { %v4152_v14 = vld [vmem:[%s4579_s9 + $0x30] sm:$0xff]   ;;  %v4153_v15 = vld [vmem:[%s4579_s9 + $0x38] sm:$0xff]   ;;  %v4154_v16 = vld [vmem:[%s4579_s9 + $0x40] sm:$0xff]   ;;  %670 = vst [vmem:[#allocation2 + $0xe0] sm:$0xff] %v4360_v25  ;;  %p4284_p11 = scmp.ne.s32.totalorder %s5979_s13, %s4283_s7  ;;  %s4361_s6 = smov [#allocation9]  }
  0x72   : > { %3717 = vmatpush3.bf16.msra.mxu0 %v4139_v1  ;;  %v4155_v17 = vld [vmem:[%s4579_s9 + $0x48] sm:$0xff]   ;;  %v4156_v18 = vld [vmem:[%s4579_s9 + $0x50] sm:$0xff]   ;;  %v4157_v19 = vld [vmem:[%s4579_s9 + $0x58] sm:$0xff]   ;;  %671 = vst [vmem:[#allocation2 + $0xe8] sm:$0xff] %v4360_v25  ;;  %s4287_s8 = sshll.u32 %s4361_s6, 4  ;;  %s4288_s8 = int_to_ptr.vmem [resolvable:$false] %s4287_s8 }
  0x73   : > { %3718 = vmatprep.subr.bf16.mxu0 %v4140_v2  ;;  %v4158_v20 = vld [vmem:[%s4579_s9 + $0x60] sm:$0xff]   ;;  %v4159_v21 = vld [vmem:[%s4579_s9 + $0x68] sm:$0xff]   ;;  %v4160_v22 = vld [vmem:[%s4579_s9 + $0x70] sm:$0xff]   ;;  %672 = vst [vmem:[#allocation2 + $0xf0] sm:$0xff] %v4360_v25  ;;  %p4285_p2 = pnand %p4284_p11, %p6153_p0  ;;  %p4290_p7 = scmp.lt.s32.totalorder %s5979_s13, %s4288_s8 }
  0x74   : > { %v4161_v23 = vld [vmem:[%s4579_s9 + $0x78] sm:$0xff]   ;;  %v4162_v24 = vld [vmem:[#allocation8 + $0x40] sm:$0xff]   ;;  %673 = vst [vmem:[#allocation2 + $0xf8] sm:$0xff] %v4360_v25  ;;  %684 = vst [vmem:[#allocation2 + $0x100] sm:$0xff] %v4360_v25  ;;  %s4289_s9 = scalar_lea.vmem %s4288_s8, 8192 }
  0x75   : > { %685 = vst [vmem:[#allocation2 + $0x120] sm:$0xff] %v4360_v25  ;;  %686 = vst [vmem:[#allocation2 + $0x140] sm:$0xff] %v4360_v25  ;;  %v4163_v26 = vld [vmem:[#allocation8 + $0x48] sm:$0xff]   ;;  %v4605_v27 = vld [vmem:[#allocation8] sm:$0xff]   ;;  %p4286_p3 = pneg %p4285_p2  ;;  %p4291_p9 = scmp.lt.s32.totalorder %s4289_s9, %s4283_s7 }
  0x76   : > { %3719 = vmatpush3.bf16.msra.mxu0 %v4140_v2  ;;  %700 = vst [vmem:[#allocation2 + $0x118] sm:$0xff] %v4360_v25  ;;  %701 = vst [vmem:[#allocation2 + $0x138] sm:$0xff] %v4360_v25  ;;  %3954 = vmatprep.subr.bf16.mxu1 %v4605_v27  ;;  %v4165_v28 = vld [vmem:[#allocation8 + $0x50] sm:$0xff]   ;;  %v4609_v29 = vld [vmem:[#allocation8 + $0x8] sm:$0xff]  }
  0x77   : > { %3720 = vmatprep.subr.bf16.mxu0 %v4141_v3  ;;  %702 = vst [vmem:[#allocation2 + $0x158] sm:$0xff] %v4360_v25  ;;  %675 = vst [vmem:[#allocation2 + $0x300] sm:$0xff] %v4360_v25  ;;  %3962 = vmatpush3.bf16.msra.mxu1 %v4605_v27  ;;  %v4167_v30 = vld [vmem:[#allocation8 + $0x58] sm:$0xff]   ;;  %v4613_v31 = vld [vmem:[#allocation8 + $0x10] sm:$0xff]   ;;  %p4292_p12 = por %p4291_p9, %p4290_p7 }
  0x78   : > { %676 = vst [vmem:[#allocation2 + $0x308] sm:$0xff] %v4360_v25  ;;  %677 = vst [vmem:[#allocation2 + $0x310] sm:$0xff] %v4360_v25  ;;  %3955 = vmatprep.subr.bf16.mxu1 %v4609_v29  ;;  %v4169_v32 = vld [vmem:[#allocation8 + $0x60] sm:$0xff]   ;;  %v4617_v33 = vld [vmem:[#allocation8 + $0x18] sm:$0xff]  }
  0x79   : > { %678 = vst [vmem:[#allocation2 + $0x318] sm:$0xff] %v4360_v25  ;;  %679 = vst [vmem:[#allocation2 + $0x320] sm:$0xff] %v4360_v25  ;;  %v4171_v34 = vld [vmem:[#allocation8 + $0x68] sm:$0xff]   ;;  %v4621_v35 = vld [vmem:[#allocation8 + $0x20] sm:$0xff]   ;;  %p4293_p1 = pnand %p4292_p12, %p4286_p3 }
  0x7a   : > { %3721 = vmatpush3.bf16.msra.mxu0 %v4141_v3  ;;  %680 = vst [vmem:[#allocation2 + $0x328] sm:$0xff] %v4360_v25  ;;  %681 = vst [vmem:[#allocation2 + $0x330] sm:$0xff] %v4360_v25  ;;  %v4173_v36 = vld [vmem:[#allocation8 + $0x70] sm:$0xff]   ;;  %v4625_v37 = vld [vmem:[#allocation8 + $0x28] sm:$0xff]  }
  0x7b   : > { %3722 = vmatprep.subr.bf16.mxu0 %v4142_v5  ;;  %682 = vst [vmem:[#allocation2 + $0x338] sm:$0xff] %v4360_v25  ;;  %687 = vst [vmem:[#allocation2 + $0x160] sm:$0xff] %v4360_v25  ;;  %3963 = vmatpush3.bf16.msra.mxu1 %v4609_v29  ;;  %v4175_v38 = vld [vmem:[#allocation8 + $0x78] sm:$0xff]   ;;  %v4176_v39 = vld [vmem:[#allocation8 + $0x30] sm:$0xff]  }
  0x7c   : > { %688 = vst [vmem:[#allocation2 + $0x180] sm:$0xff] %v4360_v25  ;;  %689 = vst [vmem:[#allocation2 + $0x1a0] sm:$0xff] %v4360_v25  ;;  %3956 = vmatprep.subr.bf16.mxu1 %v4613_v31  ;;  %v4177_v40 = vld [vmem:[#allocation8 + $0x38] sm:$0xff]   ;;  %v4630_v41 = vld [vmem:[#allocation8 + $0x80] sm:$0xff]  }
  0x7d   : > { %690 = vst [vmem:[#allocation2 + $0x1c0] sm:$0xff] %v4360_v25  ;;  %691 = vst [vmem:[#allocation2 + $0x1e0] sm:$0xff] %v4360_v25  ;;  %v748_v42 = vld [vmem:[#allocation2 + $0xc6] sm:$0xff]  ;;  %v749_v44 = vld [vmem:[#allocation2 + $0xce] sm:$0xff] }
  0x7e   : > { %3723 = vmatpush3.bf16.msra.mxu0 %v4142_v5  ;;  %692 = vst [vmem:[#allocation2 + $0x200] sm:$0xff] %v4360_v25  ;;  %693 = vst [vmem:[#allocation2 + $0x220] sm:$0xff] %v4360_v25  ;;  %v750_v43 = vld [vmem:[#allocation2 + $0xe6] sm:$0xff]  ;;  %v751_v47 = vld [vmem:[#allocation2 + $0xee] sm:$0xff] }
  0x7f   : > { %3724 = vmatprep.subr.bf16.mxu0 %v4143_v6  ;;  %694 = vst [vmem:[#allocation2 + $0x240] sm:$0xff] %v4360_v25  ;;  %695 = vst [vmem:[#allocation2 + $0x260] sm:$0xff] %v4360_v25  ;;  %3964 = vmatpush3.bf16.msra.mxu1 %v4613_v31  ;;  %v788_v45 = vld [vmem:[#allocation2 + $0xc7] sm:$0xff]  ;;  %v789_v48 = vld [vmem:[#allocation2 + $0xcf] sm:$0xff] }
  0x80   : > { %696 = vst [vmem:[#allocation2 + $0x280] sm:$0xff] %v4360_v25  ;;  %697 = vst [vmem:[#allocation2 + $0x2a0] sm:$0xff] %v4360_v25  ;;  %3957 = vmatprep.subr.bf16.mxu1 %v4617_v33  ;;  %v790_v46 = vld [vmem:[#allocation2 + $0xe7] sm:$0xff]  ;;  %v791_v49 = vld [vmem:[#allocation2 + $0xef] sm:$0xff]  ;;  %v828_v50 = vmax.f32 %v748_v42, %v788_v45  ;;  %v829_v52 = vmax.f32 %v749_v44, %v789_v48 }
  0x81   : > { %698 = vst [vmem:[#allocation2 + $0x2c0] sm:$0xff] %v4360_v25  ;;  %699 = vst [vmem:[#allocation2 + $0x2e0] sm:$0xff] %v4360_v25  ;;  %v830_v51 = vmax.f32 %v750_v43, %v790_v46  ;;  %v831_v53 = vmax.f32 %v751_v47, %v791_v49  ;;  %v4636_v54 = vld [vmem:[%s6028_s2] ss:$0 sm:$0xff]  ;;  %v948_v57 = vld [vmem:[#allocation2 + $0xc9] sm:$0xff] }
  0x82   : > { %3725 = vmatpush3.bf16.msra.mxu0 %v4143_v6  ;;  %703 = vst [vmem:[#allocation2 + $0x178] sm:$0xff] %v4360_v25  ;;  %704 = vst [vmem:[#allocation2 + $0x198] sm:$0xff] %v4360_v25  ;;  %v908_v55 = vmax.f32 %v828_v50, -1e+30  ;;  %v909_v58 = vmax.f32 %v829_v52, -1e+30 }
  0x83   : > { %3726 = vmatprep.subr.bf16.mxu0 %v4144_v7  ;;  %705 = vst [vmem:[#allocation2 + $0x1b8] sm:$0xff] %v4360_v25  ;;  %706 = vst [vmem:[#allocation2 + $0x1d8] sm:$0xff] %v4360_v25  ;;  %3965 = vmatpush3.bf16.msra.mxu1 %v4617_v33  ;;  %v910_v56 = vmax.f32 %v830_v51, -1e+30  ;;  %v911_v59 = vmax.f32 %v831_v53, -1e+30 }
  0x84   : > { %707 = vst [vmem:[#allocation2 + $0x1f8] sm:$0xff] %v4360_v25  ;;  %708 = vst [vmem:[#allocation2 + $0x218] sm:$0xff] %v4360_v25  ;;  %3958 = vmatprep.subr.bf16.mxu1 %v4621_v35  ;;  %v950_v60 = vld [vmem:[#allocation2 + $0xe9] sm:$0xff]  ;;  %v949_v0 = vld [vmem:[#allocation2 + $0xd1] sm:$0xff] }
  0x85   : > { %709 = vst [vmem:[#allocation2 + $0x238] sm:$0xff] %v4360_v25  ;;  %710 = vst [vmem:[#allocation2 + $0x258] sm:$0xff] %v4360_v25  ;;  %v784_v61 = vld [vmem:[#allocation2 + $0x306] sm:$0xff]  ;;  %v951_v1 = vld [vmem:[#allocation2 + $0xf1] sm:$0xff] }
  0x86   : > { %3727 = vmatpush3.bf16.msra.mxu0 %v4144_v7  ;;  %711 = vst [vmem:[#allocation2 + $0x278] sm:$0xff] %v4360_v25  ;;  %712 = vst [vmem:[#allocation2 + $0x298] sm:$0xff] %v4360_v25  ;;  %v824_v62 = vld [vmem:[#allocation2 + $0x307] sm:$0xff]  ;;  %v825_v5 = vld [vmem:[#allocation2 + $0x30f] sm:$0xff] }
  0x87   : > { %3728 = vmatprep.subr.bf16.mxu0 %v4145_v8  ;;  %713 = vst [vmem:[#allocation2 + $0x2b8] sm:$0xff] %v4360_v25  ;;  %714 = vst [vmem:[#allocation2 + $0x2d8] sm:$0xff] %v4360_v25  ;;  %3966 = vmatpush3.bf16.msra.mxu1 %v4621_v35  ;;  %v785_v4 = vld [vmem:[#allocation2 + $0x30e] sm:$0xff]  ;;  %v4667_v51 = vld [vmem:[#allocation2 + $0xc6] sm:$0xff] }
  0x88   : > { %715 = vst [vmem:[#allocation2 + $0x2f8] sm:$0xff] %v4360_v25  ;;  %3959 = vmatprep.subr.bf16.mxu1 %v4625_v37  ;;  %v4664_v45 = vld [vmem:[#allocation2 + $0x311] sm:$0xff]  ;;  %6081 = vst [vmem:[#allocation17_spill] sm:$0xff] %v4667_v51  ;;  %v4671_v53 = vld [vmem:[#allocation2 + $0xc7] sm:$0xff] }
  0x89   : > { %v787_v46 = vld [vmem:[#allocation2 + $0x32e] sm:$0xff]  ;;  %6083 = vst [vmem:[#allocation19_spill] sm:$0xff] %v4671_v53 }
  0x8a   : > { %3729 = vmatpush3.bf16.msra.mxu0 %v4145_v8  ;;  %v988_v8 = vmax.f32 %v908_v55, %v948_v57  ;;  %v827_v47 = vld [vmem:[#allocation2 + $0x32f] sm:$0xff] }
  0x8b   : > { %3762 = vmatprep.subr.bf16.mxu0 %v4162_v24  ;;  %3967 = vmatpush3.bf16.msra.mxu1 %v4625_v37  ;;  %v867_v50 = vmax.f32 %v787_v46, %v827_v47  ;;  %v4669_v52 = vld [vmem:[#allocation2 + $0xce] sm:$0xff] }
  0x8c   : > { %3960 = vmatprep.subr.bf16.mxu1 %v4176_v39  ;;  %6082 = vst [vmem:[#allocation18_spill] sm:$0xff] %v4669_v52 }
  0x8d   : > { %3731 = vmatmul.mubr.bf16.vlgmr.msra.gmra.mrb[0].mxu0 %v4147_v9  ;;  %v990_v9 = vmax.f32 %v910_v56, %v950_v60  ;;  %v4679_v60 = vld [vmem:[#allocation2 + $0xe6] sm:$0xff] }
  0x8e   : > { %3734 = vmatprep.mubr.bf16.mxu0 %v4148_v10  ;;  %3763 = vmatpush3.bf16.msra.mxu0 %v4162_v24  ;;  %v864_v10 = vmax.f32 %v784_v61, %v824_v62  ;;  %6084 = vst [vmem:[#allocation20_spill] sm:$0xff] %v4679_v60  ;;  %v4681_v61 = vld [vmem:[#allocation2 + $0xcf] sm:$0xff]  ;;  %v4683_v62 = vld [vmem:[#allocation2 + $0xe7] sm:$0xff] }
  0x8f   : > { %3764 = vmatprep.subr.bf16.mxu0 %v4163_v26  ;;  %3968 = vmatpush3.bf16.msra.mxu1 %v4176_v39  ;;  %v984_v39 = vld [vmem:[#allocation2 + $0x309] sm:$0xff]  ;;  %6085 = vst [vmem:[#allocation21_spill] sm:$0xff] %v4681_v61  ;;  %6086 = vst [vmem:[#allocation22_spill] sm:$0xff] %v4683_v62 }
  0x90   : > { %3961 = vmatprep.subr.bf16.mxu1 %v4177_v40 }
  0x92   : > { %3765 = vmatpush3.bf16.msra.mxu0 %v4163_v26 }
  0x93   : > { %3766 = vmatprep.subr.bf16.mxu0 %v4165_v28  ;;  %3969 = vmatpush3.bf16.msra.mxu1 %v4177_v40 }
  0x94   : > { %3858 = vmatprep.subr.bf16.mxu1 %v4630_v41 }
  0x95   : > { %3735 = vmatmul.mubr.bf16.gmra.mrb[4].mxu0 %v4149_v11 }
  0x96   : > { %3738 = vmatprep.mubr.bf16.mxu0 %v4150_v12  ;;  %3767 = vmatpush3.bf16.msra.mxu0 %v4165_v28  ;;  %v944_v28 = vmax.f32 %v864_v10, -1e+30 }
  0x97   : > { %3768 = vmatprep.subr.bf16.mxu0 %v4167_v30 }
  0x9a   : > { %3769 = vmatpush3.bf16.msra.mxu0 %v4167_v30  ;;  %v786_v30 = vld [vmem:[#allocation2 + $0x326] sm:$0xff] }
  0x9b   : > { %3770 = vmatprep.subr.bf16.mxu0 %v4169_v32 }
  0x9d   : > { %3739 = vmatmul.mubr.bf16.gmra.mrb[8].mxu0 %v4151_v13 }
  0x9e   : > { %3742 = vmatprep.mubr.bf16.mxu0 %v4152_v14  ;;  %3771 = vmatpush3.bf16.msra.mxu0 %v4169_v32  ;;  %v989_v14 = vmax.f32 %v909_v58, %v949_v0  ;;  %v826_v32 = vld [vmem:[#allocation2 + $0x327] sm:$0xff]  ;;  %v1024_v58 = vmax.f32 %v944_v28, %v984_v39 }
  0x9f   : > { %3772 = vmatprep.subr.bf16.mxu0 %v4171_v34  ;;  %v866_v40 = vmax.f32 %v786_v30, %v826_v32 }
  0xa2   : > { %3773 = vmatpush3.bf16.msra.mxu0 %v4171_v34 }
  0xa3   : > { %3774 = vmatprep.subr.bf16.mxu0 %v4173_v36 }
  0xa5   : > { %3743 = vmatmul.mubr.bf16.gmra.mrb[12].mxu0 %v4153_v15  ;;  %v991_v15 = vmax.f32 %v911_v59, %v951_v1  ;;  %v4677_v59 = vmax.f32 %v866_v40, -1e+30 }
  0xa6   : > { %3746 = vmatprep.mubr.bf16.mxu0 %v4154_v16  ;;  %3775 = vmatpush3.bf16.msra.mxu0 %v4173_v36  ;;  %v1028_v16 = vld [vmem:[#allocation2 + $0xca] sm:$0xff] }
  0xa7   : > { %3776 = vmatprep.subr.bf16.mxu0 %v4175_v38  ;;  %v1068_v25 = vmax.f32 %v988_v8, %v1028_v16 }
  0xaa   : > { %3777 = vmatpush3.bf16.msra.mxu0 %v4175_v38 }
  0xab   : > { %3810 = vmatprep.subr.bf16.mxu0 %v4605_v27 }
  0xad   : > { %3747 = vmatmul.mubr.bf16.gmra.mrb[16].mxu0 %v4155_v17  ;;  %v1030_v17 = vld [vmem:[#allocation2 + $0xea] sm:$0xff] }
  0xae   : > { %3750 = vmatprep.mubr.bf16.mxu0 %v4156_v18  ;;  %v4652_v26 = vmax.f32 %v990_v9, %v1030_v17 }
  0xb0   : > { %v4675_v57 = vmax.f32 %v1068_v25, %v4652_v26 }
  0xb5   : > { %3751 = vmatmul.mubr.bf16.gmra.mrb[20].mxu0 %v4157_v19 }
  0xb6   : > { %3754 = vmatprep.mubr.bf16.mxu0 %v4158_v20  ;;  %v1029_v20 = vld [vmem:[#allocation2 + $0xd2] sm:$0xff] }
  0xb7   : > { %v1069_v36 = vmax.f32 %v989_v14, %v1029_v20  ;;  %v4703_v20 = vld [vmem:[#allocation2 + $0xef] sm:$0xff] }
  0xb8   : > { %6091 = vst [vmem:[#allocation27_spill] sm:$0xff] %v4703_v20 }
  0xbd   : > { %3755 = vmatmul.mubr.bf16.gmra.mrb[24].mxu0 %v4159_v21  ;;  %v1031_v21 = vld [vmem:[#allocation2 + $0xf2] sm:$0xff] }
  0xbe   : > { %3758 = vmatprep.mubr.bf16.mxu0 %v4160_v22  ;;  %v865_v22 = vmax.f32 %v785_v4, %v825_v5  ;;  %v4657_v38 = vmax.f32 %v991_v15, %v1031_v21  ;;  %v947_v4 = vmax.f32 %v867_v50, -1e+30  ;;  %v986_v5 = vld [vmem:[#allocation2 + $0x329] sm:$0xff] }
  0xbf   : > { %v1026_v40 = vmax.f32 %v4677_v59, %v986_v5 }
  0xc0   : > { %v4662_v44 = vmax.f32 %v865_v22, -1e+30 }
  0xc5   : > { %3759 = vmatmul.mubr.bf16.gmra.mrb[28].mxu0 %v4161_v23 }
 0x160   : > { %v3732_v63 = vpop.f32.mrb[0].mxu0 }
 0x161   : > { %v515_v2 = vadd.f32 %v3732_v63, %v4636_v54  ;;  %v506_v3 = vpop.f32.mrb[1].mxu0 }
 0x162   : > { %v507_v6 = vadd.f32 %v4636_v54, %v506_v3  ;;  %v3733_v7 = vpop.f32.mrb[2].mxu0  ;;  %v1064_v3 = vld [vmem:[#allocation2 + $0x30a] sm:$0xff] }
 0x163   : > { %v4640_v11 = vmax.f32 %v515_v2, 0.0  ;;  %v518_v12 = vadd.f32 %v3733_v7, %v4636_v54  ;;  %v509_v13 = vpop.f32.mrb[3].mxu0  ;;  %v4689_v2 = vmax.f32 %v1069_v36, %v4657_v38  ;;  %v1065_v36 = vld [vmem:[#allocation2 + $0x312] sm:$0xff]  ;;  %v4712_v39 = vmax.f32 %v1024_v58, %v1064_v3 }
 0x164   : > { %v4643_v18 = vmax.f32 %v507_v6, 0.0  ;;  %v510_v19 = vadd.f32 %v4636_v54, %v509_v13  ;;  %v4691_v6 = vld [vmem:[#allocation2 + $0xee] sm:$0xff] }
 0x165   : > { %6077 = vst [vmem:[#allocation13_spill] sm:$0xff] %v4640_v11  ;;  %718 = vst [vmem:[#allocation2 + $0x128] sm:$0xff] %v4640_v11  ;;  %v4647_v23 = vmax.f32 %v518_v12, 0.0  ;;  %v1025_v12 = vmax.f32 %v4662_v44, %v4664_v45  ;;  %v987_v13 = vld [vmem:[#allocation2 + $0x331] sm:$0xff] }
 0x166   : > { %6078 = vst [vmem:[#allocation14_spill] sm:$0xff] %v4643_v18  ;;  %716 = vst [vmem:[#allocation2 + $0x108] sm:$0xff] %v4643_v18  ;;  %v4650_v24 = vmax.f32 %v510_v19, 0.0 }
 0x167   : > { %6079 = vst [vmem:[#allocation15_spill] sm:$0xff] %v4647_v23  ;;  %719 = vst [vmem:[#allocation2 + $0x130] sm:$0xff] %v4647_v23 }
 0x168   : > { %6080 = vst [vmem:[#allocation16_spill] sm:$0xff] %v4650_v24  ;;  %717 = vst [vmem:[#allocation2 + $0x110] sm:$0xff] %v4650_v24  ;;  %v3736_v43 = vpop.f32.mrb[4].mxu0 }
 0x169   : > { %v531_v48 = vadd.f32 %v3736_v43, %v4636_v54  ;;  %v522_v49 = vpop.f32.mrb[5].mxu0  ;;  %6088 = vst [vmem:[#allocation24_spill] sm:$0xff] %v4691_v6  ;;  %6093 = vst [vmem:[#allocation29_spill] sm:$0xff] %v4712_v39 }
 0x16a   : > { %v523_v55 = vadd.f32 %v4636_v54, %v522_v49  ;;  %v3737_v56 = vpop.f32.mrb[6].mxu0  ;;  %v1066_v49 = vld [vmem:[#allocation2 + $0x32a] sm:$0xff] }
 0x16b   : > { %v4685_v63 = vmax.f32 %v531_v48, 0.0  ;;  %v534_v0 = vadd.f32 %v3737_v56, %v4636_v54  ;;  %v525_v1 = vpop.f32.mrb[7].mxu0  ;;  %v1027_v48 = vmax.f32 %v947_v4, %v987_v13 }
 0x16c   : > { %v4693_v7 = vmax.f32 %v523_v55, 0.0  ;;  %v526_v8 = vadd.f32 %v4636_v54, %v525_v1  ;;  %v754_v9 = vld [vmem:[#allocation2 + $0x126] sm:$0xff] }
 0x16d   : > { %6087 = vst [vmem:[#allocation23_spill] sm:$0xff] %v4685_v63  ;;  %v794_v10 = vld [vmem:[#allocation2 + $0x127] sm:$0xff]  ;;  %722 = vst [vmem:[#allocation2 + $0x168] sm:$0xff] %v4685_v63  ;;  %v4701_v15 = vmax.f32 %v534_v0, 0.0  ;;  %v1067_v0 = vld [vmem:[#allocation2 + $0x332] sm:$0xff] }
 0x16e   : > { %6089 = vst [vmem:[#allocation25_spill] sm:$0xff] %v4693_v7  ;;  %v752_v16 = vld [vmem:[#allocation2 + $0x106] sm:$0xff]  ;;  %v834_v19 = vmax.f32 %v754_v9, %v794_v10  ;;  %720 = vst [vmem:[#allocation2 + $0x148] sm:$0xff] %v4693_v7  ;;  %v4710_v25 = vmax.f32 %v526_v8, 0.0  ;;  %v755_v28 = vld [vmem:[#allocation2 + $0x12e] sm:$0xff]  ;;  %v4727_v10 = vmax.f32 %v1025_v12, %v1065_v36  ;;  %v4736_v12 = vmax.f32 %v1027_v48, %v1067_v0 }
 0x16f   : > { %6090 = vst [vmem:[#allocation26_spill] sm:$0xff] %v4701_v15  ;;  %v792_v17 = vld [vmem:[#allocation2 + $0x107] sm:$0xff]  ;;  %v795_v30 = vld [vmem:[#allocation2 + $0x12f] sm:$0xff]  ;;  %723 = vst [vmem:[#allocation2 + $0x170] sm:$0xff] %v4701_v15 }
 0x170   : > { %6092 = vst [vmem:[#allocation28_spill] sm:$0xff] %v4710_v25  ;;  %v832_v32 = vmax.f32 %v752_v16, %v792_v17  ;;  %v753_v44 = vld [vmem:[#allocation2 + $0x10e] sm:$0xff]  ;;  %v835_v46 = vmax.f32 %v755_v28, %v795_v30  ;;  %v914_v47 = vmax.f32 %v834_v19, %v4640_v11  ;;  %721 = vst [vmem:[#allocation2 + $0x150] sm:$0xff] %v4710_v25  ;;  %v3740_v55 = vpop.f32.mrb[8].mxu0 }
 0x171   : > { %v793_v45 = vld [vmem:[#allocation2 + $0x10f] sm:$0xff]  ;;  %v547_v3 = vadd.f32 %v3740_v55, %v4636_v54  ;;  %v538_v5 = vpop.f32.mrb[9].mxu0  ;;  %6094 = vst [vmem:[#allocation30_spill] sm:$0xff] %v4727_v10  ;;  %v4731_v30 = vmax.f32 %v1026_v40, %v1066_v49  ;;  %6097 = vst [vmem:[#allocation33_spill] sm:$0xff] %v4736_v12 }
 0x172   : > { %v833_v56 = vmax.f32 %v753_v44, %v793_v45  ;;  %v912_v58 = vmax.f32 %v832_v32, %v4643_v18  ;;  %v954_v59 = vld [vmem:[#allocation2 + $0x129] sm:$0xff]  ;;  %v915_v4 = vmax.f32 %v835_v46, %v4647_v23  ;;  %v539_v13 = vadd.f32 %v4636_v54, %v538_v5  ;;  %v3741_v16 = vpop.f32.mrb[10].mxu0  ;;  %v955_v19 = vld [vmem:[#allocation2 + $0x131] sm:$0xff] }
 0x173   : > { %v952_v8 = vld [vmem:[#allocation2 + $0x109] sm:$0xff]  ;;  %v994_v9 = vmax.f32 %v914_v47, %v954_v59  ;;  %6095 = vst [vmem:[#allocation31_spill] sm:$0xff] %v4731_v30  ;;  %v4733_v32 = vmax.f32 %v547_v3, 0.0  ;;  %v550_v44 = vadd.f32 %v3741_v16, %v4636_v54  ;;  %v541_v45 = vpop.f32.mrb[11].mxu0  ;;  %v953_v55 = vld [vmem:[#allocation2 + $0x111] sm:$0xff] }
 0x174   : > { %v913_v17 = vmax.f32 %v833_v56, %v4650_v24  ;;  %v992_v28 = vmax.f32 %v912_v58, %v952_v8  ;;  %v995_v46 = vmax.f32 %v915_v4, %v955_v19  ;;  %v1032_v1 = vld [vmem:[#allocation2 + $0x10a] sm:$0xff]  ;;  %v4738_v36 = vmax.f32 %v539_v13, 0.0  ;;  %v1035_v5 = vld [vmem:[#allocation2 + $0x132] sm:$0xff] }
 0x175   : > { %6096 = vst [vmem:[#allocation32_spill] sm:$0xff] %v4733_v32  ;;  %v1034_v47 = vld [vmem:[#allocation2 + $0x12a] sm:$0xff]  ;;  %v542_v59 = vadd.f32 %v4636_v54, %v541_v45  ;;  %726 = vst [vmem:[#allocation2 + $0x1a8] sm:$0xff] %v4733_v32  ;;  %v4744_v3 = vmax.f32 %v550_v44, 0.0  ;;  %v1033_v16 = vld [vmem:[#allocation2 + $0x112] sm:$0xff] }
 0x176   : > { %6098 = vst [vmem:[#allocation34_spill] sm:$0xff] %v4738_v36  ;;  %v993_v56 = vmax.f32 %v913_v17, %v953_v55  ;;  %v4741_v58 = vmax.f32 %v992_v28, %v1032_v1  ;;  %v758_v40 = vld [vmem:[#allocation2 + $0x166] sm:$0xff]  ;;  %v4746_v19 = vmax.f32 %v994_v9, %v1034_v47  ;;  %v4748_v48 = vmax.f32 %v995_v46, %v1035_v5  ;;  %v759_v13 = vld [vmem:[#allocation2 + $0x16e] sm:$0xff] }
 0x177   : > { %v798_v49 = vld [vmem:[#allocation2 + $0x167] sm:$0xff]  ;;  %6099 = vst [vmem:[#allocation35_spill] sm:$0xff] %v4744_v3  ;;  %v799_v45 = vld [vmem:[#allocation2 + $0x16f] sm:$0xff]  ;;  %724 = vst [vmem:[#allocation2 + $0x188] sm:$0xff] %v4738_v36  ;;  %v4751_v1 = vmax.f32 %v542_v59, 0.0 }
 0x178   : > { %v756_v8 = vld [vmem:[#allocation2 + $0x146] sm:$0xff]  ;;  %v838_v0 = vmax.f32 %v758_v40, %v798_v49  ;;  %v4753_v28 = vmax.f32 %v993_v56, %v1033_v16  ;;  %v1110_v44 = vmax.f32 %v4652_v26, %v4741_v58  ;;  %727 = vst [vmem:[#allocation2 + $0x1b0] sm:$0xff] %v4744_v3  ;;  %v757_v55 = vld [vmem:[#allocation2 + $0x14e] sm:$0xff]  ;;  %v1140_v47 = vmax.f32 %v4675_v57, %v4741_v58  ;;  %v3744_v40 = vpop.f32.mrb[12].mxu0 }
 0x179   : > { %v796_v4 = vld [vmem:[#allocation2 + $0x147] sm:$0xff]  ;;  %6100 = vst [vmem:[#allocation36_spill] sm:$0xff] %v4751_v1  ;;  %v797_v46 = vld [vmem:[#allocation2 + $0x14f] sm:$0xff]  ;;  %v839_v5 = vmax.f32 %v759_v13, %v799_v45  ;;  %725 = vst [vmem:[#allocation2 + $0x190] sm:$0xff] %v4751_v1  ;;  %v563_v16 = vadd.f32 %v3744_v40, %v4636_v54  ;;  %v554_v22 = vpop.f32.mrb[13].mxu0 }
 0x17a   : > { %v836_v17 = vmax.f32 %v756_v8, %v796_v4  ;;  %v918_v59 = vmax.f32 %v838_v0, %v4685_v63  ;;  %v837_v49 = vmax.f32 %v757_v55, %v797_v46  ;;  %v1111_v4 = vmax.f32 %v4657_v38, %v4753_v28  ;;  %v956_v21 = vld [vmem:[#allocation2 + $0x149] sm:$0xff]  ;;  %v3745_v55 = vpop.f32.mrb[14].mxu0  ;;  %v959_v56 = vld [vmem:[#allocation2 + $0x171] sm:$0xff] }
 0x17b   : > { %v1141_v13 = vmax.f32 %v4689_v2, %v4753_v28  ;;  %v1172_v0 = vmax.f32 %v1140_v47, %v4746_v19  ;;  %v919_v45 = vmax.f32 %v839_v5, %v4701_v15  ;;  %v958_v14 = vld [vmem:[#allocation2 + $0x169] sm:$0xff]  ;;  %v555_v9 = vadd.f32 %v4636_v54, %v554_v22  ;;  %v557_v34 = vpop.f32.mrb[15].mxu0  ;;  %v957_v42 = vld [vmem:[#allocation2 + $0x151] sm:$0xff] }
 0x17c   : > { %v916_v8 = vmax.f32 %v836_v17, %v4693_v7  ;;  %v917_v17 = vmax.f32 %v837_v49, %v4710_v25  ;;  %v998_v43 = vmax.f32 %v918_v59, %v958_v14  ;;  %v4776_v50 = vmax.f32 %v563_v16, 0.0  ;;  %v1036_v20 = vld [vmem:[#allocation2 + $0x14a] sm:$0xff]  ;;  %v1039_v49 = vld [vmem:[#allocation2 + $0x172] sm:$0xff] }
 0x17d   : > { %v566_v40 = vadd.f32 %v3745_v55, %v4636_v54  ;;  %v1173_v47 = vmax.f32 %v1141_v13, %v4748_v48  ;;  %v999_v6 = vmax.f32 %v919_v45, %v959_v56  ;;  %v4780_v5 = vmax.f32 %v555_v9, 0.0  ;;  %v1037_v59 = vld [vmem:[#allocation2 + $0x152] sm:$0xff] }
 0x17e   : > { %v996_v46 = vmax.f32 %v916_v8, %v956_v21  ;;  %6101 = vst [vmem:[#allocation37_spill] sm:$0xff] %v4776_v50  ;;  %v558_v22 = vadd.f32 %v4636_v54, %v557_v34  ;;  %v997_v62 = vmax.f32 %v917_v17, %v957_v42  ;;  %v1038_v21 = vld [vmem:[#allocation2 + $0x16a] sm:$0xff]  ;;  %730 = vst [vmem:[#allocation2 + $0x1e8] sm:$0xff] %v4776_v50 }
 0x17f   : > { %6102 = vst [vmem:[#allocation38_spill] sm:$0xff] %v4780_v5  ;;  %v4786_v14 = vmax.f32 %v566_v40, 0.0  ;;  %v4788_v8 = vmax.f32 %v998_v43, %v1038_v21  ;;  %v4790_v16 = vmax.f32 %v999_v6, %v1039_v49  ;;  %v1142_v56 = vmax.f32 %v1110_v44, %v4746_v19  ;;  %v760_v9 = vld [vmem:[#allocation2 + $0x186] sm:$0xff]  ;;  %728 = vst [vmem:[#allocation2 + $0x1c8] sm:$0xff] %v4780_v5  ;;  %v763_v52 = vld [vmem:[#allocation2 + $0x1ae] sm:$0xff] }
 0x180   : > { %v4783_v60 = vmax.f32 %v996_v46, %v1036_v20  ;;  %v800_v13 = vld [vmem:[#allocation2 + $0x187] sm:$0xff]  ;;  %v4794_v34 = vmax.f32 %v558_v22, 0.0  ;;  %v4796_v42 = vmax.f32 %v997_v62, %v1037_v59  ;;  %v1143_v45 = vmax.f32 %v1111_v4, %v4748_v48  ;;  %v801_v55 = vld [vmem:[#allocation2 + $0x18f] sm:$0xff] }
 0x181   : > { %6103 = vst [vmem:[#allocation39_spill] sm:$0xff] %v4786_v14  ;;  %731 = vst [vmem:[#allocation2 + $0x1f0] sm:$0xff] %v4786_v14  ;;  %v761_v44 = vld [vmem:[#allocation2 + $0x18e] sm:$0xff]  ;;  %v840_v17 = vmax.f32 %v760_v9, %v800_v13  ;;  %v1112_v46 = vmax.f32 %v4741_v58, %v4746_v19 }
 0x182   : > { %6104 = vst [vmem:[#allocation40_spill] sm:$0xff] %v4794_v34  ;;  %v4799_v20 = vmax.f32 %v1172_v0, %v4783_v60  ;;  %v1174_v43 = vmax.f32 %v1142_v56, %v4783_v60  ;;  %729 = vst [vmem:[#allocation2 + $0x1d0] sm:$0xff] %v4794_v34  ;;  %v3748_v0 = vpop.f32.mrb[16].mxu0  ;;  %v4812_v4 = vmax.f32 %v1173_v47, %v4796_v42  ;;  %v803_v53 = vld [vmem:[#allocation2 + $0x1af] sm:$0xff] }
 0x183   : > { %v1175_v40 = vmax.f32 %v1143_v45, %v4796_v42  ;;  %v841_v22 = vmax.f32 %v761_v44, %v801_v55  ;;  %v579_v21 = vadd.f32 %v3748_v0, %v4636_v54  ;;  %v570_v49 = vpop.f32.mrb[17].mxu0  ;;  %v920_v58 = vmax.f32 %v840_v17, %v4738_v36  ;;  %v762_v55 = vld [vmem:[#allocation2 + $0x1a6] sm:$0xff] }
 0x184   : > { %1236 = vst [vmem:[#allocation2 + $0x108] sm:$0xff] %v4799_v20  ;;  %v4818_v59 = vmax.f32 %v1174_v43, %v4788_v8  ;;  %v1113_v56 = vmax.f32 %v4753_v28, %v4748_v48  ;;  %v571_v9 = vadd.f32 %v4636_v54, %v570_v49  ;;  %v3749_v47 = vpop.f32.mrb[18].mxu0  ;;  %1237 = vst [vmem:[#allocation2 + $0x110] sm:$0xff] %v4812_v4  ;;  %v960_v43 = vld [vmem:[#allocation2 + $0x189] sm:$0xff]  ;;  %v961_v49 = vld [vmem:[#allocation2 + $0x191] sm:$0xff] }
 0x185   : > { %v2308_v13 = vpack.c.bf16 %v4812_v4, %v4799_v20  ;;  %v4828_v45 = vmax.f32 %v1175_v40, %v4790_v16  ;;  %v921_v44 = vmax.f32 %v841_v22, %v4751_v1  ;;  %v802_v0 = vld [vmem:[#allocation2 + $0x1a7] sm:$0xff]  ;;  %v4831_v17 = vmax.f32 %v579_v21, 0.0  ;;  %v573_v6 = vpop.f32.mrb[19].mxu0 }
 0x186   : > { %v582_v28 = vadd.f32 %v3749_v47, %v4636_v54  ;;  %1238 = vst [vmem:[#allocation2 + $0x128] sm:$0xff] %v4818_v59  ;;  %v1000_v62 = vmax.f32 %v920_v58, %v960_v43  ;;  %v1144_v61 = vmax.f32 %v1112_v46, %v4783_v60  ;;  %v4836_v40 = vmax.f32 %v571_v9, 0.0  ;;  %v1040_v51 = vld [vmem:[#allocation2 + $0x18a] sm:$0xff]  ;;  %v1041_v58 = vld [vmem:[#allocation2 + $0x192] sm:$0xff] }
 0x187   : > { %v574_v22 = vadd.f32 %v4636_v54, %v573_v6  ;;  %3778 = vmatprep.mubr.bf16.mxu0 %v2308_v13  ;;  %v2309_v21 = vpack.c.bf16 %v4828_v45, %v4818_v59  ;;  %1239 = vst [vmem:[#allocation2 + $0x130] sm:$0xff] %v4828_v45  ;;  %v1001_v47 = vmax.f32 %v921_v44, %v961_v49  ;;  %734 = vst [vmem:[#allocation2 + $0x228] sm:$0xff] %v4831_v17  ;;  %v764_v1 = vld [vmem:[#allocation2 + $0x1c6] sm:$0xff] }
 0x188   : > { %v4843_v36 = vmax.f32 %v582_v28, 0.0  ;;  %v4845_v46 = vmax.f32 %v1000_v62, %v1040_v51  ;;  %v1145_v9 = vmax.f32 %v1113_v56, %v4796_v42  ;;  %v1176_v43 = vmax.f32 %v1144_v61, %v4788_v8  ;;  %732 = vst [vmem:[#allocation2 + $0x208] sm:$0xff] %v4836_v40  ;;  %v804_v63 = vld [vmem:[#allocation2 + $0x1c7] sm:$0xff] }
 0x189   : > { %v4850_v6 = vmax.f32 %v574_v22, 0.0  ;;  %3779 = vmatmul.mubr.bf16.vlgmr.msra.gmra.mrb[32].mxu0 %v2309_v21  ;;  %v4852_v13 = vmax.f32 %v1001_v47, %v1041_v58  ;;  %v842_v44 = vmax.f32 %v762_v55, %v802_v0  ;;  %v843_v49 = vmax.f32 %v763_v52, %v803_v53  ;;  %v3752_v52 = vpop.f32.mrb[20].mxu0  ;;  %v962_v21 = vld [vmem:[#allocation2 + $0x1a9] sm:$0xff]  ;;  %v963_v47 = vld [vmem:[#allocation2 + $0x1b1] sm:$0xff] }
 0x18a   : > { %735 = vst [vmem:[#allocation2 + $0x230] sm:$0xff] %v4843_v36  ;;  %v2285_v51 = vpack.c.bf16 %v4843_v36, %v4831_v17  ;;  %v1177_v62 = vmax.f32 %v1145_v9, %v4790_v16  ;;  %v4859_v61 = vmax.f32 %v1176_v43, %v4845_v46  ;;  %v1114_v56 = vmax.f32 %v4746_v19, %v4783_v60  ;;  %v586_v19 = vpop.f32.mrb[21].mxu0  ;;  %v4179_v9 = vld [vmem:[#allocation8 + $0x88] sm:$0xff]  }
 0x18b   : > { %3811 = vmatpush3.bf16.msra.mxu0 %v4605_v27  ;;  %733 = vst [vmem:[#allocation2 + $0x210] sm:$0xff] %v4850_v6  ;;  %v2284_v53 = vpack.c.bf16 %v4850_v6, %v4836_v40  ;;  %v922_v55 = vmax.f32 %v842_v44, %v4733_v32  ;;  %v923_v0 = vmax.f32 %v843_v49, %v4744_v3  ;;  %v3753_v49 = vpop.f32.mrb[22].mxu0  ;;  %v765_v3 = vld [vmem:[#allocation2 + $0x1ce] sm:$0xff] }
 0x18c   : > { %v1115_v28 = vmax.f32 %v4748_v48, %v4796_v42  ;;  %3812 = vmatprep.subr.bf16.mxu0 %v4609_v29  ;;  %v595_v22 = vadd.f32 %v3752_v52, %v4636_v54  ;;  %v4874_v27 = vmax.f32 %v1177_v62, %v4852_v13  ;;  %1240 = vst [vmem:[#allocation2 + $0x148] sm:$0xff] %v4859_v61  ;;  %v805_v15 = vld [vmem:[#allocation2 + $0x1cf] sm:$0xff]  ;;  %v589_v25 = vpop.f32.mrb[23].mxu0 }
 0x18d   : > { %v1146_v58 = vmax.f32 %v1114_v56, %v4788_v8  ;;  %v844_v43 = vmax.f32 %v764_v1, %v804_v63  ;;  %v587_v44 = vadd.f32 %v4636_v54, %v586_v19  ;;  %3842 = vmatprep.mubr.bf16.mxu1 %v2284_v53  ;;  %v1002_v48 = vmax.f32 %v922_v55, %v962_v21  ;;  %v1042_v63 = vld [vmem:[#allocation2 + $0x1aa] sm:$0xff]  ;;  %v1043_v1 = vld [vmem:[#allocation2 + $0x1b2] sm:$0xff] }
 0x18e   : > { %v1003_v32 = vmax.f32 %v923_v0, %v963_v47  ;;  %v1147_v52 = vmax.f32 %v1115_v28, %v4790_v16  ;;  %v4880_v62 = vmax.f32 %v595_v22, 0.0  ;;  %v598_v7 = vadd.f32 %v3753_v49, %v4636_v54  ;;  %3843 = vmatmul.mubr.bf16.vlgmr.msra.gmra.mrb[0].mxu1 %v2285_v51  ;;  %1241 = vst [vmem:[#allocation2 + $0x150] sm:$0xff] %v4874_v27  ;;  %v766_v47 = vld [vmem:[#allocation2 + $0x1e6] sm:$0xff] }
 0x18f   : > { %v2310_v56 = vpack.c.bf16 %v4874_v27, %v4859_v61  ;;  %v1178_v53 = vmax.f32 %v1146_v58, %v4845_v46  ;;  %3813 = vmatpush3.bf16.msra.mxu0 %v4609_v29  ;;  %v4888_v55 = vmax.f32 %v587_v44, 0.0  ;;  %v590_v0 = vadd.f32 %v4636_v54, %v589_v25  ;;  %3859 = vmatpush3.bf16.msra.mxu1 %v4630_v41  ;;  %v4180_v29 = vld [vmem:[#allocation8 + $0x90] sm:$0xff]   ;;  %v806_v41 = vld [vmem:[#allocation2 + $0x1e7] sm:$0xff] }
 0x190   : > { %v4892_v28 = vmax.f32 %v1002_v48, %v1042_v63  ;;  %v4894_v51 = vmax.f32 %v1003_v32, %v1043_v1  ;;  %3814 = vmatprep.subr.bf16.mxu0 %v4613_v31  ;;  %738 = vst [vmem:[#allocation2 + $0x268] sm:$0xff] %v4880_v62  ;;  %v4898_v22 = vmax.f32 %v598_v7, 0.0  ;;  %v1179_v19 = vmax.f32 %v1147_v52, %v4852_v13  ;;  %v964_v44 = vld [vmem:[#allocation2 + $0x1c9] sm:$0xff]  ;;  %v965_v63 = vld [vmem:[#allocation2 + $0x1d1] sm:$0xff] }
 0x191   : > { %3782 = vmatprep.mubr.bf16.mxu0 %v2310_v56  ;;  %3860 = vmatprep.subr.bf16.mxu1 %v4179_v9  ;;  %v845_v21 = vmax.f32 %v765_v3, %v805_v15  ;;  %v924_v25 = vmax.f32 %v844_v43, %v4780_v5  ;;  %736 = vst [vmem:[#allocation2 + $0x248] sm:$0xff] %v4888_v55  ;;  %v4903_v32 = vmax.f32 %v590_v0, 0.0  ;;  %v767_v52 = vld [vmem:[#allocation2 + $0x1ee] sm:$0xff] }
 0x192   : > { %v4906_v58 = vmax.f32 %v1178_v53, %v4892_v28  ;;  %v1116_v7 = vmax.f32 %v4783_v60, %v4788_v8  ;;  %v1117_v49 = vmax.f32 %v4796_v42, %v4790_v16  ;;  %739 = vst [vmem:[#allocation2 + $0x270] sm:$0xff] %v4898_v22  ;;  %v2287_v15 = vpack.c.bf16 %v4898_v22, %v4880_v62  ;;  %v807_v56 = vld [vmem:[#allocation2 + $0x1ef] sm:$0xff]  ;;  %v3756_v42 = vpop.f32.mrb[24].mxu0 }
 0x193   : > { %v4916_v3 = vmax.f32 %v1179_v19, %v4894_v51  ;;  %v925_v43 = vmax.f32 %v845_v21, %v4794_v34  ;;  %v1004_v48 = vmax.f32 %v924_v25, %v964_v44  ;;  %3815 = vmatpush3.bf16.msra.mxu0 %v4613_v31  ;;  %737 = vst [vmem:[#allocation2 + $0x250] sm:$0xff] %v4903_v32  ;;  %v1044_v1 = vld [vmem:[#allocation2 + $0x1ca] sm:$0xff]  ;;  %v602_v25 = vpop.f32.mrb[25].mxu0 }
 0x194   : > { %v2286_v60 = vpack.c.bf16 %v4903_v32, %v4888_v55  ;;  %1242 = vst [vmem:[#allocation2 + $0x168] sm:$0xff] %v4906_v58  ;;  %3861 = vmatpush3.bf16.msra.mxu1 %v4179_v9  ;;  %v1148_v53 = vmax.f32 %v1116_v7, %v4845_v46  ;;  %v1149_v0 = vmax.f32 %v1117_v49, %v4852_v13  ;;  %v4181_v9 = vld [vmem:[#allocation8 + $0x98] sm:$0xff]   ;;  %v3757_v11 = vpop.f32.mrb[26].mxu0 }
 0x195   : > { %v846_v19 = vmax.f32 %v766_v47, %v806_v41  ;;  %1243 = vst [vmem:[#allocation2 + $0x170] sm:$0xff] %v4916_v3  ;;  %v2311_v31 = vpack.c.bf16 %v4916_v3, %v4906_v58  ;;  %v611_v21 = vadd.f32 %v3756_v42, %v4636_v54  ;;  %3862 = vmatprep.subr.bf16.mxu1 %v4180_v29  ;;  %v1045_v7 = vld [vmem:[#allocation2 + $0x1d2] sm:$0xff]  ;;  %v605_v18 = vpop.f32.mrb[27].mxu0 }
 0x196   : > { %v1005_v44 = vmax.f32 %v925_v43, %v965_v63  ;;  %v4930_v5 = vmax.f32 %v1004_v48, %v1044_v1  ;;  %v603_v34 = vadd.f32 %v4636_v54, %v602_v25  ;;  %3846 = vmatprep.mubr.bf16.mxu1 %v2286_v60  ;;  %v1180_v47 = vmax.f32 %v1148_v53, %v4892_v28  ;;  %v768_v63 = vld [vmem:[#allocation2 + $0x206] sm:$0xff] }
 0x197   : > { %v1181_v41 = vmax.f32 %v1149_v0, %v4894_v51  ;;  %v847_v49 = vmax.f32 %v767_v52, %v807_v56  ;;  %3783 = vmatmul.mubr.bf16.gmra.mrb[36].mxu0 %v2311_v31  ;;  %v4935_v23 = vmax.f32 %v611_v21, 0.0  ;;  %v614_v42 = vadd.f32 %v3757_v11, %v4636_v54  ;;  %3847 = vmatmul.mubr.bf16.gmra.mrb[4].mxu1 %v2287_v15  ;;  %v808_v1 = vld [vmem:[#allocation2 + $0x207] sm:$0xff]  ;;  %v809_v21 = vld [vmem:[#allocation2 + $0x20f] sm:$0xff] }
 0x198   : > { %v4938_v43 = vmax.f32 %v1005_v44, %v1045_v7  ;;  %v926_v48 = vmax.f32 %v846_v19, %v4776_v50  ;;  %v4941_v60 = vmax.f32 %v603_v34, 0.0  ;;  %v606_v53 = vadd.f32 %v4636_v54, %v605_v18  ;;  %3863 = vmatpush3.bf16.msra.mxu1 %v4180_v29  ;;  %v966_v0 = vld [vmem:[#allocation2 + $0x1e9] sm:$0xff]  ;;  %v4182_v11 = vld [vmem:[#allocation8 + $0xa0] sm:$0xff]   ;;  %3816 = vmatprep.subr.bf16.mxu0 %v4617_v33  ;;  %v967_v34 = vld [vmem:[#allocation2 + $0x1f1] sm:$0xff] }
 0x199   : > { %v4945_v52 = vmax.f32 %v1180_v47, %v4930_v5  ;;  %v927_v56 = vmax.f32 %v847_v49, %v4786_v14  ;;  %742 = vst [vmem:[#allocation2 + $0x2a8] sm:$0xff] %v4935_v23  ;;  %v4950_v15 = vmax.f32 %v614_v42, 0.0  ;;  %v1118_v18 = vmax.f32 %v4788_v8, %v4845_v46  ;;  %3864 = vmatprep.subr.bf16.mxu1 %v4181_v9  ;;  %v769_v29 = vld [vmem:[#allocation2 + $0x20e] sm:$0xff]  ;;  %v5038_v14 = vld [vmem:[#allocation2 + $0x106] sm:$0xff] }
 0x19a   : > { %v4953_v19 = vmax.f32 %v1181_v41, %v4938_v43  ;;  %v1006_v31 = vmax.f32 %v926_v48, %v966_v0  ;;  %3817 = vmatpush3.bf16.msra.mxu0 %v4617_v33  ;;  %740 = vst [vmem:[#allocation2 + $0x288] sm:$0xff] %v4941_v60  ;;  %v4959_v25 = vmax.f32 %v606_v53, 0.0  ;;  %v1046_v7 = vld [vmem:[#allocation2 + $0x1ea] sm:$0xff]  ;;  %v1119_v47 = vmax.f32 %v4790_v16, %v4852_v13  ;;  %v1047_v49 = vld [vmem:[#allocation2 + $0x1f2] sm:$0xff]  ;;  %v3760_v53 = vpop.f32.mrb[28].mxu0 }
 0x19b   : > { %1244 = vst [vmem:[#allocation2 + $0x188] sm:$0xff] %v4945_v52  ;;  %v1007_v44 = vmax.f32 %v927_v56, %v967_v34  ;;  %v848_v41 = vmax.f32 %v768_v63, %v808_v1  ;;  %3818 = vmatprep.subr.bf16.mxu0 %v4621_v35  ;;  %743 = vst [vmem:[#allocation2 + $0x2b0] sm:$0xff] %v4950_v15  ;;  %v2289_v8 = vpack.c.bf16 %v4950_v15, %v4935_v23  ;;  %v972_v10 = vld [vmem:[#allocation2 + $0x249] sm:$0xff]  ;;  %v973_v39 = vld [vmem:[#allocation2 + $0x251] sm:$0xff] }
 0x19c   : > { %v2312_v33 = vpack.c.bf16 %v4953_v19, %v4945_v52  ;;  %1245 = vst [vmem:[#allocation2 + $0x190] sm:$0xff] %v4953_v19  ;;  %v4971_v42 = vmax.f32 %v1006_v31, %v1046_v7  ;;  %v1150_v48 = vmax.f32 %v1118_v18, %v4892_v28  ;;  %741 = vst [vmem:[#allocation2 + $0x290] sm:$0xff] %v4959_v25  ;;  %3865 = vmatpush3.bf16.msra.mxu1 %v4181_v9  ;;  %v618_v31 = vpop.f32.mrb[29].mxu0  ;;  %v4183_v7 = vld [vmem:[#allocation8 + $0xa8] sm:$0xff]  }
 0x19d   : > { %v2288_v16 = vpack.c.bf16 %v4959_v25, %v4941_v60  ;;  %v4977_v63 = vmax.f32 %v1007_v44, %v1047_v49  ;;  %v1151_v1 = vmax.f32 %v1119_v47, %v4894_v51  ;;  %v849_v56 = vmax.f32 %v769_v29, %v809_v21  ;;  %3866 = vmatprep.subr.bf16.mxu1 %v4182_v11  ;;  %v3761_v49 = vpop.f32.mrb[30].mxu0  ;;  %v968_v47 = vld [vmem:[#allocation2 + $0x209] sm:$0xff] }
 0x19e   : > { %3786 = vmatprep.mubr.bf16.mxu0 %v2312_v33  ;;  %v1182_v0 = vmax.f32 %v1150_v48, %v4930_v5  ;;  %v627_v34 = vadd.f32 %v3760_v53, %v4636_v54  ;;  %v928_v18 = vmax.f32 %v848_v41, %v4836_v40  ;;  %v619_v44 = vadd.f32 %v4636_v54, %v618_v31  ;;  %v621_v41 = vpop.f32.mrb[31].mxu0  ;;  %v969_v48 = vld [vmem:[#allocation2 + $0x211] sm:$0xff]  ;;  %v770_v53 = vld [vmem:[#allocation2 + $0x226] sm:$0xff] }
 0x19f   : > { %v1183_v50 = vmax.f32 %v1151_v1, %v4938_v43  ;;  %3850 = vmatprep.mubr.bf16.mxu1 %v2288_v16  ;;  %v929_v9 = vmax.f32 %v849_v56, %v4850_v6  ;;  %v1120_v29 = vmax.f32 %v4845_v46, %v4892_v28  ;;  %v630_v40 = vadd.f32 %v3761_v49, %v4636_v54  ;;  %v810_v31 = vld [vmem:[#allocation2 + $0x227] sm:$0xff]  ;;  %v811_v49 = vld [vmem:[#allocation2 + $0x22f] sm:$0xff] }
 0x1a0   : > { %v4989_v21 = vmax.f32 %v1182_v0, %v4971_v42  ;;  %v4991_v33 = vmax.f32 %v627_v34, 0.0  ;;  %3851 = vmatmul.mubr.bf16.gmra.mrb[8].mxu1 %v2289_v8  ;;  %v1008_v1 = vmax.f32 %v928_v18, %v968_v47  ;;  %3819 = vmatpush3.bf16.msra.mxu0 %v4621_v35  ;;  %v4998_v16 = vmax.f32 %v619_v44, 0.0  ;;  %v1048_v0 = vld [vmem:[#allocation2 + $0x20a] sm:$0xff]  ;;  %v1049_v35 = vld [vmem:[#allocation2 + $0x212] sm:$0xff] }
 0x1a1   : > { %v4996_v6 = vmax.f32 %v1183_v50, %v4977_v63  ;;  %v622_v46 = vadd.f32 %v4636_v54, %v621_v41  ;;  %3867 = vmatpush3.bf16.msra.mxu1 %v4182_v11  ;;  %v1009_v56 = vmax.f32 %v929_v9, %v969_v48  ;;  %v771_v34 = vld [vmem:[#allocation2 + $0x22e] sm:$0xff]  ;;  %3820 = vmatprep.subr.bf16.mxu0 %v4625_v37  ;;  %v5004_v8 = vmax.f32 %v630_v40, 0.0  ;;  %v772_v41 = vld [vmem:[#allocation2 + $0x246] sm:$0xff] }
 0x1a2   : > { %6105 = vst [vmem:[#allocation41_spill] sm:$0xff] %v4991_v33  ;;  %1246 = vst [vmem:[#allocation2 + $0x1a8] sm:$0xff] %v4989_v21  ;;  %v5006_v50 = vmax.f32 %v1008_v1, %v1048_v0  ;;  %v1121_v18 = vmax.f32 %v4852_v13, %v4894_v51  ;;  %v1152_v54 = vmax.f32 %v1120_v29, %v4930_v5  ;;  %3868 = vmatprep.subr.bf16.mxu1 %v4183_v7  ;;  %v4184_v40 = vld [vmem:[#allocation8 + $0xb0] sm:$0xff]   ;;  %v812_v48 = vld [vmem:[#allocation2 + $0x247] sm:$0xff] }
 0x1a3   : > { %746 = vst [vmem:[#allocation2 + $0x2e8] sm:$0xff] %v4991_v33  ;;  %6106 = vst [vmem:[#allocation42_spill] sm:$0xff] %v5004_v8  ;;  %v2313_v11 = vpack.c.bf16 %v4996_v6, %v4989_v21  ;;  %v5015_v44 = vmax.f32 %v622_v46, 0.0  ;;  %v5017_v9 = vmax.f32 %v1009_v56, %v1049_v35  ;;  %v850_v47 = vmax.f32 %v770_v53, %v810_v31  ;;  %v773_v35 = vld [vmem:[#allocation2 + $0x24e] sm:$0xff] }
 0x1a4   : > { %1247 = vst [vmem:[#allocation2 + $0x1b0] sm:$0xff] %v4996_v6  ;;  %744 = vst [vmem:[#allocation2 + $0x2c8] sm:$0xff] %v4998_v16  ;;  %v2291_v13 = vpack.c.bf16 %v5004_v8, %v4991_v33  ;;  %v1153_v29 = vmax.f32 %v1121_v18, %v4938_v43  ;;  %v1184_v1 = vmax.f32 %v1152_v54, %v4971_v42  ;;  %3821 = vmatpush3.bf16.msra.mxu0 %v4625_v37  ;;  %v813_v18 = vld [vmem:[#allocation2 + $0x24f] sm:$0xff] }
 0x1a5   : > { %747 = vst [vmem:[#allocation2 + $0x2f0] sm:$0xff] %v5004_v8  ;;  %v851_v0 = vmax.f32 %v771_v34, %v811_v49  ;;  %3787 = vmatmul.mubr.bf16.gmra.mrb[40].mxu0 %v2313_v11  ;;  %745 = vst [vmem:[#allocation2 + $0x2d0] sm:$0xff] %v5015_v44  ;;  %v2290_v53 = vpack.c.bf16 %v5015_v44, %v4998_v16  ;;  %v930_v31 = vmax.f32 %v850_v47, %v4831_v17  ;;  %v970_v54 = vld [vmem:[#allocation2 + $0x229] sm:$0xff]  ;;  %v5040_v17 = vld [vmem:[#allocation8 + $0xb8] sm:$0xff]  }
 0x1a6   : > { %v1122_v46 = vmax.f32 %v4892_v28, %v4930_v5  ;;  %v1123_v56 = vmax.f32 %v4894_v51, %v4938_v43  ;;  %v1185_v34 = vmax.f32 %v1153_v29, %v4977_v63  ;;  %v5035_v37 = vmax.f32 %v1184_v1, %v5006_v50  ;;  %3869 = vmatpush3.bf16.msra.mxu1 %v4183_v7  ;;  %v971_v28 = vld [vmem:[#allocation2 + $0x231] sm:$0xff]  ;;  %v1312_v1 = vld [vmem:[#allocation2 + $0x107] sm:$0xff] }
 0x1a7   : > { %v931_v49 = vmax.f32 %v851_v0, %v4843_v36  ;;  %v852_v11 = vmax.f32 %v772_v41, %v812_v48  ;;  %v1010_v47 = vmax.f32 %v930_v31, %v970_v54  ;;  %3854 = vmatprep.mubr.bf16.mxu1 %v2290_v53  ;;  %3870 = vmatprep.subr.bf16.mxu1 %v4184_v40  ;;  %v5044_v29 = vld [vmem:[#allocation2 + $0x10e] sm:$0xff]  ;;  %v1274_v31 = vld [vmem:[#allocation2 + $0x126] sm:$0xff] }
 0x1a8   : > { %6107 = vst [vmem:[#allocation43_spill] sm:$0xff] %v5035_v37  ;;  %v1154_v51 = vmax.f32 %v1122_v46, %v4971_v42  ;;  %v1155_v24 = vmax.f32 %v1123_v56, %v4977_v63  ;;  %v5047_v36 = vmax.f32 %v1185_v34, %v5017_v9  ;;  %1248 = vst [vmem:[#allocation2 + $0x1c8] sm:$0xff] %v5035_v37  ;;  %v1050_v41 = vld [vmem:[#allocation2 + $0x22a] sm:$0xff]  ;;  %3855 = vmatmul.mubr.bf16.gmra.mrb[12].mxu1 %v2291_v13  ;;  %v1051_v53 = vld [vmem:[#allocation2 + $0x232] sm:$0xff] }
 0x1a9   : > { %v1011_v7 = vmax.f32 %v931_v49, %v971_v28  ;;  %v853_v48 = vmax.f32 %v773_v35, %v813_v18  ;;  %v932_v0 = vmax.f32 %v852_v11, %v4888_v55  ;;  %v1275_v46 = vld [vmem:[#allocation2 + $0x12e] sm:$0xff]  ;;  %v5051_v12 = vmax.f32 %v1010_v47, %v1050_v41  ;;  %v5057_v13 = vld [vmem:[#allocation8 + $0xc0] sm:$0xff]  }
 0x1aa   : > { %6108 = vst [vmem:[#allocation44_spill] sm:$0xff] %v5047_v36  ;;  %v1313_v54 = vld [vmem:[#allocation2 + $0x10f] sm:$0xff]  ;;  %v1314_v56 = vld [vmem:[#allocation2 + $0x127] sm:$0xff]  ;;  %v1186_v30 = vmax.f32 %v1154_v51, %v5006_v50  ;;  %v1187_v34 = vmax.f32 %v1155_v24, %v5017_v9  ;;  %v1124_v49 = vmax.f32 %v4930_v5, %v4971_v42  ;;  %v2314_v55 = vpack.c.bf16 %v5047_v36, %v5035_v37 }
 0x1ab   : > { %v1315_v28 = vld [vmem:[#allocation2 + $0x12f] sm:$0xff]  ;;  %1249 = vst [vmem:[#allocation2 + $0x1d0] sm:$0xff] %v5047_v36  ;;  %v5062_v18 = vmax.f32 %v1011_v7, %v1051_v53  ;;  %3871 = vmatpush3.bf16.msra.mxu1 %v4184_v40  ;;  %v933_v11 = vmax.f32 %v853_v48, %v4903_v32  ;;  %v1012_v24 = vmax.f32 %v932_v0, %v972_v10  ;;  %v1276_v47 = vld [vmem:[#allocation2 + $0x146] sm:$0xff] }
 0x1ac   : > { %v4194_v35 = vld [vmem:[#allocation8 + $0x30] sm:$0xff]   ;;  %v1316_v41 = vld [vmem:[#allocation2 + $0x147] sm:$0xff]  ;;  %v5066_v5 = vmax.f32 %v1186_v30, %v5051_v12  ;;  %v1125_v33 = vmax.f32 %v4938_v43, %v4977_v63  ;;  %v1156_v37 = vmax.f32 %v1124_v49, %v5006_v50  ;;  %v1352_v7 = vmax.f32 %v5038_v14, %v1312_v1  ;;  %3872 = vmatprep.subr.bf16.mxu1 %v5040_v17 }
 0x1ad   : > { %3822 = vmatprep.subr.bf16.mxu0 %v4194_v35  ;;  %v1277_v51 = vld [vmem:[#allocation2 + $0x14e] sm:$0xff]  ;;  %3790 = vmatprep.mubr.bf16.mxu0 %v2314_v55  ;;  %v5074_v10 = vmax.f32 %v1187_v34, %v5062_v18  ;;  %v1013_v32 = vmax.f32 %v933_v11, %v973_v39  ;;  %v1353_v30 = vmax.f32 %v5044_v29, %v1313_v54  ;;  %v774_v29 = vld [vmem:[#allocation2 + $0x266] sm:$0xff] }
 0x1ae   : > { %v1052_v8 = vld [vmem:[#allocation2 + $0x24a] sm:$0xff]  ;;  %1250 = vst [vmem:[#allocation2 + $0x1e8] sm:$0xff] %v5066_v5  ;;  %v1053_v48 = vld [vmem:[#allocation2 + $0x252] sm:$0xff]  ;;  %v1157_v43 = vmax.f32 %v1125_v33, %v5017_v9  ;;  %v1188_v0 = vmax.f32 %v1156_v37, %v5051_v12  ;;  %v1354_v53 = vmax.f32 %v1274_v31, %v1314_v56  ;;  %v1355_v14 = vmax.f32 %v1275_v46, %v1315_v28 }
 0x1af   : > { %v1317_v36 = vld [vmem:[#allocation2 + $0x14f] sm:$0xff]  ;;  %v5076_v40 = vmax.f32 %v1012_v24, %v1052_v8  ;;  %3823 = vmatpush3.bf16.msra.mxu0 %v4194_v35  ;;  %v2315_v1 = vpack.c.bf16 %v5074_v10, %v5066_v5  ;;  %1251 = vst [vmem:[#allocation2 + $0x1f0] sm:$0xff] %v5074_v10  ;;  %v5085_v39 = vmax.f32 %v1013_v32, %v1053_v48  ;;  %v814_v54 = vld [vmem:[#allocation2 + $0x267] sm:$0xff] }
 0x1b0   : > { %v1356_v8 = vmax.f32 %v1276_v47, %v1316_v41  ;;  %v1357_v34 = vmax.f32 %v1277_v51, %v1317_v36  ;;  %3873 = vmatpush3.bf16.msra.mxu1 %v5040_v17  ;;  %v1189_v33 = vmax.f32 %v1157_v43, %v5062_v18  ;;  %v1432_v31 = vmax.f32 %v1352_v7, %v4799_v20  ;;  %v1472_v56 = vld [vmem:[#allocation2 + $0x109] sm:$0xff]  ;;  %v1473_v49 = vld [vmem:[#allocation2 + $0x111] sm:$0xff] }
 0x1b1   : > { %v5090_v37 = vmax.f32 %v1188_v0, %v5076_v40  ;;  %v1433_v46 = vmax.f32 %v1353_v30, %v4812_v4  ;;  %v1474_v28 = vld [vmem:[#allocation2 + $0x129] sm:$0xff]  ;;  %3906 = vmatprep.subr.bf16.mxu1 %v5057_v13  ;;  %3791 = vmatmul.mubr.bf16.gmra.mrb[44].mxu0 %v2315_v1  ;;  %v1434_v36 = vmax.f32 %v1354_v53, %v4818_v59  ;;  %v1475_v11 = vld [vmem:[#allocation2 + $0x131] sm:$0xff] }
 0x1b2   : > { %v1435_v35 = vmax.f32 %v1355_v14, %v4828_v45  ;;  %v1436_v17 = vmax.f32 %v1356_v8, %v4859_v61  ;;  %v1437_v55 = vmax.f32 %v1357_v34, %v4874_v27  ;;  %v775_v24 = vld [vmem:[#allocation2 + $0x26e] sm:$0xff]  ;;  %v5100_v20 = vmax.f32 %v1189_v33, %v5085_v39  ;;  %v4195_v30 = vld [vmem:[#allocation8 + $0x38] sm:$0xff]   ;;  %v1278_v33 = vld [vmem:[#allocation2 + $0x166] sm:$0xff] }
 0x1b3   : > { %v815_v47 = vld [vmem:[#allocation2 + $0x26f] sm:$0xff]  ;;  %1252 = vst [vmem:[#allocation2 + $0x208] sm:$0xff] %v5090_v37  ;;  %v1512_v41 = vmax.f32 %v1432_v31, %v1472_v56  ;;  %v1513_v7 = vmax.f32 %v1433_v46, %v1473_v49  ;;  %v854_v59 = vmax.f32 %v774_v29, %v814_v54  ;;  %3824 = vmatprep.subr.bf16.mxu0 %v4195_v30 }
 0x1b4   : > { %v1476_v4 = vld [vmem:[#allocation2 + $0x149] sm:$0xff]  ;;  %v1477_v51 = vld [vmem:[#allocation2 + $0x151] sm:$0xff]  ;;  %v1514_v45 = vmax.f32 %v1434_v36, %v1474_v28  ;;  %v1515_v61 = vmax.f32 %v1435_v35, %v1475_v11  ;;  %3825 = vmatpush3.bf16.msra.mxu0 %v4195_v30  ;;  %v2316_v14 = vpack.c.bf16 %v5100_v20, %v5090_v37  ;;  %1253 = vst [vmem:[#allocation2 + $0x210] sm:$0xff] %v5100_v20 }
 0x1b5   : > { %v1552_v32 = vld [vmem:[#allocation2 + $0x10a] sm:$0xff]  ;;  %v1516_v48 = vmax.f32 %v1436_v17, %v1476_v4  ;;  %v1517_v27 = vmax.f32 %v1437_v55, %v1477_v51  ;;  %v1553_v43 = vld [vmem:[#allocation2 + $0x112] sm:$0xff]  ;;  %v855_v54 = vmax.f32 %v775_v24, %v815_v47  ;;  %v934_v47 = vmax.f32 %v854_v59, %v4880_v62 }
 0x1b6   : > { %v1554_v0 = vld [vmem:[#allocation2 + $0x12a] sm:$0xff]  ;;  %v1555_v53 = vld [vmem:[#allocation2 + $0x132] sm:$0xff]  ;;  %v5106_v34 = vmax.f32 %v1512_v41, %v1552_v32  ;;  %v5108_v29 = vmax.f32 %v1513_v7, %v1553_v43  ;;  %3794 = vmatprep.mubr.bf16.mxu0 %v2316_v14  ;;  %v1126_v51 = vmax.f32 %v4971_v42, %v5006_v50  ;;  %v1127_v41 = vmax.f32 %v4977_v63, %v5017_v9 }
 0x1b7   : > { %v1556_v1 = vld [vmem:[#allocation2 + $0x14a] sm:$0xff]  ;;  %v1557_v8 = vld [vmem:[#allocation2 + $0x152] sm:$0xff]  ;;  %v5110_v31 = vmax.f32 %v1514_v45, %v1554_v0  ;;  %v5112_v46 = vmax.f32 %v1515_v61, %v1555_v53  ;;  %v935_v4 = vmax.f32 %v855_v54, %v4898_v22 }
 0x1b8   : > { %v5114_v56 = vmax.f32 %v1516_v48, %v1556_v1  ;;  %v5116_v49 = vmax.f32 %v1517_v27, %v1557_v8  ;;  %v1279_v28 = vld [vmem:[#allocation2 + $0x16e] sm:$0xff]  ;;  %v1630_v17 = vmax.f32 %v4652_v26, %v5106_v34  ;;  %v1631_v55 = vmax.f32 %v4657_v38, %v5108_v29  ;;  %v776_v0 = vld [vmem:[#allocation2 + $0x286] sm:$0xff] }
 0x1b9   : > { %v1318_v36 = vld [vmem:[#allocation2 + $0x167] sm:$0xff]  ;;  %v1319_v35 = vld [vmem:[#allocation2 + $0x16f] sm:$0xff]  ;;  %v1660_v11 = vmax.f32 %v4675_v57, %v5106_v34  ;;  %v1661_v24 = vmax.f32 %v4689_v2, %v5108_v29  ;;  %v1158_v22 = vmax.f32 %v1126_v51, %v5051_v12  ;;  %v1159_v59 = vmax.f32 %v1127_v41, %v5062_v18 }
 0x1ba   : > { %v974_v7 = vld [vmem:[#allocation2 + $0x269] sm:$0xff]  ;;  %v975_v32 = vld [vmem:[#allocation2 + $0x271] sm:$0xff]  ;;  %v1358_v57 = vmax.f32 %v1278_v33, %v1318_v36  ;;  %v1359_v30 = vmax.f32 %v1279_v28, %v1319_v35  ;;  %v1663_v41 = vmax.f32 %v1631_v55, %v5112_v46 }
 0x1bb   : > { %v1692_v26 = vmax.f32 %v1660_v11, %v5110_v31  ;;  %v1693_v38 = vmax.f32 %v1661_v24, %v5112_v46  ;;  %v1014_v45 = vmax.f32 %v934_v47, %v974_v7  ;;  %v1015_v2 = vmax.f32 %v935_v4, %v975_v32  ;;  %v1054_v61 = vld [vmem:[#allocation2 + $0x26a] sm:$0xff]  ;;  %v1055_v62 = vld [vmem:[#allocation2 + $0x272] sm:$0xff] }
 0x1bc   : > { %v1438_v48 = vmax.f32 %v1358_v57, %v4906_v58  ;;  %v1439_v27 = vmax.f32 %v1359_v30, %v4916_v3  ;;  %v1478_v43 = vld [vmem:[#allocation2 + $0x169] sm:$0xff]  ;;  %v1190_v8 = vmax.f32 %v1158_v22, %v5076_v40  ;;  %v1191_v54 = vmax.f32 %v1159_v59, %v5085_v39  ;;  %v1479_v33 = vld [vmem:[#allocation2 + $0x171] sm:$0xff] }
 0x1bd   : > { %v1724_v42 = vmax.f32 %v1692_v26, %v5114_v56  ;;  %v1725_v63 = vmax.f32 %v1693_v38, %v5116_v49  ;;  %v816_v53 = vld [vmem:[#allocation2 + $0x287] sm:$0xff]  ;;  %v5140_v14 = vmax.f32 %v1014_v45, %v1054_v61  ;;  %v5142_v1 = vmax.f32 %v1015_v2, %v1055_v62  ;;  %v817_v36 = vld [vmem:[#allocation2 + $0x28f] sm:$0xff] }
 0x1be   : > { %v777_v28 = vld [vmem:[#allocation2 + $0x28e] sm:$0xff]  ;;  %v1518_v58 = vmax.f32 %v1438_v48, %v1478_v43  ;;  %v1519_v11 = vmax.f32 %v1439_v27, %v1479_v33  ;;  %v1662_v24 = vmax.f32 %v1630_v17, %v5110_v31  ;;  %v856_v26 = vmax.f32 %v776_v0, %v816_v53  ;;  %v1280_v38 = vld [vmem:[#allocation2 + $0x186] sm:$0xff] }
 0x1bf   : > { %v2759_v35 = vpack.c.bf16 %v1725_v63, %v1724_v42  ;;  %1756 = vst [vmem:[#allocation2 + $0x108] sm:$0xff] %v1724_v42  ;;  %1757 = vst [vmem:[#allocation2 + $0x110] sm:$0xff] %v1725_v63  ;;  %v1558_v3 = vld [vmem:[#allocation2 + $0x16a] sm:$0xff]  ;;  %v5148_v47 = vmax.f32 %v1190_v8, %v5140_v14  ;;  %v5151_v4 = vmax.f32 %v1191_v54, %v5142_v1  ;;  %v1559_v51 = vld [vmem:[#allocation2 + $0x172] sm:$0xff] }
 0x1c0   : > { %v1320_v7 = vld [vmem:[#allocation2 + $0x187] sm:$0xff]  ;;  %v5154_v32 = vmax.f32 %v1518_v58, %v1558_v3  ;;  %v5156_v57 = vmax.f32 %v1519_v11, %v1559_v51  ;;  %v1694_v30 = vmax.f32 %v1662_v24, %v5114_v56  ;;  %v857_v17 = vmax.f32 %v777_v28, %v817_v36  ;;  %v1321_v2 = vld [vmem:[#allocation2 + $0x18f] sm:$0xff] }
 0x1c1   : > { %3874 = vmatprep.mubr.bf16.mxu1 %v2759_v35  ;;  %v1281_v45 = vld [vmem:[#allocation2 + $0x18e] sm:$0xff]  ;;  %v2317_v61 = vpack.c.bf16 %v5151_v4, %v5148_v47  ;;  %1254 = vst [vmem:[#allocation2 + $0x228] sm:$0xff] %v5148_v47  ;;  %1255 = vst [vmem:[#allocation2 + $0x230] sm:$0xff] %v5151_v4  ;;  %v1695_v55 = vmax.f32 %v1663_v41, %v5116_v49  ;;  %v936_v62 = vmax.f32 %v856_v26, %v4941_v60  ;;  %v778_v35 = vld [vmem:[#allocation2 + $0x2a6] sm:$0xff] }
 0x1c2   : > { %v1128_v22 = vmax.f32 %v5006_v50, %v5051_v12  ;;  %v1726_v59 = vmax.f32 %v1694_v30, %v5154_v32  ;;  %v937_v42 = vmax.f32 %v857_v17, %v4959_v25  ;;  %v976_v63 = vld [vmem:[#allocation2 + $0x289] sm:$0xff]  ;;  %v1129_v48 = vmax.f32 %v5017_v9, %v5062_v18  ;;  %v977_v0 = vld [vmem:[#allocation2 + $0x291] sm:$0xff] }
 0x1c3   : > { %v1360_v27 = vmax.f32 %v1280_v38, %v1320_v7  ;;  %3795 = vmatmul.mubr.bf16.gmra.mrb[48].mxu0 %v2317_v61  ;;  %v1727_v43 = vmax.f32 %v1695_v55, %v5156_v57  ;;  %v1016_v53 = vmax.f32 %v936_v62, %v976_v63  ;;  %v1056_v8 = vld [vmem:[#allocation2 + $0x28a] sm:$0xff]  ;;  %v1361_v54 = vmax.f32 %v1281_v45, %v1321_v2  ;;  %v1057_v28 = vld [vmem:[#allocation2 + $0x292] sm:$0xff] }
 0x1c4   : > { %v1160_v60 = vmax.f32 %v1128_v22, %v5076_v40  ;;  %v5173_v33 = vld [vmem:[#allocation8 + $0xc8] sm:$0xff]   ;;  %1758 = vst [vmem:[#allocation2 + $0x128] sm:$0xff] %v1726_v59  ;;  %v1017_v50 = vmax.f32 %v937_v42, %v977_v0  ;;  %v1161_v25 = vmax.f32 %v1129_v48, %v5085_v39  ;;  %v1632_v9 = vmax.f32 %v5106_v34, %v5110_v31  ;;  %v1481_v30 = vld [vmem:[#allocation2 + $0x191] sm:$0xff] }
 0x1c5   : > { %v1440_v36 = vmax.f32 %v1360_v27, %v4945_v52  ;;  %v818_v58 = vld [vmem:[#allocation2 + $0x2a7] sm:$0xff]  ;;  %v2760_v11 = vpack.c.bf16 %v1727_v43, %v1726_v59  ;;  %1759 = vst [vmem:[#allocation2 + $0x130] sm:$0xff] %v1727_v43  ;;  %v5179_v3 = vmax.f32 %v1016_v53, %v1056_v8  ;;  %v1441_v51 = vmax.f32 %v1361_v54, %v4953_v19  ;;  %v819_v38 = vld [vmem:[#allocation2 + $0x2af] sm:$0xff] }
 0x1c6   : > { %v1192_v24 = vmax.f32 %v1160_v60, %v5140_v14  ;;  %v1480_v41 = vld [vmem:[#allocation2 + $0x189] sm:$0xff]  ;;  %v5183_v7 = vmax.f32 %v1017_v50, %v1057_v28  ;;  %v1193_v52 = vmax.f32 %v1161_v25, %v5142_v1  ;;  %v1633_v34 = vmax.f32 %v5108_v29, %v5112_v46  ;;  %v1561_v22 = vld [vmem:[#allocation2 + $0x192] sm:$0xff] }
 0x1c7   : > { %v779_v26 = vld [vmem:[#allocation2 + $0x2ae] sm:$0xff]  ;;  %v1520_v17 = vmax.f32 %v1440_v36, %v1480_v41  ;;  %3875 = vmatmul.mubr.bf16.vlgmr.msra.gmra.mrb[16].mxu1 %v2760_v11  ;;  %v1521_v2 = vmax.f32 %v1441_v51, %v1481_v30  ;;  %v1664_v19 = vmax.f32 %v1632_v9, %v5114_v56  ;;  %v858_v55 = vmax.f32 %v778_v35, %v818_v58  ;;  %v1282_v63 = vld [vmem:[#allocation2 + $0x1a6] sm:$0xff] }
 0x1c8   : > { %v5189_v45 = vmax.f32 %v1192_v24, %v5179_v3  ;;  %v1560_v61 = vld [vmem:[#allocation2 + $0x18a] sm:$0xff]  ;;  %3907 = vmatpush3.bf16.msra.mxu1 %v5057_v13  ;;  %v5194_v62 = vmax.f32 %v1193_v52, %v5183_v7  ;;  %v1665_v42 = vmax.f32 %v1633_v34, %v5116_v49  ;;  %v859_v29 = vmax.f32 %v779_v26, %v819_v38  ;;  %v1059_v41 = vld [vmem:[#allocation2 + $0x2b2] sm:$0xff] }
 0x1c9   : > { %v5196_v59 = vmax.f32 %v1520_v17, %v1560_v61  ;;  %v1322_v48 = vld [vmem:[#allocation2 + $0x1a7] sm:$0xff]  ;;  %v5200_v27 = vmax.f32 %v1521_v2, %v1561_v22  ;;  %v1696_v43 = vmax.f32 %v1664_v19, %v5154_v32  ;;  %v938_v0 = vmax.f32 %v858_v55, %v4935_v23  ;;  %3908 = vmatprep.subr.bf16.mxu1 %v5173_v33  ;;  %v1323_v8 = vld [vmem:[#allocation2 + $0x1af] sm:$0xff] }
 0x1ca   : > { %1256 = vst [vmem:[#allocation2 + $0x248] sm:$0xff] %v5189_v45  ;;  %v1130_v13 = vmax.f32 %v5051_v12, %v5076_v40  ;;  %v1283_v53 = vld [vmem:[#allocation2 + $0x1ae] sm:$0xff]  ;;  %v2318_v60 = vpack.c.bf16 %v5194_v62, %v5189_v45  ;;  %1257 = vst [vmem:[#allocation2 + $0x250] sm:$0xff] %v5194_v62  ;;  %v1697_v54 = vmax.f32 %v1665_v42, %v5156_v57  ;;  %v780_v38 = vld [vmem:[#allocation2 + $0x2c6] sm:$0xff] }
 0x1cb   : > { %v939_v50 = vmax.f32 %v859_v29, %v4950_v15  ;;  %v978_v28 = vld [vmem:[#allocation2 + $0x2a9] sm:$0xff]  ;;  %v1131_v23 = vmax.f32 %v5062_v18, %v5085_v39  ;;  %v1728_v12 = vmax.f32 %v1696_v43, %v5196_v59  ;;  %v979_v36 = vld [vmem:[#allocation2 + $0x2b1] sm:$0xff]  ;;  %v1362_v58 = vmax.f32 %v1282_v63, %v1322_v48 }
 0x1cc   : > { %v4188_v25 = vld [vmem:[#allocation8 + $0xd0] sm:$0xff]   ;;  %v1018_v9 = vmax.f32 %v938_v0, %v978_v28  ;;  %v1162_v35 = vmax.f32 %v1130_v13, %v5140_v14  ;;  %3798 = vmatprep.mubr.bf16.mxu0 %v2318_v60  ;;  %v1729_v11 = vmax.f32 %v1697_v54, %v5200_v27  ;;  %v1363_v26 = vmax.f32 %v1283_v53, %v1323_v8  ;;  %v820_v2 = vld [vmem:[#allocation2 + $0x2c7] sm:$0xff]  ;;  %v4189_v63 = vld [vmem:[#allocation8 + $0xd8] sm:$0xff]  }
 0x1cd   : > { %v1019_v24 = vmax.f32 %v939_v50, %v979_v36  ;;  %v1058_v51 = vld [vmem:[#allocation2 + $0x2aa] sm:$0xff]  ;;  %v1163_v15 = vmax.f32 %v1131_v23, %v5142_v1  ;;  %1760 = vst [vmem:[#allocation2 + $0x148] sm:$0xff] %v1728_v12  ;;  %v1442_v30 = vmax.f32 %v1362_v58, %v4989_v21  ;;  %v1634_v17 = vmax.f32 %v5110_v31, %v5114_v56 }
 0x1ce   : > { %v5218_v18 = vmax.f32 %v1018_v9, %v1058_v51  ;;  %v1194_v52 = vmax.f32 %v1162_v35, %v5179_v3  ;;  %3909 = vmatpush3.bf16.msra.mxu1 %v5173_v33  ;;  %v781_v34 = vld [vmem:[#allocation2 + $0x2ce] sm:$0xff]  ;;  %v2761_v19 = vpack.c.bf16 %v1729_v11, %v1728_v12  ;;  %1761 = vst [vmem:[#allocation2 + $0x150] sm:$0xff] %v1729_v11  ;;  %v1284_v54 = vld [vmem:[#allocation2 + $0x1c6] sm:$0xff] }
 0x1cf   : > { %v821_v61 = vld [vmem:[#allocation2 + $0x2cf] sm:$0xff]  ;;  %v5225_v55 = vmax.f32 %v1019_v24, %v1059_v41  ;;  %v1195_v22 = vmax.f32 %v1163_v15, %v5183_v7  ;;  %v1443_v42 = vmax.f32 %v1363_v26, %v4996_v6  ;;  %3910 = vmatprep.subr.bf16.mxu1 %v4188_v25  ;;  %v1635_v33 = vmax.f32 %v5112_v46, %v5116_v49  ;;  %v1324_v36 = vld [vmem:[#allocation2 + $0x1c7] sm:$0xff] }
 0x1d0   : > { %v1482_v29 = vld [vmem:[#allocation2 + $0x1a9] sm:$0xff]  ;;  %v5230_v21 = vmax.f32 %v1194_v52, %v5218_v18  ;;  %v1483_v31 = vld [vmem:[#allocation2 + $0x1b1] sm:$0xff]  ;;  %v1666_v43 = vmax.f32 %v1634_v17, %v5154_v32  ;;  %3878 = vmatprep.mubr.bf16.mxu1 %v2761_v19  ;;  %v860_v8 = vmax.f32 %v780_v38, %v820_v2  ;;  %v861_v60 = vmax.f32 %v781_v34, %v821_v61  ;;  %v4190_v51 = vld [vmem:[#allocation8 + $0xe0] sm:$0xff]  }
 0x1d1   : > { %v1522_v48 = vmax.f32 %v1442_v30, %v1482_v29  ;;  %v5236_v0 = vmax.f32 %v1195_v22, %v5225_v55  ;;  %v1523_v13 = vmax.f32 %v1443_v42, %v1483_v31  ;;  %v1562_v53 = vld [vmem:[#allocation2 + $0x1aa] sm:$0xff]  ;;  %v1563_v6 = vld [vmem:[#allocation2 + $0x1b2] sm:$0xff]  ;;  %v1667_v28 = vmax.f32 %v1635_v33, %v5156_v57 }
 0x1d2   : > { %1258 = vst [vmem:[#allocation2 + $0x268] sm:$0xff] %v5230_v21  ;;  %v1698_v46 = vmax.f32 %v1666_v43, %v5196_v59  ;;  %v1132_v23 = vmax.f32 %v5076_v40, %v5140_v14  ;;  %v1285_v12 = vld [vmem:[#allocation2 + $0x1ce] sm:$0xff]  ;;  %3911 = vmatpush3.bf16.msra.mxu1 %v4188_v25  ;;  %v940_v11 = vmax.f32 %v860_v8, %v4998_v16  ;;  %v6110_v43 = vld [vmem:[#allocation44_spill] sm:$0xff] }
 0x1d3   : > { %v5239_v50 = vmax.f32 %v1522_v48, %v1562_v53  ;;  %v1325_v9 = vld [vmem:[#allocation2 + $0x1cf] sm:$0xff]  ;;  %v2319_v35 = vpack.c.bf16 %v5236_v0, %v5230_v21  ;;  %1259 = vst [vmem:[#allocation2 + $0x270] sm:$0xff] %v5236_v0  ;;  %v5248_v58 = vmax.f32 %v1523_v13, %v1563_v6  ;;  %v941_v24 = vmax.f32 %v861_v60, %v5015_v44  ;;  %v822_v42 = vld [vmem:[#allocation2 + $0x2e7] sm:$0xff] }
 0x1d4   : > { %3912 = vmatprep.subr.bf16.mxu1 %v4189_v63  ;;  %v1699_v41 = vmax.f32 %v1667_v28, %v5200_v27  ;;  %v980_v15 = vld [vmem:[#allocation2 + $0x2c9] sm:$0xff]  ;;  %v981_v26 = vld [vmem:[#allocation2 + $0x2d1] sm:$0xff]  ;;  %v1133_v25 = vmax.f32 %v5085_v39, %v5142_v1  ;;  %v1164_v38 = vmax.f32 %v1132_v23, %v5179_v3  ;;  %v1364_v16 = vmax.f32 %v1284_v54, %v1324_v36 }
 0x1d5   : > { %v1730_v40 = vmax.f32 %v1698_v46, %v5239_v50  ;;  %3799 = vmatmul.mubr.bf16.gmra.mrb[52].mxu0 %v2319_v35  ;;  %v1020_v52 = vmax.f32 %v940_v11, %v980_v15  ;;  %v1021_v30 = vmax.f32 %v941_v24, %v981_v26  ;;  %v1060_v17 = vld [vmem:[#allocation2 + $0x2ca] sm:$0xff]  ;;  %v1365_v34 = vmax.f32 %v1285_v12, %v1325_v9  ;;  %v1061_v2 = vld [vmem:[#allocation2 + $0x2d2] sm:$0xff] }
 0x1d6   : > { %v1731_v44 = vmax.f32 %v1699_v41, %v5248_v58  ;;  %v1165_v61 = vmax.f32 %v1133_v25, %v5183_v7  ;;  %v1196_v19 = vmax.f32 %v1164_v38, %v5218_v18  ;;  %v1636_v22 = vmax.f32 %v5114_v56, %v5154_v32  ;;  %v782_v39 = vld [vmem:[#allocation2 + $0x2e6] sm:$0xff]  ;;  %3913 = vmatpush3.bf16.msra.mxu1 %v4189_v63  ;;  %v6109_v48 = vld [vmem:[#allocation43_spill] sm:$0xff] }
 0x1d7   : > { %1762 = vst [vmem:[#allocation2 + $0x168] sm:$0xff] %v1730_v40  ;;  %v5262_v29 = vmax.f32 %v1020_v52, %v1060_v17  ;;  %v5264_v31 = vmax.f32 %v1021_v30, %v1061_v2  ;;  %v1444_v33 = vmax.f32 %v1364_v16, %v6109_v48  ;;  %v1445_v13 = vmax.f32 %v1365_v34, %v6110_v43  ;;  %v783_v53 = vld [vmem:[#allocation2 + $0x2ee] sm:$0xff]  ;;  %v6111_v25 = vld [vmem:[#allocation41_spill] sm:$0xff] }
 0x1d8   : > { %v823_v6 = vld [vmem:[#allocation2 + $0x2ef] sm:$0xff]  ;;  %3914 = vmatprep.subr.bf16.mxu1 %v4190_v51  ;;  %v2762_v8 = vpack.c.bf16 %v1731_v44, %v1730_v40  ;;  %1763 = vst [vmem:[#allocation2 + $0x170] sm:$0xff] %v1731_v44  ;;  %v1197_v60 = vmax.f32 %v1165_v61, %v5225_v55  ;;  %v1637_v63 = vmax.f32 %v5116_v49, %v5156_v57 }
 0x1d9   : > { %v1484_v54 = vld [vmem:[#allocation2 + $0x1c9] sm:$0xff]  ;;  %v1485_v56 = vld [vmem:[#allocation2 + $0x1d1] sm:$0xff]  ;;  %v1668_v28 = vmax.f32 %v1636_v22, %v5196_v59  ;;  %v5273_v23 = vmax.f32 %v1196_v19, %v5262_v29  ;;  %v862_v9 = vmax.f32 %v782_v39, %v822_v42  ;;  %v863_v49 = vmax.f32 %v783_v53, %v823_v6 }
 0x1da   : > { %v4191_v46 = vld [vmem:[#allocation8 + $0xe8] sm:$0xff]   ;;  %v1524_v12 = vmax.f32 %v1444_v33, %v1484_v54  ;;  %v1525_v36 = vmax.f32 %v1445_v13, %v1485_v56  ;;  %3879 = vmatmul.mubr.bf16.gmra.mrb[20].mxu1 %v2762_v8  ;;  %v5276_v35 = vmax.f32 %v1197_v60, %v5264_v31  ;;  %v1565_v24 = vld [vmem:[#allocation2 + $0x1d2] sm:$0xff]  ;;  %v1669_v41 = vmax.f32 %v1637_v63, %v5200_v27 }
 0x1db   : > { %v1564_v11 = vld [vmem:[#allocation2 + $0x1ca] sm:$0xff]  ;;  %v1700_v40 = vmax.f32 %v1668_v28, %v5239_v50  ;;  %1260 = vst [vmem:[#allocation2 + $0x288] sm:$0xff] %v5273_v23  ;;  %v942_v38 = vmax.f32 %v862_v9, %v6111_v25  ;;  %v1134_v52 = vmax.f32 %v5140_v14, %v5179_v3  ;;  %3915 = vmatpush3.bf16.msra.mxu1 %v4190_v51  ;;  %v1063_v60 = vld [vmem:[#allocation2 + $0x2f2] sm:$0xff] }
 0x1dc   : > { %v5281_v15 = vmax.f32 %v1524_v12, %v1564_v11  ;;  %v5283_v26 = vmax.f32 %v1525_v36, %v1565_v24  ;;  %v4192_v30 = vld [vmem:[#allocation8 + $0xf0] sm:$0xff]   ;;  %v2320_v17 = vpack.c.bf16 %v5276_v35, %v5273_v23  ;;  %1261 = vst [vmem:[#allocation2 + $0x290] sm:$0xff] %v5276_v35  ;;  %v1701_v16 = vmax.f32 %v1669_v41, %v5248_v58  ;;  %v6112_v34 = vld [vmem:[#allocation42_spill] sm:$0xff]  ;;  %v4193_v24 = vld [vmem:[#allocation8 + $0xf8] sm:$0xff]  }
 0x1dd   : > { %v943_v44 = vmax.f32 %v863_v49, %v6112_v34  ;;  %v982_v2 = vld [vmem:[#allocation2 + $0x2e9] sm:$0xff]  ;;  %v1135_v61 = vmax.f32 %v5142_v1, %v5183_v7  ;;  %3916 = vmatprep.subr.bf16.mxu1 %v4191_v46  ;;  %v983_v51 = vld [vmem:[#allocation2 + $0x2f1] sm:$0xff]  ;;  %v1166_v42 = vmax.f32 %v1134_v52, %v5218_v18  ;;  %v1136_v48 = vmax.f32 %v5179_v3, %v5218_v18 }
 0x1de   : > { %v1286_v19 = vld [vmem:[#allocation2 + $0x1e6] sm:$0xff]  ;;  %v1732_v14 = vmax.f32 %v1700_v40, %v5281_v15  ;;  %v1022_v39 = vmax.f32 %v942_v38, %v982_v2  ;;  %3802 = vmatprep.mubr.bf16.mxu0 %v2320_v17  ;;  %v1733_v33 = vmax.f32 %v1701_v16, %v5283_v26  ;;  %v1137_v1 = vmax.f32 %v5183_v7, %v5225_v55  ;;  %v1287_v6 = vld [vmem:[#allocation2 + $0x1ee] sm:$0xff] }
 0x1df   : > { %v1326_v22 = vld [vmem:[#allocation2 + $0x1e7] sm:$0xff]  ;;  %v1023_v43 = vmax.f32 %v943_v44, %v983_v51  ;;  %v1167_v53 = vmax.f32 %v1135_v61, %v5225_v55  ;;  %v1327_v8 = vld [vmem:[#allocation2 + $0x1ef] sm:$0xff]  ;;  %v1198_v56 = vmax.f32 %v1166_v42, %v5262_v29  ;;  %v1168_v3 = vmax.f32 %v1136_v48, %v5262_v29  ;;  %3917 = vmatpush3.bf16.msra.mxu1 %v4191_v46 }
 0x1e0   : > { %v1062_v13 = vld [vmem:[#allocation2 + $0x2ea] sm:$0xff]  ;;  %1764 = vst [vmem:[#allocation2 + $0x188] sm:$0xff] %v1732_v14  ;;  %v1366_v63 = vmax.f32 %v1286_v19, %v1326_v22  ;;  %v2763_v28 = vpack.c.bf16 %v1733_v33, %v1732_v14  ;;  %1765 = vst [vmem:[#allocation2 + $0x190] sm:$0xff] %v1733_v33  ;;  %v1169_v7 = vmax.f32 %v1137_v1, %v5264_v31  ;;  %3918 = vmatprep.subr.bf16.mxu1 %v4192_v30  ;;  %v6113_v2 = vld [vmem:[#allocation29_spill] sm:$0xff] }
 0x1e1   : > { %v5303_v54 = vmax.f32 %v1022_v39, %v1062_v13  ;;  %v5307_v12 = vmax.f32 %v1023_v43, %v1063_v60  ;;  %v1199_v36 = vmax.f32 %v1167_v53, %v5264_v31  ;;  %v1288_v9 = vld [vmem:[#allocation2 + $0x206] sm:$0xff]  ;;  %v1367_v49 = vmax.f32 %v1287_v6, %v1327_v8  ;;  %v1289_v34 = vld [vmem:[#allocation2 + $0x20e] sm:$0xff] }
 0x1e2   : > { %v1328_v11 = vld [vmem:[#allocation2 + $0x207] sm:$0xff]  ;;  %v1446_v46 = vmax.f32 %v1366_v63, %v5066_v5  ;;  %3882 = vmatprep.mubr.bf16.mxu1 %v2763_v28  ;;  %v1638_v17 = vmax.f32 %v5154_v32, %v5196_v59  ;;  %v1639_v16 = vmax.f32 %v5156_v57, %v5200_v27  ;;  %v1329_v44 = vld [vmem:[#allocation2 + $0x20f] sm:$0xff]  ;;  %v1640_v60 = vmax.f32 %v5196_v59, %v5239_v50 }
 0x1e3   : > { %v5312_v41 = vmax.f32 %v1198_v56, %v5303_v54  ;;  %v1200_v40 = vmax.f32 %v1168_v3, %v5303_v54  ;;  %v5317_v25 = vmax.f32 %v1199_v36, %v5307_v12  ;;  %v1201_v38 = vmax.f32 %v1169_v7, %v5307_v12  ;;  %v1486_v52 = vld [vmem:[#allocation2 + $0x1e9] sm:$0xff]  ;;  %3919 = vmatpush3.bf16.msra.mxu1 %v4192_v30  ;;  %v1487_v57 = vld [vmem:[#allocation2 + $0x1f1] sm:$0xff] }
 0x1e4   : > { %v1447_v5 = vmax.f32 %v1367_v49, %v5074_v10  ;;  %v1526_v19 = vmax.f32 %v1446_v46, %v1486_v52  ;;  %v1368_v22 = vmax.f32 %v1288_v9, %v1328_v11  ;;  %v6114_v32 = vld [vmem:[#allocation30_spill] sm:$0xff]  ;;  %v1670_v42 = vmax.f32 %v1638_v17, %v5239_v50  ;;  %3920 = vmatprep.subr.bf16.mxu1 %v4193_v24  ;;  %v1567_v53 = vld [vmem:[#allocation2 + $0x1f2] sm:$0xff] }
 0x1e5   : > { %1262 = vst [vmem:[#allocation2 + $0x2a8] sm:$0xff] %v5312_v41  ;;  %v5326_v61 = vmax.f32 %v1200_v40, %v6113_v2  ;;  %v2321_v14 = vpack.c.bf16 %v5317_v25, %v5312_v41  ;;  %1263 = vst [vmem:[#allocation2 + $0x2b0] sm:$0xff] %v5317_v25  ;;  %v5333_v51 = vmax.f32 %v1201_v38, %v6114_v32  ;;  %v1566_v39 = vld [vmem:[#allocation2 + $0x1ea] sm:$0xff]  ;;  %v1569_v17 = vld [vmem:[#allocation2 + $0x212] sm:$0xff] }
 0x1e6   : > { %v1671_v48 = vmax.f32 %v1639_v16, %v5248_v58  ;;  %v1527_v10 = vmax.f32 %v1447_v5, %v1487_v57  ;;  %v5338_v33 = vmax.f32 %v1526_v19, %v1566_v39  ;;  %v1369_v30 = vmax.f32 %v1289_v34, %v1329_v44  ;;  %v1488_v8 = vld [vmem:[#allocation2 + $0x209] sm:$0xff] }
 0x1e7   : > { %1264 = vst [vmem:[#allocation2 + $0x2c8] sm:$0xff] %v5326_v61  ;;  %v1448_v43 = vmax.f32 %v1368_v22, %v5090_v37  ;;  %3803 = vmatmul.mubr.bf16.gmra.mrb[56].mxu0 %v2321_v14  ;;  %v2322_v13 = vpack.c.bf16 %v5333_v51, %v5326_v61  ;;  %1265 = vst [vmem:[#allocation2 + $0x2d0] sm:$0xff] %v5333_v51  ;;  %v1702_v1 = vmax.f32 %v1670_v42, %v5281_v15  ;;  %v1489_v37 = vld [vmem:[#allocation2 + $0x211] sm:$0xff]  ;;  %v1290_v36 = vld [vmem:[#allocation2 + $0x226] sm:$0xff] }
 0x1e8   : > { %v1703_v6 = vmax.f32 %v1671_v48, %v5283_v26  ;;  %v5348_v56 = vmax.f32 %v1527_v10, %v1567_v53  ;;  %v1449_v3 = vmax.f32 %v1369_v30, %v5100_v20  ;;  %v1641_v28 = vmax.f32 %v5200_v27, %v5248_v58  ;;  %v1330_v7 = vld [vmem:[#allocation2 + $0x227] sm:$0xff]  ;;  %3921 = vmatpush3.bf16.msra.mxu1 %v4193_v24  ;;  %v1331_v46 = vld [vmem:[#allocation2 + $0x22f] sm:$0xff] }
 0x1e9   : > { %v1528_v63 = vmax.f32 %v1448_v43, %v1488_v8  ;;  %3806 = vmatprep.mubr.bf16.mxu0 %v2322_v13  ;;  %v1734_v9 = vmax.f32 %v1702_v1, %v5338_v33  ;;  %v1568_v11 = vld [vmem:[#allocation2 + $0x20a] sm:$0xff]  ;;  %v1672_v40 = vmax.f32 %v1640_v60, %v5281_v15  ;;  %v1138_v59 = vmax.f32 %v5218_v18, %v5262_v29 }
 0x1ea   : > { %v1139_v20 = vmax.f32 %v5225_v55, %v5264_v31  ;;  %v1291_v49 = vld [vmem:[#allocation2 + $0x22e] sm:$0xff]  ;;  %v1735_v38 = vmax.f32 %v1703_v6, %v5348_v56  ;;  %v1529_v27 = vmax.f32 %v1449_v3, %v1489_v37  ;;  %v1673_v24 = vmax.f32 %v1641_v28, %v5283_v26  ;;  %v1292_v19 = vld [vmem:[#allocation2 + $0x246] sm:$0xff] }
 0x1eb   : > { %v5360_v52 = vmax.f32 %v1528_v63, %v1568_v11  ;;  %1766 = vst [vmem:[#allocation2 + $0x1a8] sm:$0xff] %v1734_v9  ;;  %v1704_v16 = vmax.f32 %v1672_v40, %v5338_v33  ;;  %v1170_v34 = vmax.f32 %v1138_v59, %v5303_v54  ;;  %v1370_v29 = vmax.f32 %v1290_v36, %v1330_v7  ;;  %v1332_v22 = vld [vmem:[#allocation2 + $0x247] sm:$0xff]  ;;  %v1333_v13 = vld [vmem:[#allocation2 + $0x24f] sm:$0xff] }
 0x1ec   : > { %v1171_v18 = vmax.f32 %v1139_v20, %v5307_v12  ;;  %v2764_v44 = vpack.c.bf16 %v1735_v38, %v1734_v9  ;;  %1767 = vst [vmem:[#allocation2 + $0x1b0] sm:$0xff] %v1735_v38  ;;  %v5366_v55 = vmax.f32 %v1529_v27, %v1569_v17  ;;  %v1705_v31 = vmax.f32 %v1673_v24, %v5348_v56  ;;  %v1490_v48 = vld [vmem:[#allocation2 + $0x229] sm:$0xff]  ;;  %v6116_v6 = vld [vmem:[#allocation33_spill] sm:$0xff]  ;;  %v1491_v8 = vld [vmem:[#allocation2 + $0x231] sm:$0xff] }
 0x1ed   : > { %v1371_v5 = vmax.f32 %v1291_v49, %v1331_v46  ;;  %v1736_v14 = vmax.f32 %v1704_v16, %v5360_v52  ;;  %v1202_v57 = vmax.f32 %v1170_v34, %v6113_v2  ;;  %v1450_v54 = vmax.f32 %v1370_v29, %v5148_v47  ;;  %v1293_v43 = vld [vmem:[#allocation2 + $0x24e] sm:$0xff]  ;;  %v1294_v28 = vld [vmem:[#allocation2 + $0x266] sm:$0xff]  ;;  %v6117_v29 = vld [vmem:[#allocation16_spill] sm:$0xff] }
 0x1ee   : > { %v1203_v39 = vmax.f32 %v1171_v18, %v6114_v32  ;;  %3883 = vmatmul.mubr.bf16.gmra.mrb[24].mxu1 %v2764_v44  ;;  %v1737_v12 = vmax.f32 %v1705_v31, %v5366_v55  ;;  %v1642_v10 = vmax.f32 %v5239_v50, %v5281_v15  ;;  %v1643_v30 = vmax.f32 %v5248_v58, %v5283_v26  ;;  %v6115_v53 = vld [vmem:[#allocation31_spill] sm:$0xff]  ;;  %v1334_v36 = vld [vmem:[#allocation2 + $0x267] sm:$0xff] }
 0x1ef   : > { %v1451_v42 = vmax.f32 %v1371_v5, %v5151_v4  ;;  %1768 = vst [vmem:[#allocation2 + $0x1c8] sm:$0xff] %v1736_v14  ;;  %v5380_v1 = vmax.f32 %v1202_v57, %v6115_v53  ;;  %v1530_v60 = vmax.f32 %v1450_v54, %v1490_v48  ;;  %v1372_v3 = vmax.f32 %v1292_v19, %v1332_v22  ;;  %v1570_v63 = vld [vmem:[#allocation2 + $0x22a] sm:$0xff]  ;;  %v1571_v9 = vld [vmem:[#allocation2 + $0x232] sm:$0xff] }
 0x1f0   : > { %v5383_v47 = vmax.f32 %v1203_v39, %v6116_v6  ;;  %v2765_v4 = vpack.c.bf16 %v1737_v12, %v1736_v14  ;;  %1769 = vst [vmem:[#allocation2 + $0x1d0] sm:$0xff] %v1737_v12  ;;  %v1674_v50 = vmax.f32 %v1642_v10, %v5338_v33  ;;  %v1675_v58 = vmax.f32 %v1643_v30, %v5348_v56  ;;  %v1295_v20 = vld [vmem:[#allocation2 + $0x26e] sm:$0xff] }
 0x1f1   : > { %v1531_v37 = vmax.f32 %v1451_v42, %v1491_v8  ;;  %1266 = vst [vmem:[#allocation2 + $0x2e8] sm:$0xff] %v5380_v1  ;;  %v5391_v11 = vmax.f32 %v1530_v60, %v1570_v63  ;;  %v1373_v40 = vmax.f32 %v1293_v43, %v1333_v13  ;;  %v1452_v59 = vmax.f32 %v1372_v3, %v5189_v45  ;;  %v1335_v49 = vld [vmem:[#allocation2 + $0x26f] sm:$0xff]  ;;  %v1296_v42 = vld [vmem:[#allocation2 + $0x286] sm:$0xff] }
 0x1f2   : > { %v2323_v7 = vpack.c.bf16 %v5383_v47, %v5380_v1  ;;  %1267 = vst [vmem:[#allocation2 + $0x2f0] sm:$0xff] %v5383_v47  ;;  %3886 = vmatprep.mubr.bf16.mxu1 %v2765_v4  ;;  %v1706_v38 = vmax.f32 %v1674_v50, %v5360_v52  ;;  %v1707_v27 = vmax.f32 %v1675_v58, %v5366_v55  ;;  %v1492_v24 = vld [vmem:[#allocation2 + $0x249] sm:$0xff]  ;;  %v1493_v22 = vld [vmem:[#allocation2 + $0x251] sm:$0xff] }
 0x1f3   : > { %v5394_v46 = vmax.f32 %v1531_v37, %v1571_v9  ;;  %v1644_v17 = vmax.f32 %v5281_v15, %v5338_v33  ;;  %v1453_v16 = vmax.f32 %v1373_v40, %v5194_v62  ;;  %v1532_v34 = vmax.f32 %v1452_v59, %v1492_v24  ;;  %v6118_v44 = vld [vmem:[#allocation14_spill] sm:$0xff]  ;;  %v1573_v39 = vld [vmem:[#allocation2 + $0x252] sm:$0xff] }
 0x1f4   : > { %3807 = vmatmul.mubr.bf16.gmra.mrb[60].mxu0 %v2323_v7  ;;  %v1645_v45 = vmax.f32 %v5283_v26, %v5348_v56  ;;  %v1374_v18 = vmax.f32 %v1294_v28, %v1334_v36  ;;  %v6119_v31 = vpack.c.bf16 %v6117_v29, %v6118_v44  ;;  %v5407_v5 = vmax.f32 %v1706_v38, %v5391_v11  ;;  %v1572_v15 = vld [vmem:[#allocation2 + $0x24a] sm:$0xff]  ;;  %v1575_v9 = vld [vmem:[#allocation2 + $0x272] sm:$0xff]  ;;  %v6121_v29 = vld [vmem:[#allocation13_spill] sm:$0xff] }
 0x1f5   : > { %v5410_v19 = vmax.f32 %v1707_v27, %v5394_v46  ;;  %v1676_v14 = vmax.f32 %v1644_v17, %v5360_v52  ;;  %v1375_v62 = vmax.f32 %v1295_v20, %v1335_v49  ;;  %v1533_v57 = vmax.f32 %v1453_v16, %v1493_v22  ;;  %v1336_v48 = vld [vmem:[#allocation2 + $0x287] sm:$0xff]  ;;  %v1337_v3 = vld [vmem:[#allocation2 + $0x28f] sm:$0xff] }
 0x1f6   : > { %3826 = vmatprep.mubr.bf16.mxu0 %v6119_v31  ;;  %v5413_v54 = vmax.f32 %v1532_v34, %v1572_v15  ;;  %v1677_v26 = vmax.f32 %v1645_v45, %v5366_v55  ;;  %v1454_v12 = vmax.f32 %v1374_v18, %v5230_v21  ;;  %1770 = vst [vmem:[#allocation2 + $0x1e8] sm:$0xff] %v5407_v5  ;;  %v1494_v13 = vld [vmem:[#allocation2 + $0x269] sm:$0xff]  ;;  %v1495_v37 = vld [vmem:[#allocation2 + $0x271] sm:$0xff] }
 0x1f7   : > { %v2766_v10 = vpack.c.bf16 %v5410_v19, %v5407_v5  ;;  %1771 = vst [vmem:[#allocation2 + $0x1f0] sm:$0xff] %v5410_v19  ;;  %v1708_v30 = vmax.f32 %v1676_v14, %v5391_v11  ;;  %v1455_v43 = vmax.f32 %v1375_v62, %v5236_v0  ;;  %v1646_v8 = vmax.f32 %v5338_v33, %v5360_v52  ;;  %v1297_v60 = vld [vmem:[#allocation2 + $0x28e] sm:$0xff]  ;;  %v1298_v49 = vld [vmem:[#allocation2 + $0x2a6] sm:$0xff] }
 0x1f8   : > { %v5425_v21 = vmax.f32 %v1533_v57, %v1573_v39  ;;  %v1709_v4 = vmax.f32 %v1677_v26, %v5394_v46  ;;  %v1534_v63 = vmax.f32 %v1454_v12, %v1494_v13  ;;  %v1647_v50 = vmax.f32 %v5348_v56, %v5366_v55  ;;  %v1574_v28 = vld [vmem:[#allocation2 + $0x26a] sm:$0xff]  ;;  %v6124_v14 = vld [vmem:[#allocation25_spill] sm:$0xff] }
 0x1f9   : > { %3887 = vmatmul.mubr.bf16.gmra.mrb[28].mxu1 %v2766_v10  ;;  %v5431_v58 = vmax.f32 %v1708_v30, %v5413_v54  ;;  %v1535_v0 = vmax.f32 %v1455_v43, %v1495_v37  ;;  %v1678_v36 = vmax.f32 %v1646_v8, %v5391_v11  ;;  %v1376_v33 = vmax.f32 %v1296_v42, %v1336_v48  ;;  %v1338_v56 = vld [vmem:[#allocation2 + $0x2a7] sm:$0xff]  ;;  %v1339_v34 = vld [vmem:[#allocation2 + $0x2af] sm:$0xff] }
 0x1fa   : > { %v5435_v7 = vmax.f32 %v1709_v4, %v5425_v21  ;;  %v5437_v40 = vmax.f32 %v1534_v63, %v1574_v28  ;;  %v1679_v59 = vmax.f32 %v1647_v50, %v5394_v46  ;;  %v1377_v20 = vmax.f32 %v1297_v60, %v1337_v3  ;;  %v1299_v16 = vld [vmem:[#allocation2 + $0x2ae] sm:$0xff]  ;;  %v1300_v13 = vld [vmem:[#allocation2 + $0x2c6] sm:$0xff] }
 0x1fb   : > { %1772 = vst [vmem:[#allocation2 + $0x208] sm:$0xff] %v5431_v58  ;;  %v5441_v38 = vmax.f32 %v1535_v0, %v1575_v9  ;;  %v1710_v27 = vmax.f32 %v1678_v36, %v5413_v54  ;;  %v1456_v24 = vmax.f32 %v1376_v33, %v5273_v23  ;;  %v1648_v17 = vmax.f32 %v5360_v52, %v5391_v11  ;;  %v6120_v18 = vld [vmem:[#allocation15_spill] sm:$0xff]  ;;  %v6123_v52 = vld [vmem:[#allocation28_spill] sm:$0xff]  ;;  %v1340_v63 = vld [vmem:[#allocation2 + $0x2c7] sm:$0xff] }
 0x1fc   : > { %v2767_v45 = vpack.c.bf16 %v5435_v7, %v5431_v58  ;;  %1773 = vst [vmem:[#allocation2 + $0x210] sm:$0xff] %v5435_v7  ;;  %v6122_v44 = vpack.c.bf16 %v6120_v18, %v6121_v29  ;;  %v1711_v31 = vmax.f32 %v1679_v59, %v5425_v21  ;;  %v1457_v22 = vmax.f32 %v1377_v20, %v5276_v35  ;;  %v1496_v15 = vld [vmem:[#allocation2 + $0x289] sm:$0xff]  ;;  %v1497_v39 = vld [vmem:[#allocation2 + $0x291] sm:$0xff] }
 0x1fd   : > { %v1649_v23 = vmax.f32 %v5366_v55, %v5394_v46  ;;  %v6125_v62 = vpack.c.bf16 %v6123_v52, %v6124_v14  ;;  %v5461_v57 = vmax.f32 %v1710_v27, %v5437_v40  ;;  %v1536_v26 = vmax.f32 %v1456_v24, %v1496_v15  ;;  %v1576_v10 = vld [vmem:[#allocation2 + $0x28a] sm:$0xff]  ;;  %v1577_v30 = vld [vmem:[#allocation2 + $0x292] sm:$0xff] }
 0x1fe   : > { %3827 = vmatmul.mubr.bf16.vlgmr.msra.gmra.mrb[32].mxu0 %v6122_v44  ;;  %v1680_v12 = vmax.f32 %v1648_v17, %v5413_v54  ;;  %v1378_v42 = vmax.f32 %v1298_v49, %v1338_v56  ;;  %3890 = vmatprep.mubr.bf16.mxu1 %v2767_v45  ;;  %v5465_v48 = vmax.f32 %v1711_v31, %v5441_v38  ;;  %v1301_v37 = vld [vmem:[#allocation2 + $0x2ce] sm:$0xff] }
 0x1ff   : > { %3830 = vmatprep.mubr.bf16.mxu0 %v6125_v62  ;;  %v1537_v35 = vmax.f32 %v1457_v22, %v1497_v39  ;;  %v1681_v55 = vmax.f32 %v1649_v23, %v5425_v21  ;;  %v1379_v43 = vmax.f32 %v1299_v16, %v1339_v34  ;;  %1774 = vst [vmem:[#allocation2 + $0x228] sm:$0xff] %v5461_v57  ;;  %v1341_v50 = vld [vmem:[#allocation2 + $0x2cf] sm:$0xff]  ;;  %v1302_v34 = vld [vmem:[#allocation2 + $0x2e6] sm:$0xff] }
 0x200   : > { %v5469_v8 = vmax.f32 %v1536_v26, %v1576_v10  ;;  %v1712_v60 = vmax.f32 %v1680_v12, %v5437_v40  ;;  %v1458_v3 = vmax.f32 %v1378_v42, %v5312_v41  ;;  %v1650_v4 = vmax.f32 %v5391_v11, %v5413_v54  ;;  %1775 = vst [vmem:[#allocation2 + $0x230] sm:$0xff] %v5465_v48  ;;  %v1498_v9 = vld [vmem:[#allocation2 + $0x2a9] sm:$0xff]  ;;  %v1499_v59 = vld [vmem:[#allocation2 + $0x2b1] sm:$0xff] }
 0x201   : > { %v2768_v0 = vpack.c.bf16 %v5465_v48, %v5461_v57  ;;  %v5478_v28 = vmax.f32 %v1537_v35, %v1577_v30  ;;  %v1713_v36 = vmax.f32 %v1681_v55, %v5441_v38  ;;  %v1459_v33 = vmax.f32 %v1379_v43, %v5317_v25  ;;  %v1578_v24 = vld [vmem:[#allocation2 + $0x2aa] sm:$0xff]  ;;  %v1579_v17 = vld [vmem:[#allocation2 + $0x2b2] sm:$0xff] }
 0x202   : > { %v5483_v41 = vmax.f32 %v1712_v60, %v5469_v8  ;;  %v1538_v11 = vmax.f32 %v1458_v3, %v1498_v9  ;;  %v1651_v20 = vmax.f32 %v5394_v46, %v5425_v21  ;;  %v1682_v49 = vmax.f32 %v1650_v4, %v5437_v40  ;;  %v1303_v44 = vld [vmem:[#allocation2 + $0x2ee] sm:$0xff]  ;;  %v6129_v12 = vld [vmem:[#allocation36_spill] sm:$0xff] }
 0x203   : > { %3891 = vmatmul.mubr.bf16.gmra.mrb[0].mxu1 %v2768_v0  ;;  %v5489_v56 = vmax.f32 %v1713_v36, %v5478_v28  ;;  %v1539_v27 = vmax.f32 %v1459_v33, %v1499_v59  ;;  %v1380_v16 = vmax.f32 %v1300_v13, %v1340_v63  ;;  %v1381_v25 = vmax.f32 %v1301_v37, %v1341_v50  ;;  %v1342_v31 = vld [vmem:[#allocation2 + $0x2e7] sm:$0xff]  ;;  %v1343_v22 = vld [vmem:[#allocation2 + $0x2ef] sm:$0xff] }
 0x204   : > { %1776 = vst [vmem:[#allocation2 + $0x248] sm:$0xff] %v5483_v41  ;;  %v5492_v45 = vmax.f32 %v1538_v11, %v1578_v24  ;;  %v1683_v18 = vmax.f32 %v1651_v20, %v5441_v38  ;;  %v1714_v46 = vmax.f32 %v1682_v49, %v5469_v8  ;;  %v1652_v29 = vmax.f32 %v5413_v54, %v5437_v40  ;;  %v6126_v23 = vld [vmem:[#allocation26_spill] sm:$0xff]  ;;  %v6127_v52 = vld [vmem:[#allocation23_spill] sm:$0xff] }
 0x205   : > { %v2769_v15 = vpack.c.bf16 %v5489_v56, %v5483_v41  ;;  %1777 = vst [vmem:[#allocation2 + $0x250] sm:$0xff] %v5489_v56  ;;  %v6128_v14 = vpack.c.bf16 %v6126_v23, %v6127_v52  ;;  %v5504_v62 = vmax.f32 %v1539_v27, %v1579_v17  ;;  %v1460_v39 = vmax.f32 %v1380_v16, %v5326_v61  ;;  %v6130_v54 = vld [vmem:[#allocation34_spill] sm:$0xff]  ;;  %v1501_v55 = vld [vmem:[#allocation2 + $0x2d1] sm:$0xff] }
 0x206   : > { %v1461_v26 = vmax.f32 %v1381_v25, %v5333_v51  ;;  %v6131_v42 = vpack.c.bf16 %v6129_v12, %v6130_v54  ;;  %v1715_v35 = vmax.f32 %v1683_v18, %v5478_v28  ;;  %v5513_v10 = vmax.f32 %v1714_v46, %v5492_v45  ;;  %v1500_v30 = vld [vmem:[#allocation2 + $0x2c9] sm:$0xff]  ;;  %v1581_v63 = vld [vmem:[#allocation2 + $0x2d2] sm:$0xff] }
 0x207   : > { %3831 = vmatmul.mubr.bf16.gmra.mrb[36].mxu0 %v6128_v14  ;;  %v1653_v43 = vmax.f32 %v5425_v21, %v5441_v38  ;;  %v1684_v13 = vmax.f32 %v1652_v29, %v5469_v8  ;;  %3894 = vmatprep.mubr.bf16.mxu1 %v2769_v15  ;;  %v1540_v61 = vmax.f32 %v1460_v39, %v1500_v30  ;;  %v1580_v37 = vld [vmem:[#allocation2 + $0x2ca] sm:$0xff]  ;;  %v1583_v46 = vld [vmem:[#allocation2 + $0x2f2] sm:$0xff] }
 0x208   : > { %3834 = vmatprep.mubr.bf16.mxu0 %v6131_v42  ;;  %v1541_v60 = vmax.f32 %v1461_v26, %v1501_v55  ;;  %v1382_v51 = vmax.f32 %v1302_v34, %v1342_v31  ;;  %v1383_v3 = vmax.f32 %v1303_v44, %v1343_v22  ;;  %v5519_v4 = vmax.f32 %v1715_v35, %v5504_v62  ;;  %v1502_v49 = vld [vmem:[#allocation2 + $0x2e9] sm:$0xff]  ;;  %v1503_v27 = vld [vmem:[#allocation2 + $0x2f1] sm:$0xff] }
 0x209   : > { %1778 = vst [vmem:[#allocation2 + $0x268] sm:$0xff] %v5513_v10  ;;  %v1685_v50 = vmax.f32 %v1653_v43, %v5478_v28  ;;  %v1716_v0 = vmax.f32 %v1684_v13, %v5492_v45  ;;  %v1654_v21 = vmax.f32 %v5437_v40, %v5469_v8  ;;  %v1620_v36 = vmax.f32 %v1540_v61, %v1580_v37  ;;  %v5539_v25 = vld [vmem:[#allocation2 + $0x106] sm:$0xff]  ;;  %v6132_v22 = vld [vmem:[#allocation35_spill] sm:$0xff]  ;;  %v6133_v15 = vld [vmem:[#allocation32_spill] sm:$0xff] }
 0x20a   : > { %v1621_v33 = vmax.f32 %v1541_v60, %v1581_v63  ;;  %v1462_v9 = vmax.f32 %v1382_v51, %v5380_v1  ;;  %v1463_v59 = vmax.f32 %v1383_v3, %v5383_v47  ;;  %v2770_v11 = vpack.c.bf16 %v5519_v4, %v5513_v10  ;;  %1779 = vst [vmem:[#allocation2 + $0x270] sm:$0xff] %v5519_v4  ;;  %v1582_v18 = vld [vmem:[#allocation2 + $0x2ea] sm:$0xff]  ;;  %v6135_v42 = vld [vmem:[#allocation40_spill] sm:$0xff] }
 0x20b   : > { %v1717_v20 = vmax.f32 %v1685_v50, %v5504_v62  ;;  %v1655_v24 = vmax.f32 %v5441_v38, %v5478_v28  ;;  %v1686_v40 = vmax.f32 %v1654_v21, %v5492_v45  ;;  %v5535_v17 = vmax.f32 %v1716_v0, %v1620_v36  ;;  %v5546_v31 = vld [vmem:[#allocation2 + $0x107] sm:$0xff]  ;;  %v1833_v54 = vld [vmem:[#allocation2 + $0x10f] sm:$0xff] }
 0x20c   : > { %v1542_v16 = vmax.f32 %v1462_v9, %v1502_v49  ;;  %v1543_v1 = vmax.f32 %v1463_v59, %v1503_v27  ;;  %v1656_v47 = vmax.f32 %v5469_v8, %v5492_v45  ;;  %3895 = vmatmul.mubr.bf16.gmra.mrb[4].mxu1 %v2770_v11  ;;  %v1657_v38 = vmax.f32 %v5478_v28, %v5504_v62  ;;  %v5553_v26 = vld [vmem:[#allocation2 + $0x10e] sm:$0xff]  ;;  %v5555_v12 = vld [vmem:[#allocation2 + $0x126] sm:$0xff] }
 0x20d   : > { %v5541_v34 = vmax.f32 %v1717_v20, %v1621_v33  ;;  %v1687_v29 = vmax.f32 %v1655_v24, %v5504_v62  ;;  %v1718_v44 = vmax.f32 %v1686_v40, %v1620_v36  ;;  %1780 = vst [vmem:[#allocation2 + $0x288] sm:$0xff] %v5535_v17  ;;  %v6134_v8 = vpack.c.bf16 %v6132_v22, %v6133_v15  ;;  %v6136_v35 = vld [vmem:[#allocation38_spill] sm:$0xff] }
 0x20e   : > { %v1622_v23 = vmax.f32 %v1542_v16, %v1582_v18  ;;  %v1623_v52 = vmax.f32 %v1543_v1, %v1583_v46  ;;  %v1688_v14 = vmax.f32 %v1656_v47, %v1620_v36  ;;  %v1658_v39 = vmax.f32 %v5492_v45, %v1620_v36  ;;  %v1795_v61 = vld [vmem:[#allocation2 + $0x12e] sm:$0xff]  ;;  %v1796_v63 = vld [vmem:[#allocation2 + $0x146] sm:$0xff] }
 0x20f   : > { %3835 = vmatmul.mubr.bf16.gmra.mrb[40].mxu0 %v6134_v8  ;;  %v2771_v28 = vpack.c.bf16 %v5541_v34, %v5535_v17  ;;  %1781 = vst [vmem:[#allocation2 + $0x290] sm:$0xff] %v5541_v34  ;;  %v6137_v30 = vpack.c.bf16 %v6135_v42, %v6136_v35  ;;  %v1719_v55 = vmax.f32 %v1687_v29, %v1621_v33  ;;  %v1834_v45 = vld [vmem:[#allocation2 + $0x127] sm:$0xff]  ;;  %v1835_v60 = vld [vmem:[#allocation2 + $0x12f] sm:$0xff] }
 0x210   : > { %v1689_v43 = vmax.f32 %v1657_v38, %v1621_v33  ;;  %v1659_v13 = vmax.f32 %v5504_v62, %v1621_v33  ;;  %v5564_v51 = vmax.f32 %v1718_v44, %v1622_v23  ;;  %v1720_v3 = vmax.f32 %v1688_v14, %v1622_v23  ;;  %v1836_v50 = vld [vmem:[#allocation2 + $0x147] sm:$0xff]  ;;  %v1837_v11 = vld [vmem:[#allocation2 + $0x14f] sm:$0xff] }
 0x211   : > { %3838 = vmatprep.mubr.bf16.mxu0 %v6137_v30  ;;  %v1690_v37 = vmax.f32 %v1658_v39, %v1622_v23  ;;  %v1872_v0 = vmax.f32 %v5539_v25, %v5546_v31  ;;  %3898 = vmatprep.mubr.bf16.mxu1 %v2771_v28  ;;  %v5568_v21 = vmax.f32 %v1719_v55, %v1623_v52  ;;  %v1797_v59 = vld [vmem:[#allocation2 + $0x14e] sm:$0xff]  ;;  %v5588_v29 = vld [vmem:[#allocation2 + $0xc0] sm:$0xff]  ;;  %v6144_v28 = vld [vmem:[#allocation20_spill] sm:$0xff] }
 0x212   : > { %v1721_v36 = vmax.f32 %v1689_v43, %v1623_v52  ;;  %v1691_v9 = vmax.f32 %v1659_v13, %v1623_v52  ;;  %v1873_v62 = vmax.f32 %v5553_v26, %v1833_v54  ;;  %1782 = vst [vmem:[#allocation2 + $0x2a8] sm:$0xff] %v5564_v51  ;;  %v5573_v33 = vmax.f32 %v1720_v3, %v6113_v2  ;;  %v1988_v47 = vld [vmem:[#allocation2 + $0xc9] sm:$0xff]  ;;  %v1989_v25 = vld [vmem:[#allocation2 + $0xd1] sm:$0xff]  ;;  %v6138_v44 = vld [vmem:[#allocation17_spill] sm:$0xff] }
 0x213   : > { %v1722_v20 = vmax.f32 %v1690_v37, %v6113_v2  ;;  %v1874_v49 = vmax.f32 %v5555_v12, %v1834_v45  ;;  %v1875_v27 = vmax.f32 %v1795_v61, %v1835_v60  ;;  %v2772_v24 = vpack.c.bf16 %v5568_v21, %v5564_v51  ;;  %1783 = vst [vmem:[#allocation2 + $0x2b0] sm:$0xff] %v5568_v21  ;;  %v1912_v46 = vld [vmem:[#allocation2 + $0x108] sm:$0xff]  ;;  %v6139_v38 = vld [vmem:[#allocation19_spill] sm:$0xff]  ;;  %v6147_v55 = vld [vmem:[#allocation24_spill] sm:$0xff] }
 0x214   : > { %v5581_v40 = vmax.f32 %v1721_v36, %v6114_v32  ;;  %v1723_v16 = vmax.f32 %v1691_v9, %v6114_v32  ;;  %v1876_v1 = vmax.f32 %v1796_v63, %v1836_v50  ;;  %1784 = vst [vmem:[#allocation2 + $0x2c8] sm:$0xff] %v5573_v33  ;;  %v1877_v18 = vmax.f32 %v1797_v59, %v1837_v11  ;;  %v6141_v15 = vld [vmem:[#allocation18_spill] sm:$0xff]  ;;  %v6142_v32 = vld [vmem:[#allocation21_spill] sm:$0xff]  ;;  %v1991_v14 = vld [vmem:[#allocation2 + $0xf1] sm:$0xff] }
 0x215   : > { %v5586_v2 = vmax.f32 %v1722_v20, %v6115_v53  ;;  %v6140_v31 = vmax.f32 %v6138_v44, %v6139_v38  ;;  %v6143_v8 = vmax.f32 %v6141_v15, %v6142_v32  ;;  %v1990_v52 = vld [vmem:[#allocation2 + $0xe9] sm:$0xff]  ;;  %3899 = vmatmul.mubr.bf16.gmra.mrb[8].mxu1 %v2772_v24  ;;  %v2069_v60 = vld [vmem:[#allocation2 + $0xd2] sm:$0xff]  ;;  %v6151_v63 = vld [vmem:[#allocation37_spill] sm:$0xff]  ;;  %v1952_v9 = vmax.f32 %v1872_v0, %v1912_v46 }
 0x216   : > { %v2773_v53 = vpack.c.bf16 %v5581_v40, %v5573_v33  ;;  %1785 = vst [vmem:[#allocation2 + $0x2d0] sm:$0xff] %v5581_v40  ;;  %v5602_v39 = vmax.f32 %v1723_v16, %v6116_v6  ;;  %v1913_v26 = vld [vmem:[#allocation2 + $0x110] sm:$0xff]  ;;  %v1914_v12 = vld [vmem:[#allocation2 + $0x128] sm:$0xff] }
 0x217   : > { %v1948_v22 = vmax.f32 %v6140_v31, %v5588_v29  ;;  %v1949_v23 = vmax.f32 %v6143_v8, %v5588_v29  ;;  %v1915_v54 = vld [vmem:[#allocation2 + $0x130] sm:$0xff]  ;;  %v6145_v42 = vld [vmem:[#allocation22_spill] sm:$0xff]  ;;  %1786 = vst [vmem:[#allocation2 + $0x2e8] sm:$0xff] %v5586_v2  ;;  %v1953_v59 = vmax.f32 %v1873_v62, %v1913_v26  ;;  %v1954_v11 = vmax.f32 %v1874_v49, %v1914_v12 }
 0x218   : > { %v6146_v35 = vmax.f32 %v6144_v28, %v6145_v42  ;;  %v6148_v43 = vld [vmem:[#allocation27_spill] sm:$0xff]  ;;  %v1916_v50 = vld [vmem:[#allocation2 + $0x148] sm:$0xff]  ;;  %v1955_v20 = vmax.f32 %v1875_v27, %v1915_v54  ;;  %3902 = vmatprep.mubr.bf16.mxu1 %v2773_v53  ;;  %v2774_v44 = vpack.c.bf16 %v5602_v39, %v5586_v2  ;;  %1787 = vst [vmem:[#allocation2 + $0x2f0] sm:$0xff] %v5602_v39 }
 0x219   : > { %v6149_v13 = vmax.f32 %v6147_v55, %v6148_v43  ;;  %v2068_v45 = vld [vmem:[#allocation2 + $0xca] sm:$0xff]  ;;  %v2071_v16 = vld [vmem:[#allocation2 + $0xf2] sm:$0xff]  ;;  %v1956_v38 = vmax.f32 %v1876_v1, %v1916_v50  ;;  %v2028_v28 = vmax.f32 %v1948_v22, %v1988_v47  ;;  %v2029_v0 = vmax.f32 %v1949_v23, %v1989_v25 }
 0x21a   : > { %v1950_v30 = vmax.f32 %v6146_v35, %v5588_v29  ;;  %v2070_v3 = vld [vmem:[#allocation2 + $0xea] sm:$0xff]  ;;  %v2073_v26 = vld [vmem:[#allocation2 + $0x112] sm:$0xff] }
 0x21b   : > { %v1951_v61 = vmax.f32 %v6149_v13, %v5588_v29  ;;  %v6150_v37 = vld [vmem:[#allocation39_spill] sm:$0xff]  ;;  %v2108_v47 = vmax.f32 %v2028_v28, %v2068_v45  ;;  %v2109_v22 = vmax.f32 %v2029_v0, %v2069_v60 }
 0x21c   : > { %v6152_v6 = vpack.c.bf16 %v6150_v37, %v6151_v63  ;;  %v1917_v36 = vld [vmem:[#allocation2 + $0x150] sm:$0xff]  ;;  %v2030_v62 = vmax.f32 %v1950_v30, %v1990_v52  ;;  %v1798_v37 = vld [vmem:[#allocation2 + $0x166] sm:$0xff] }
 0x21d   : > { %v1992_v24 = vld [vmem:[#allocation2 + $0x109] sm:$0xff]  ;;  %v1957_v31 = vmax.f32 %v1877_v18, %v1917_v36  ;;  %v1993_v15 = vld [vmem:[#allocation2 + $0x111] sm:$0xff]  ;;  %v2031_v49 = vmax.f32 %v1951_v61, %v1991_v14  ;;  %3903 = vmatmul.mubr.bf16.gmra.mrb[12].mxu1 %v2774_v44 }
 0x21e   : > { %3839 = vmatmul.mubr.bf16.gmra.mrb[44].mxu0 %v6152_v6  ;;  %v1994_v32 = vld [vmem:[#allocation2 + $0x129] sm:$0xff]  ;;  %v1995_v8 = vld [vmem:[#allocation2 + $0x131] sm:$0xff]  ;;  %v2032_v27 = vmax.f32 %v1952_v9, %v1992_v24  ;;  %v2033_v12 = vmax.f32 %v1953_v59, %v1993_v15  ;;  %v2110_v50 = vmax.f32 %v2030_v62, %v2070_v3 }
 0x21f   : > { %v1996_v42 = vld [vmem:[#allocation2 + $0x149] sm:$0xff]  ;;  %v1997_v35 = vld [vmem:[#allocation2 + $0x151] sm:$0xff]  ;;  %v2034_v54 = vmax.f32 %v1954_v11, %v1994_v32  ;;  %v2035_v55 = vmax.f32 %v1955_v20, %v1995_v8  ;;  %v2111_v14 = vmax.f32 %v2031_v49, %v2071_v16 }
 0x220   : > { %v2072_v46 = vld [vmem:[#allocation2 + $0x10a] sm:$0xff]  ;;  %v2036_v43 = vmax.f32 %v1956_v38, %v1996_v42  ;;  %v2075_v13 = vld [vmem:[#allocation2 + $0x132] sm:$0xff]  ;;  %v2037_v6 = vmax.f32 %v1957_v31, %v1997_v35  ;;  %v5621_v61 = vmax.f32 %v2033_v12, %v2073_v26  ;;  %v2148_v60 = vmax.f32 %v2108_v47, %v2110_v50 }
 0x221   : > { %v2074_v53 = vld [vmem:[#allocation2 + $0x12a] sm:$0xff]  ;;  %v2077_v18 = vld [vmem:[#allocation2 + $0x152] sm:$0xff]  ;;  %v5619_v30 = vmax.f32 %v2032_v27, %v2072_v46  ;;  %v5625_v20 = vmax.f32 %v2035_v55, %v2075_v13  ;;  %v2149_v3 = vmax.f32 %v2109_v22, %v2111_v14 }
 0x222   : > { %v2076_v1 = vld [vmem:[#allocation2 + $0x14a] sm:$0xff]  ;;  %v5623_v36 = vmax.f32 %v2034_v54, %v2074_v53  ;;  %v5629_v45 = vmax.f32 %v2037_v6, %v2077_v18  ;;  %v2151_v38 = vmax.f32 %v2111_v14, %v5621_v61 }
 0x223   : > { %v1838_v63 = vld [vmem:[#allocation2 + $0x167] sm:$0xff]  ;;  %v1839_v23 = vld [vmem:[#allocation2 + $0x16f] sm:$0xff]  ;;  %v5627_v24 = vmax.f32 %v2036_v43, %v2076_v1  ;;  %v2150_v16 = vmax.f32 %v2110_v50, %v5619_v30  ;;  %v2180_v15 = vmax.f32 %v2148_v60, %v5619_v30  ;;  %v2181_v35 = vmax.f32 %v2149_v3, %v5621_v61 }
 0x224   : > { %v1799_v25 = vld [vmem:[#allocation2 + $0x16e] sm:$0xff]  ;;  %v1800_v52 = vld [vmem:[#allocation2 + $0x186] sm:$0xff]  ;;  %v1878_v31 = vmax.f32 %v1798_v37, %v1838_v63  ;;  %v2183_v44 = vmax.f32 %v2151_v38, %v5625_v20  ;;  %v2153_v38 = vmax.f32 %v5621_v61, %v5625_v20 }
 0x225   : > { %v1801_v9 = vld [vmem:[#allocation2 + $0x18e] sm:$0xff]  ;;  %v1879_v32 = vmax.f32 %v1799_v25, %v1839_v23  ;;  %v2182_v49 = vmax.f32 %v2150_v16, %v5623_v36  ;;  %v2212_v26 = vmax.f32 %v2180_v15, %v5623_v36  ;;  %v2213_v1 = vmax.f32 %v2181_v35, %v5625_v20  ;;  %v1802_v47 = vld [vmem:[#allocation2 + $0x1a6] sm:$0xff] }
 0x226   : > { %v1840_v59 = vld [vmem:[#allocation2 + $0x187] sm:$0xff]  ;;  %v1841_v11 = vld [vmem:[#allocation2 + $0x18f] sm:$0xff]  ;;  %v2215_v63 = vmax.f32 %v2183_v44, %v5629_v45  ;;  %v2152_v16 = vmax.f32 %v5619_v30, %v5623_v36  ;;  %v2185_v30 = vmax.f32 %v2153_v38, %v5629_v45 }
 0x227   : > { %v1918_v8 = vld [vmem:[#allocation2 + $0x168] sm:$0xff]  ;;  %v1880_v28 = vmax.f32 %v1800_v52, %v1840_v59  ;;  %v1881_v42 = vmax.f32 %v1801_v9, %v1841_v11  ;;  %v1919_v0 = vld [vmem:[#allocation2 + $0x170] sm:$0xff]  ;;  %v2214_v37 = vmax.f32 %v2182_v49, %v5627_v24  ;;  %v2244_v50 = vmax.f32 %v2212_v26, %v5627_v24 }
 0x228   : > { %v1958_v62 = vmax.f32 %v1878_v31, %v1918_v8  ;;  %v1920_v27 = vld [vmem:[#allocation2 + $0x188] sm:$0xff]  ;;  %v1921_v46 = vld [vmem:[#allocation2 + $0x190] sm:$0xff]  ;;  %v1959_v53 = vmax.f32 %v1879_v32, %v1919_v0  ;;  %v2245_v11 = vmax.f32 %v2213_v1, %v5629_v45  ;;  %v2184_v44 = vmax.f32 %v2152_v16, %v5627_v24 }
 0x229   : > { %v1998_v12 = vld [vmem:[#allocation2 + $0x169] sm:$0xff]  ;;  %v1999_v54 = vld [vmem:[#allocation2 + $0x171] sm:$0xff]  ;;  %v1960_v55 = vmax.f32 %v1880_v28, %v1920_v27  ;;  %v1961_v43 = vmax.f32 %v1881_v42, %v1921_v46 }
 0x22a   : > { %v2000_v13 = vld [vmem:[#allocation2 + $0x189] sm:$0xff]  ;;  %v2038_v18 = vmax.f32 %v1958_v62, %v1998_v12  ;;  %v2001_v6 = vld [vmem:[#allocation2 + $0x191] sm:$0xff]  ;;  %v2039_v25 = vmax.f32 %v1959_v53, %v1999_v54  ;;  %v3033_v62 = vpack.c.bf16 %v2245_v11, %v2244_v50  ;;  %v2154_v53 = vmax.f32 %v5623_v36, %v5627_v24 }
 0x22b   : > { %v1842_v22 = vld [vmem:[#allocation2 + $0x1a7] sm:$0xff]  ;;  %v2079_v52 = vld [vmem:[#allocation2 + $0x172] sm:$0xff]  ;;  %v2040_v14 = vmax.f32 %v1960_v55, %v2000_v13  ;;  %v2041_v9 = vmax.f32 %v1961_v43, %v2001_v6 }
 0x22c   : > { %v2078_v23 = vld [vmem:[#allocation2 + $0x16a] sm:$0xff]  ;;  %v2081_v3 = vld [vmem:[#allocation2 + $0x192] sm:$0xff]  ;;  %v5649_v32 = vmax.f32 %v2039_v25, %v2079_v52  ;;  %v1882_v42 = vmax.f32 %v1802_v47, %v1842_v22  ;;  %3922 = vmatprep.mubr.bf16.mxu1 %v3033_v62 }
 0x22d   : > { %v2080_v59 = vld [vmem:[#allocation2 + $0x18a] sm:$0xff]  ;;  %v5643_v60 = vmax.f32 %v2038_v18, %v2078_v23  ;;  %v5653_v28 = vmax.f32 %v2041_v9, %v2081_v3  ;;  %v2155_v18 = vmax.f32 %v5625_v20, %v5629_v45 }
 0x22e   : > { %v1803_v31 = vld [vmem:[#allocation2 + $0x1ae] sm:$0xff]  ;;  %v5651_v8 = vmax.f32 %v2040_v14, %v2080_v59  ;;  %v1804_v35 = vld [vmem:[#allocation2 + $0x1c6] sm:$0xff]  ;;  %v2247_v61 = vmax.f32 %v2215_v63, %v5649_v32  ;;  %v2217_v43 = vmax.f32 %v2185_v30, %v5649_v32 }
 0x22f   : > { %v1843_v15 = vld [vmem:[#allocation2 + $0x1af] sm:$0xff]  ;;  %v1844_v0 = vld [vmem:[#allocation2 + $0x1c7] sm:$0xff]  ;;  %v2246_v49 = vmax.f32 %v2214_v37, %v5643_v60  ;;  %v2216_v55 = vmax.f32 %v2184_v44, %v5643_v60  ;;  %v2186_v36 = vmax.f32 %v2154_v53, %v5643_v60  ;;  %v2187_v52 = vmax.f32 %v2155_v18, %v5649_v32 }
 0x230   : > { %v1922_v27 = vld [vmem:[#allocation2 + $0x1a8] sm:$0xff]  ;;  %v1883_v46 = vmax.f32 %v1803_v31, %v1843_v15  ;;  %v1923_v13 = vld [vmem:[#allocation2 + $0x1b0] sm:$0xff]  ;;  %v1884_v37 = vmax.f32 %v1804_v35, %v1844_v0  ;;  %v2249_v23 = vmax.f32 %v2217_v43, %v5653_v28  ;;  %v2156_v30 = vmax.f32 %v5627_v24, %v5643_v60 }
 0x231   : > { %v1962_v26 = vmax.f32 %v1882_v42, %v1922_v27  ;;  %v1805_v12 = vld [vmem:[#allocation2 + $0x1ce] sm:$0xff]  ;;  %v3034_v6 = vpack.c.bf16 %v2247_v61, %v2246_v49  ;;  %v2248_v25 = vmax.f32 %v2216_v55, %v5651_v8  ;;  %v1806_v11 = vld [vmem:[#allocation2 + $0x1e6] sm:$0xff]  ;;  %v2218_v16 = vmax.f32 %v2186_v36, %v5651_v8 }
 0x232   : > { %v1845_v54 = vld [vmem:[#allocation2 + $0x1cf] sm:$0xff]  ;;  %v1963_v63 = vmax.f32 %v1883_v46, %v1923_v13  ;;  %v1846_v15 = vld [vmem:[#allocation2 + $0x1e7] sm:$0xff]  ;;  %v2219_v62 = vmax.f32 %v2187_v52, %v5653_v28  ;;  %v2157_v53 = vmax.f32 %v5629_v45, %v5649_v32  ;;  %v2188_v55 = vmax.f32 %v2156_v30, %v5651_v8 }
 0x233   : > { %v2002_v1 = vld [vmem:[#allocation2 + $0x1a9] sm:$0xff]  ;;  %v2003_v47 = vld [vmem:[#allocation2 + $0x1b1] sm:$0xff]  ;;  %v1885_v14 = vmax.f32 %v1805_v12, %v1845_v54  ;;  %3923 = vmatmul.mubr.bf16.vlgmr.msra.gmra.mrb[16].mxu1 %v3034_v6  ;;  %v3035_v35 = vpack.c.bf16 %v2249_v23, %v2248_v25  ;;  %v1886_v43 = vmax.f32 %v1806_v11, %v1846_v15  ;;  %v2158_v6 = vmax.f32 %v5643_v60, %v5651_v8 }
 0x234   : > { %v2042_v22 = vmax.f32 %v1962_v26, %v2002_v1  ;;  %v2082_v50 = vld [vmem:[#allocation2 + $0x1aa] sm:$0xff]  ;;  %v2043_v20 = vmax.f32 %v1963_v63, %v2003_v47  ;;  %v2083_v0 = vld [vmem:[#allocation2 + $0x1b2] sm:$0xff]  ;;  %v2159_v60 = vmax.f32 %v5649_v32, %v5653_v28 }
 0x235   : > { %v1924_v9 = vld [vmem:[#allocation2 + $0x1c8] sm:$0xff]  ;;  %v1925_v59 = vld [vmem:[#allocation2 + $0x1d0] sm:$0xff]  ;;  %3926 = vmatprep.mubr.bf16.mxu1 %v3035_v35 }
 0x236   : > { %v5669_v3 = vmax.f32 %v2042_v22, %v2082_v50  ;;  %v1964_v38 = vmax.f32 %v1884_v37, %v1924_v9  ;;  %v1807_v31 = vld [vmem:[#allocation2 + $0x1ee] sm:$0xff]  ;;  %v1965_v49 = vmax.f32 %v1885_v14, %v1925_v59  ;;  %v5675_v27 = vmax.f32 %v2043_v20, %v2083_v0  ;;  %v1808_v63 = vld [vmem:[#allocation2 + $0x206] sm:$0xff] }
 0x237   : > { %v1847_v42 = vld [vmem:[#allocation2 + $0x1ef] sm:$0xff]  ;;  %v2189_v37 = vmax.f32 %v2157_v53, %v5653_v28  ;;  %v1848_v47 = vld [vmem:[#allocation2 + $0x207] sm:$0xff]  ;;  %v1966_v50 = vmax.f32 %v1886_v43, %v5407_v5 }
 0x238   : > { %v2004_v44 = vld [vmem:[#allocation2 + $0x1c9] sm:$0xff]  ;;  %v2250_v61 = vmax.f32 %v2218_v16, %v5669_v3  ;;  %v2005_v46 = vld [vmem:[#allocation2 + $0x1d1] sm:$0xff]  ;;  %v1887_v13 = vmax.f32 %v1807_v31, %v1847_v42  ;;  %v2251_v1 = vmax.f32 %v2219_v62, %v5675_v27  ;;  %v2220_v22 = vmax.f32 %v2188_v55, %v5669_v3 }
 0x239   : > { %v2044_v26 = vmax.f32 %v1964_v38, %v2004_v44  ;;  %v2045_v12 = vmax.f32 %v1965_v49, %v2005_v46  ;;  %v2084_v54 = vld [vmem:[#allocation2 + $0x1ca] sm:$0xff]  ;;  %v2085_v18 = vld [vmem:[#allocation2 + $0x1d2] sm:$0xff]  ;;  %v2221_v14 = vmax.f32 %v2189_v37, %v5675_v27  ;;  %v2190_v11 = vmax.f32 %v2158_v6, %v5669_v3 }
 0x23a   : > { %v1967_v36 = vmax.f32 %v1887_v13, %v5410_v19  ;;  %v1809_v25 = vld [vmem:[#allocation2 + $0x20e] sm:$0xff]  ;;  %v3036_v52 = vpack.c.bf16 %v2251_v1, %v2250_v61  ;;  %v1888_v5 = vmax.f32 %v1808_v63, %v1848_v47  ;;  %v2191_v42 = vmax.f32 %v2159_v60, %v5675_v27  ;;  %v1810_v62 = vld [vmem:[#allocation2 + $0x226] sm:$0xff] }
 0x23b   : > { %v5682_v24 = vmax.f32 %v2044_v26, %v2084_v54  ;;  %v5687_v45 = vmax.f32 %v2045_v12, %v2085_v18  ;;  %v1849_v23 = vld [vmem:[#allocation2 + $0x20f] sm:$0xff]  ;;  %v1850_v49 = vld [vmem:[#allocation2 + $0x227] sm:$0xff]  ;;  %v2160_v61 = vmax.f32 %v5651_v8, %v5669_v3  ;;  %v2161_v43 = vmax.f32 %v5653_v28, %v5675_v27 }
 0x23c   : > { %v2006_v9 = vld [vmem:[#allocation2 + $0x1e9] sm:$0xff]  ;;  %v2007_v59 = vld [vmem:[#allocation2 + $0x1f1] sm:$0xff]  ;;  %3927 = vmatmul.mubr.bf16.gmra.mrb[20].mxu1 %v3036_v52  ;;  %v1889_v0 = vmax.f32 %v1809_v25, %v1849_v23  ;;  %v1968_v30 = vmax.f32 %v1888_v5, %v5431_v58  ;;  %v1890_v37 = vmax.f32 %v1810_v62, %v1850_v49 }
 0x23d   : > { %v2252_v20 = vmax.f32 %v2220_v22, %v5682_v24  ;;  %v2046_v16 = vmax.f32 %v1966_v50, %v2006_v9  ;;  %v2047_v38 = vmax.f32 %v1967_v36, %v2007_v59  ;;  %v2086_v31 = vld [vmem:[#allocation2 + $0x1ea] sm:$0xff]  ;;  %v2253_v19 = vmax.f32 %v2221_v14, %v5687_v45  ;;  %v2087_v15 = vld [vmem:[#allocation2 + $0x1f2] sm:$0xff] }
 0x23e   : > { %v2222_v35 = vmax.f32 %v2190_v11, %v5682_v24  ;;  %v1811_v46 = vld [vmem:[#allocation2 + $0x22e] sm:$0xff]  ;;  %v2223_v12 = vmax.f32 %v2191_v42, %v5687_v45  ;;  %v1969_v54 = vmax.f32 %v1889_v0, %v5435_v7  ;;  %v2192_v58 = vmax.f32 %v2160_v61, %v5682_v24  ;;  %v1812_v50 = vld [vmem:[#allocation2 + $0x246] sm:$0xff] }
 0x23f   : > { %v5700_v32 = vmax.f32 %v2046_v16, %v2086_v31  ;;  %v5702_v44 = vmax.f32 %v2047_v38, %v2087_v15  ;;  %v1851_v26 = vld [vmem:[#allocation2 + $0x22f] sm:$0xff]  ;;  %v3037_v53 = vpack.c.bf16 %v2253_v19, %v2252_v20  ;;  %v2193_v22 = vmax.f32 %v2161_v43, %v5687_v45  ;;  %v1852_v14 = vld [vmem:[#allocation2 + $0x247] sm:$0xff] }
 0x240   : > { %v2008_v55 = vld [vmem:[#allocation2 + $0x209] sm:$0xff]  ;;  %v2009_v1 = vld [vmem:[#allocation2 + $0x211] sm:$0xff]  ;;  %v1891_v7 = vmax.f32 %v1811_v46, %v1851_v26  ;;  %v1970_v25 = vmax.f32 %v1890_v37, %v5461_v57  ;;  %v2162_v23 = vmax.f32 %v5669_v3, %v5682_v24  ;;  %v2163_v57 = vmax.f32 %v5675_v27, %v5687_v45 }
 0x241   : > { %v2254_v13 = vmax.f32 %v2222_v35, %v5700_v32  ;;  %v2048_v18 = vmax.f32 %v1968_v30, %v2008_v55  ;;  %3930 = vmatprep.mubr.bf16.mxu1 %v3037_v53  ;;  %v2255_v8 = vmax.f32 %v2223_v12, %v5702_v44  ;;  %v2049_v6 = vmax.f32 %v1969_v54, %v2009_v1  ;;  %v2088_v63 = vld [vmem:[#allocation2 + $0x20a] sm:$0xff]  ;;  %v2089_v47 = vld [vmem:[#allocation2 + $0x212] sm:$0xff] }
 0x242   : > { %v2224_v28 = vmax.f32 %v2192_v58, %v5700_v32  ;;  %v1813_v52 = vld [vmem:[#allocation2 + $0x24e] sm:$0xff]  ;;  %v2225_v11 = vmax.f32 %v2193_v22, %v5702_v44  ;;  %v1971_v20 = vmax.f32 %v1891_v7, %v5465_v48  ;;  %v2194_v3 = vmax.f32 %v2162_v23, %v5700_v32  ;;  %v1814_v49 = vld [vmem:[#allocation2 + $0x266] sm:$0xff] }
 0x243   : > { %v5715_v36 = vmax.f32 %v2048_v18, %v2088_v63  ;;  %v1853_v9 = vld [vmem:[#allocation2 + $0x24f] sm:$0xff]  ;;  %v3038_v59 = vpack.c.bf16 %v2255_v8, %v2254_v13  ;;  %v5721_v60 = vmax.f32 %v2049_v6, %v2089_v47  ;;  %v1892_v0 = vmax.f32 %v1812_v50, %v1852_v14  ;;  %v1854_v26 = vld [vmem:[#allocation2 + $0x267] sm:$0xff] }
 0x244   : > { %v2010_v16 = vld [vmem:[#allocation2 + $0x229] sm:$0xff]  ;;  %v2011_v31 = vld [vmem:[#allocation2 + $0x231] sm:$0xff]  ;;  %v1893_v62 = vmax.f32 %v1813_v52, %v1853_v9  ;;  %v2195_v30 = vmax.f32 %v2163_v57, %v5702_v44  ;;  %v2164_v27 = vmax.f32 %v5682_v24, %v5700_v32  ;;  %v2165_v37 = vmax.f32 %v5687_v45, %v5702_v44 }
 0x245   : > { %v2256_v38 = vmax.f32 %v2224_v28, %v5715_v36  ;;  %v2050_v5 = vmax.f32 %v1970_v25, %v2010_v16  ;;  %3931 = vmatmul.mubr.bf16.gmra.mrb[24].mxu1 %v3038_v59  ;;  %v2257_v19 = vmax.f32 %v2225_v11, %v5721_v60  ;;  %v2051_v15 = vmax.f32 %v1971_v20, %v2011_v31  ;;  %v2090_v42 = vld [vmem:[#allocation2 + $0x22a] sm:$0xff]  ;;  %v2091_v35 = vld [vmem:[#allocation2 + $0x232] sm:$0xff] }
 0x246   : > { %v2226_v61 = vmax.f32 %v2194_v3, %v5715_v36  ;;  %v1815_v46 = vld [vmem:[#allocation2 + $0x26e] sm:$0xff]  ;;  %v1972_v55 = vmax.f32 %v1892_v0, %v5483_v41  ;;  %v1973_v43 = vmax.f32 %v1893_v62, %v5489_v56  ;;  %v2227_v13 = vmax.f32 %v2195_v30, %v5721_v60  ;;  %v1816_v25 = vld [vmem:[#allocation2 + $0x286] sm:$0xff] }
 0x247   : > { %v5730_v48 = vmax.f32 %v2050_v5, %v2090_v42  ;;  %v1855_v53 = vld [vmem:[#allocation2 + $0x26f] sm:$0xff]  ;;  %v3039_v12 = vpack.c.bf16 %v2257_v19, %v2256_v38  ;;  %v5736_v54 = vmax.f32 %v2051_v15, %v2091_v35  ;;  %v2196_v24 = vmax.f32 %v2164_v27, %v5715_v36  ;;  %v1856_v45 = vld [vmem:[#allocation2 + $0x287] sm:$0xff] }
 0x248   : > { %v2012_v18 = vld [vmem:[#allocation2 + $0x249] sm:$0xff]  ;;  %v2013_v58 = vld [vmem:[#allocation2 + $0x251] sm:$0xff]  ;;  %v1894_v47 = vmax.f32 %v1814_v49, %v1854_v26  ;;  %v1895_v22 = vmax.f32 %v1815_v46, %v1855_v53  ;;  %v2197_v7 = vmax.f32 %v2165_v37, %v5721_v60  ;;  %v2166_v28 = vmax.f32 %v5700_v32, %v5715_v36 }
 0x249   : > { %v2258_v1 = vmax.f32 %v2226_v61, %v5730_v48  ;;  %3934 = vmatprep.mubr.bf16.mxu1 %v3039_v12  ;;  %v2052_v8 = vmax.f32 %v1972_v55, %v2012_v18  ;;  %v2053_v6 = vmax.f32 %v1973_v43, %v2013_v58  ;;  %v2092_v63 = vld [vmem:[#allocation2 + $0x24a] sm:$0xff]  ;;  %v2259_v41 = vmax.f32 %v2227_v13, %v5736_v54  ;;  %v2093_v56 = vld [vmem:[#allocation2 + $0x252] sm:$0xff] }
 0x24a   : > { %v2228_v50 = vmax.f32 %v2196_v24, %v5730_v48  ;;  %v1974_v14 = vmax.f32 %v1894_v47, %v5513_v10  ;;  %v1975_v9 = vmax.f32 %v1895_v22, %v5519_v4  ;;  %v1817_v59 = vld [vmem:[#allocation2 + $0x28e] sm:$0xff]  ;;  %v2229_v16 = vmax.f32 %v2197_v7, %v5736_v54  ;;  %v1818_v49 = vld [vmem:[#allocation2 + $0x2a6] sm:$0xff] }
 0x24b   : > { %v5750_v23 = vmax.f32 %v2052_v8, %v2092_v63  ;;  %v5752_v52 = vmax.f32 %v2053_v6, %v2093_v56  ;;  %v1857_v11 = vld [vmem:[#allocation2 + $0x28f] sm:$0xff]  ;;  %v3040_v20 = vpack.c.bf16 %v2259_v41, %v2258_v1  ;;  %v2167_v32 = vmax.f32 %v5702_v44, %v5721_v60  ;;  %v1858_v30 = vld [vmem:[#allocation2 + $0x2a7] sm:$0xff] }
 0x24c   : > { %v2014_v38 = vld [vmem:[#allocation2 + $0x269] sm:$0xff]  ;;  %v2015_v31 = vld [vmem:[#allocation2 + $0x271] sm:$0xff]  ;;  %v2198_v5 = vmax.f32 %v2166_v28, %v5730_v48  ;;  %v1896_v10 = vmax.f32 %v1816_v25, %v1856_v45  ;;  %v1897_v62 = vmax.f32 %v1817_v59, %v1857_v11  ;;  %v2168_v46 = vmax.f32 %v5715_v36, %v5730_v48 }
 0x24d   : > { %v2260_v57 = vmax.f32 %v2228_v50, %v5750_v23  ;;  %v2054_v3 = vmax.f32 %v1974_v14, %v2014_v38  ;;  %v2055_v19 = vmax.f32 %v1975_v9, %v2015_v31  ;;  %v2094_v15 = vld [vmem:[#allocation2 + $0x26a] sm:$0xff]  ;;  %3935 = vmatmul.mubr.bf16.gmra.mrb[28].mxu1 %v3040_v20  ;;  %v2261_v4 = vmax.f32 %v2229_v16, %v5752_v52  ;;  %v2095_v42 = vld [vmem:[#allocation2 + $0x272] sm:$0xff] }
 0x24e   : > { %v2199_v35 = vmax.f32 %v2167_v32, %v5736_v54  ;;  %v2230_v0 = vmax.f32 %v2198_v5, %v5750_v23  ;;  %v1976_v27 = vmax.f32 %v1896_v10, %v5535_v17  ;;  %v1819_v26 = vld [vmem:[#allocation2 + $0x2ae] sm:$0xff]  ;;  %v1977_v43 = vmax.f32 %v1897_v62, %v5541_v34  ;;  %v1820_v22 = vld [vmem:[#allocation2 + $0x2c6] sm:$0xff] }
 0x24f   : > { %v5764_v44 = vmax.f32 %v2054_v3, %v2094_v15  ;;  %v5766_v61 = vmax.f32 %v2055_v19, %v2095_v42  ;;  %v1859_v53 = vld [vmem:[#allocation2 + $0x2af] sm:$0xff]  ;;  %v3041_v12 = vpack.c.bf16 %v2261_v4, %v2260_v57  ;;  %v2169_v1 = vmax.f32 %v5721_v60, %v5736_v54  ;;  %v1860_v28 = vld [vmem:[#allocation2 + $0x2c7] sm:$0xff] }
 0x250   : > { %v2231_v55 = vmax.f32 %v2199_v35, %v5752_v52  ;;  %v2016_v13 = vld [vmem:[#allocation2 + $0x289] sm:$0xff]  ;;  %v2017_v58 = vld [vmem:[#allocation2 + $0x291] sm:$0xff]  ;;  %v2200_v17 = vmax.f32 %v2168_v46, %v5750_v23  ;;  %v1898_v24 = vmax.f32 %v1818_v49, %v1858_v30  ;;  %v1899_v34 = vmax.f32 %v1819_v26, %v1859_v53 }
 0x251   : > { %v2262_v18 = vmax.f32 %v2230_v0, %v5764_v44  ;;  %v2056_v37 = vmax.f32 %v1976_v27, %v2016_v13  ;;  %3938 = vmatprep.mubr.bf16.mxu1 %v3041_v12  ;;  %v2057_v8 = vmax.f32 %v1977_v43, %v2017_v58  ;;  %v2096_v6 = vld [vmem:[#allocation2 + $0x28a] sm:$0xff]  ;;  %v2097_v63 = vld [vmem:[#allocation2 + $0x292] sm:$0xff]  ;;  %v2201_v47 = vmax.f32 %v2169_v1, %v5752_v52 }
 0x252   : > { %v2263_v36 = vmax.f32 %v2231_v55, %v5766_v61  ;;  %v2232_v60 = vmax.f32 %v2200_v17, %v5764_v44  ;;  %v1978_v56 = vmax.f32 %v1898_v24, %v5564_v51  ;;  %v2170_v7 = vmax.f32 %v5730_v48, %v5750_v23  ;;  %v1821_v50 = vld [vmem:[#allocation2 + $0x2ce] sm:$0xff]  ;;  %v1822_v15 = vld [vmem:[#allocation2 + $0x2e6] sm:$0xff] }
 0x253   : > { %v5779_v41 = vmax.f32 %v2056_v37, %v2096_v6  ;;  %v1861_v25 = vld [vmem:[#allocation2 + $0x2cf] sm:$0xff]  ;;  %v5785_v14 = vmax.f32 %v2057_v8, %v2097_v63  ;;  %v2233_v9 = vmax.f32 %v2201_v47, %v5766_v61  ;;  %v1979_v59 = vmax.f32 %v1899_v34, %v5568_v21  ;;  %v1862_v35 = vld [vmem:[#allocation2 + $0x2e7] sm:$0xff] }
 0x254   : > { %v3042_v45 = vpack.c.bf16 %v2263_v36, %v2262_v18  ;;  %v2018_v11 = vld [vmem:[#allocation2 + $0x2a9] sm:$0xff]  ;;  %v2019_v16 = vld [vmem:[#allocation2 + $0x2b1] sm:$0xff]  ;;  %v2171_v51 = vmax.f32 %v5736_v54, %v5752_v52  ;;  %v2202_v48 = vmax.f32 %v2170_v7, %v5764_v44  ;;  %v1900_v3 = vmax.f32 %v1820_v22, %v1860_v28 }
 0x255   : > { %v2264_v20 = vmax.f32 %v2232_v60, %v5779_v41  ;;  %v2058_v38 = vmax.f32 %v1978_v56, %v2018_v11  ;;  %v2265_v31 = vmax.f32 %v2233_v9, %v5785_v14  ;;  %v2059_v32 = vmax.f32 %v1979_v59, %v2019_v16  ;;  %v2098_v5 = vld [vmem:[#allocation2 + $0x2aa] sm:$0xff]  ;;  %v2099_v57 = vld [vmem:[#allocation2 + $0x2b2] sm:$0xff] }
 0x256   : > { %3939 = vmatmul.mubr.bf16.gmra.mrb[0].mxu1 %v3042_v45  ;;  %v1901_v19 = vmax.f32 %v1821_v50, %v1861_v25  ;;  %v2203_v10 = vmax.f32 %v2171_v51, %v5766_v61  ;;  %v2234_v4 = vmax.f32 %v2202_v48, %v5779_v41  ;;  %v2172_v54 = vmax.f32 %v5750_v23, %v5764_v44  ;;  %v1823_v42 = vld [vmem:[#allocation2 + $0x2ee] sm:$0xff]  ;;  %v1824_v58 = vld [vmem:[#allocation2 + $0x306] sm:$0xff] }
 0x257   : > { %v5794_v21 = vmax.f32 %v2058_v38, %v2098_v5  ;;  %v1863_v0 = vld [vmem:[#allocation2 + $0x2ef] sm:$0xff]  ;;  %v3043_v62 = vpack.c.bf16 %v2265_v31, %v2264_v20  ;;  %v5800_v49 = vmax.f32 %v2059_v32, %v2099_v57  ;;  %v1980_v30 = vmax.f32 %v1900_v3, %v5573_v33  ;;  %v1866_v11 = vld [vmem:[#allocation2 + $0x327] sm:$0xff] }
 0x258   : > { %v1981_v27 = vmax.f32 %v1901_v19, %v5581_v40  ;;  %v2235_v46 = vmax.f32 %v2203_v10, %v5785_v14  ;;  %v2020_v53 = vld [vmem:[#allocation2 + $0x2c9] sm:$0xff]  ;;  %v2021_v12 = vld [vmem:[#allocation2 + $0x2d1] sm:$0xff]  ;;  %v2173_v55 = vmax.f32 %v5752_v52, %v5766_v61  ;;  %v2204_v23 = vmax.f32 %v2172_v54, %v5779_v41 }
 0x259   : > { %v2266_v26 = vmax.f32 %v2234_v4, %v5794_v21  ;;  %3942 = vmatprep.mubr.bf16.mxu1 %v3043_v62  ;;  %v2060_v43 = vmax.f32 %v1980_v30, %v2020_v53  ;;  %v1902_v1 = vmax.f32 %v1822_v15, %v1862_v35  ;;  %v1903_v18 = vmax.f32 %v1823_v42, %v1863_v0  ;;  %v2100_v40 = vld [vmem:[#allocation2 + $0x2ca] sm:$0xff]  ;;  %v2101_v37 = vld [vmem:[#allocation2 + $0x2d2] sm:$0xff] }
 0x25a   : > { %v2061_v13 = vmax.f32 %v1981_v27, %v2021_v12  ;;  %v2267_v33 = vmax.f32 %v2235_v46, %v5800_v49  ;;  %v2205_v17 = vmax.f32 %v2173_v55, %v5785_v14  ;;  %v2236_v24 = vmax.f32 %v2204_v23, %v5794_v21  ;;  %v1864_v52 = vld [vmem:[#allocation2 + $0x307] sm:$0xff]  ;;  %v1865_v22 = vld [vmem:[#allocation2 + $0x30f] sm:$0xff] }
 0x25b   : > { %v2174_v36 = vmax.f32 %v5764_v44, %v5779_v41  ;;  %v5814_v8 = vmax.f32 %v2060_v43, %v2100_v40  ;;  %v1982_v63 = vmax.f32 %v1902_v1, %v5586_v2  ;;  %v1983_v47 = vmax.f32 %v1903_v18, %v5602_v39  ;;  %v1825_v34 = vld [vmem:[#allocation2 + $0x30e] sm:$0xff]  ;;  %v1826_v2 = vld [vmem:[#allocation2 + $0x326] sm:$0xff] }
 0x25c   : > { %v5816_v6 = vmax.f32 %v2061_v13, %v2101_v37  ;;  %v3044_v60 = vpack.c.bf16 %v2267_v33, %v2266_v26  ;;  %v2237_v56 = vmax.f32 %v2205_v17, %v5800_v49  ;;  %v2022_v7 = vld [vmem:[#allocation2 + $0x2e9] sm:$0xff]  ;;  %v2023_v50 = vld [vmem:[#allocation2 + $0x2f1] sm:$0xff]  ;;  %v2175_v28 = vmax.f32 %v5766_v61, %v5785_v14 }
 0x25d   : > { %v2206_v44 = vmax.f32 %v2174_v36, %v5794_v21  ;;  %v2268_v25 = vmax.f32 %v2236_v24, %v5814_v8  ;;  %v2062_v45 = vmax.f32 %v1982_v63, %v2022_v7  ;;  %v2063_v9 = vmax.f32 %v1983_v47, %v2023_v50  ;;  %v2102_v20 = vld [vmem:[#allocation2 + $0x2ea] sm:$0xff]  ;;  %v2103_v16 = vld [vmem:[#allocation2 + $0x2f2] sm:$0xff] }
 0x25e   : > { %v1904_v59 = vmax.f32 %v1824_v58, %v1864_v52  ;;  %3943 = vmatmul.mubr.bf16.gmra.mrb[4].mxu1 %v3044_v60  ;;  %v2269_v39 = vmax.f32 %v2237_v56, %v5816_v6  ;;  %v2207_v38 = vmax.f32 %v2175_v28, %v5800_v49  ;;  %v1905_v48 = vmax.f32 %v1825_v34, %v1865_v22  ;;  %v2024_v61 = vld [vmem:[#allocation2 + $0x309] sm:$0xff]  ;;  %v2025_v57 = vld [vmem:[#allocation2 + $0x311] sm:$0xff] }
 0x25f   : > { %v2238_v51 = vmax.f32 %v2206_v44, %v5814_v8  ;;  %v2142_v31 = vmax.f32 %v2062_v45, %v2102_v20  ;;  %v2143_v32 = vmax.f32 %v2063_v9, %v2103_v16  ;;  %v2176_v3 = vmax.f32 %v5779_v41, %v5794_v21  ;;  %v1827_v19 = vld [vmem:[#allocation2 + $0x32e] sm:$0xff] }
 0x260   : > { %v1984_v5 = vmax.f32 %v1904_v59, %v5588_v29  ;;  %v1867_v15 = vld [vmem:[#allocation2 + $0x32f] sm:$0xff]  ;;  %v3045_v10 = vpack.c.bf16 %v2269_v39, %v2268_v25  ;;  %v2239_v4 = vmax.f32 %v2207_v38, %v5816_v6  ;;  %v1985_v54 = vmax.f32 %v1905_v48, %v5588_v29 }
 0x261   : > { %v2104_v42 = vld [vmem:[#allocation2 + $0x30a] sm:$0xff]  ;;  %v2177_v35 = vmax.f32 %v5785_v14, %v5800_v49  ;;  %v2270_v0 = vmax.f32 %v2238_v51, %v2142_v31  ;;  %v2105_v30 = vld [vmem:[#allocation2 + $0x312] sm:$0xff]  ;;  %v2208_v27 = vmax.f32 %v2176_v3, %v5814_v8  ;;  %v1906_v46 = vmax.f32 %v1826_v2, %v1866_v11 }
 0x262   : > { %v2064_v62 = vmax.f32 %v1984_v5, %v2024_v61  ;;  %3946 = vmatprep.mubr.bf16.mxu1 %v3045_v10  ;;  %v2271_v26 = vmax.f32 %v2239_v4, %v2143_v32  ;;  %v2065_v41 = vmax.f32 %v1985_v54, %v2025_v57  ;;  %v1907_v12 = vmax.f32 %v1827_v19, %v1867_v15  ;;  %v2026_v55 = vld [vmem:[#allocation2 + $0x329] sm:$0xff]  ;;  %v2027_v1 = vld [vmem:[#allocation2 + $0x331] sm:$0xff] }
 0x263   : > { %v2209_v53 = vmax.f32 %v2177_v35, %v5816_v6  ;;  %v2240_v43 = vmax.f32 %v2208_v27, %v2142_v31  ;;  %v1986_v13 = vmax.f32 %v1906_v46, %v5588_v29  ;;  %v2178_v14 = vmax.f32 %v5794_v21, %v5814_v8  ;;  %v2106_v37 = vld [vmem:[#allocation2 + $0x32a] sm:$0xff]  ;;  %v2107_v24 = vld [vmem:[#allocation2 + $0x332] sm:$0xff] }
 0x264   : > { %v2144_v23 = vmax.f32 %v2064_v62, %v2104_v42  ;;  %v3046_v18 = vpack.c.bf16 %v2271_v26, %v2270_v0  ;;  %v2145_v58 = vmax.f32 %v2065_v41, %v2105_v30  ;;  %v1987_v40 = vmax.f32 %v1907_v12, %v5588_v29  ;;  %v5886_v26 = vld [vmem:[%s6030_s4] ss:$0 sm:$0xff] }
 0x265   : > { %v2241_v33 = vmax.f32 %v2209_v53, %v2143_v32  ;;  %v2066_v17 = vmax.f32 %v1986_v13, %v2026_v55  ;;  %v2179_v36 = vmax.f32 %v5800_v49, %v5816_v6  ;;  %v2210_v52 = vmax.f32 %v2178_v14, %v2142_v31 }
 0x266   : > { %3947 = vmatmul.mubr.bf16.gmra.mrb[8].mxu1 %v3046_v18  ;;  %v2272_v63 = vmax.f32 %v2240_v43, %v2144_v23  ;;  %v2067_v34 = vmax.f32 %v1987_v40, %v2027_v1 }
 0x267   : > { %v2273_v47 = vmax.f32 %v2241_v33, %v2145_v58  ;;  %v2146_v22 = vmax.f32 %v2066_v17, %v2106_v37  ;;  %v2211_v60 = vmax.f32 %v2179_v36, %v2143_v32  ;;  %v2242_v56 = vmax.f32 %v2210_v52, %v2144_v23 }
 0x268   : > { %v2147_v8 = vmax.f32 %v2067_v34, %v2107_v24 }
 0x269   : > { %v3047_v21 = vpack.c.bf16 %v2273_v47, %v2272_v63  ;;  %v2243_v7 = vmax.f32 %v2211_v60, %v2145_v58  ;;  %v2274_v50 = vmax.f32 %v2242_v56, %v2146_v22 }
 0x26b   : > { %3950 = vmatprep.mubr.bf16.mxu1 %v3047_v21  ;;  %v2275_v29 = vmax.f32 %v2243_v7, %v2147_v8 }
 0x26d   : > { %v3048_v28 = vpack.c.bf16 %v2275_v29, %v2274_v50 }
 0x26f   : > { %3951 = vmatmul.mubr.bf16.gmra.mrb[12].mxu1 %v3048_v28 }
 0x296   : > { %v5843_v44 = vpop.f32.mrb[48].mxu0 }
 0x297   : > { %v5845_v25 = vpop.f32.mrb[49].mxu0 }
 0x298   : > { %v5847_v49 = vpop.f32.mrb[50].mxu0 }
 0x299   : > { %v5849_v6 = vpop.f32.mrb[51].mxu0 }
 0x2a8   : > { %v5851_v45 = vpop.f32.mrb[52].mxu0 }
 0x2a9   : > { %v5853_v9 = vpop.f32.mrb[53].mxu0 }
 0x2aa   : > { %v5855_v59 = vpop.f32.mrb[54].mxu0 }
 0x2ab   : > { %v5857_v2 = vpop.f32.mrb[55].mxu0 }
 0x2ba   : > { %v5859_v11 = vpop.f32.mrb[56].mxu0 }
 0x2bb   : > { %v5861_v39 = vpop.f32.mrb[57].mxu0 }
 0x2bc   : > { %v5863_v20 = vpop.f32.mrb[58].mxu0 }
 0x2bd   : > { %v5865_v16 = vpop.f32.mrb[59].mxu0 }
 0x2c7   : > { %v5867_v38 = vpop.f32.mrb[60].mxu0 }
 0x2c8   : > { %v5869_v51 = vpop.f32.mrb[61].mxu0 }
 0x2c9   : > { %v5871_v48 = vpop.f32.mrb[62].mxu0 }
 0x2ca   : > { %v5873_v61 = vpop.f32.mrb[63].mxu0 }
 0x2d1   : > { %v3828_v31 = vpop.f32.mrb[32].mxu0 }
 0x2d2   : > { %v2632_v32 = vpop.f32.mrb[33].mxu0 }
 0x2d3   : > { %v3829_v5 = vpop.f32.mrb[34].mxu0 }
 0x2d4   : > { %v2635_v57 = vpop.f32.mrb[35].mxu0 }
 0x2da   : > { %v3832_v3 = vpop.f32.mrb[36].mxu0 }
 0x2db   : > { %v2648_v19 = vpop.f32.mrb[37].mxu0 }
 0x2dc   : > { %v3833_v15 = vpop.f32.mrb[38].mxu0 }
 0x2dd   : > { %v2651_v10 = vpop.f32.mrb[39].mxu0 }
 0x2e2   : > { %v3836_v4 = vpop.f32.mrb[40].mxu0 }
 0x2e3   : > { %v2664_v54 = vpop.f32.mrb[41].mxu0 }
 0x2e4   : > { %v3837_v42 = vpop.f32.mrb[42].mxu0 }
 0x2e5   : > { %v2667_v35 = vpop.f32.mrb[43].mxu0 }
 0x2f1   : > { %v5875_v0 = vpop.f32.mrb[44].mxu0 }
 0x2f2   : > { %v5877_v62 = vpop.f32.mrb[45].mxu0 }
 0x2f3   : > { %v5879_v30 = vpop.f32.mrb[46].mxu0 }
 0x2f4   : > { %v5881_v27 = vpop.f32.mrb[47].mxu0 }
 0x306   : > { %v3924_v46 = vpop.f32.mrb[16].mxu1 }
 0x307   : > { %v3970_v41 = vadd.f32 %v3924_v46, %v3828_v31  ;;  %v3148_v53 = vpop.f32.mrb[17].mxu1 }
 0x308   : > { %v3971_v12 = vadd.f32 %v3148_v53, %v2632_v32  ;;  %v3925_v55 = vpop.f32.mrb[18].mxu1 }
 0x309   : > { %v3316_v23 = vadd.f32 %v3970_v41, %v5886_v26  ;;  %v3972_v43 = vadd.f32 %v3925_v55, %v3829_v5  ;;  %v3151_v13 = vpop.f32.mrb[19].mxu1 }
 0x30a   : > { %v3314_v1 = vadd.f32 %v3971_v12, %v5886_v26  ;;  %v3973_v14 = vadd.f32 %v3151_v13, %v2635_v57 }
 0x30b   : > { %v3348_v18 = vmax.f32 %v3316_v23, 0.0  ;;  %v3317_v58 = vadd.f32 %v3972_v43, %v5886_v26 }
 0x30c   : > { %v3346_v33 = vmax.f32 %v3314_v1, 0.0  ;;  %v3315_v40 = vadd.f32 %v3973_v14, %v5886_v26 }
 0x30d   : > { %3380 = vst [vmem:[%s5893_s28 + $0x10] sm:$0xff] %v3348_v18  ;;  %v3349_v37 = vmax.f32 %v3317_v58, 0.0 }
 0x30e   : > { %3378 = vst [vmem:[%s5893_s28] sm:$0xff] %v3346_v33  ;;  %v3347_v17 = vmax.f32 %v3315_v40, 0.0 }
 0x30f   : > { %v3928_v24 = vpop.f32.mrb[20].mxu1  ;;  %3381 = vst [vmem:[%s5893_s28 + $0x18] sm:$0xff] %v3349_v37 }
 0x310   : > { %v3974_v36 = vadd.f32 %v3928_v24, %v3832_v3  ;;  %v3164_v52 = vpop.f32.mrb[21].mxu1  ;;  %3379 = vst [vmem:[%s5893_s28 + $0x8] sm:$0xff] %v3347_v17 }
 0x311   : > { %v3975_v63 = vadd.f32 %v3164_v52, %v2648_v19  ;;  %v3929_v47 = vpop.f32.mrb[22].mxu1 }
 0x312   : > { %v3320_v34 = vadd.f32 %v3974_v36, %v5886_v26  ;;  %v3976_v22 = vadd.f32 %v3929_v47, %v3833_v15  ;;  %v3167_v60 = vpop.f32.mrb[23].mxu1 }
 0x313   : > { %v3318_v56 = vadd.f32 %v3975_v63, %v5886_v26  ;;  %v3977_v21 = vadd.f32 %v3167_v60, %v2651_v10 }
 0x314   : > { %v3352_v8 = vmax.f32 %v3320_v34, 0.0  ;;  %v3321_v7 = vadd.f32 %v3976_v22, %v5886_v26 }
 0x315   : > { %v3350_v50 = vmax.f32 %v3318_v56, 0.0  ;;  %v3319_v29 = vadd.f32 %v3977_v21, %v5886_v26 }
 0x316   : > { %3384 = vst [vmem:[%s5893_s28 + $0x30] sm:$0xff] %v3352_v8  ;;  %v3353_v28 = vmax.f32 %v3321_v7, 0.0 }
 0x317   : > { %3382 = vst [vmem:[%s5893_s28 + $0x20] sm:$0xff] %v3350_v50  ;;  %v3351_v31 = vmax.f32 %v3319_v29, 0.0 }
 0x318   : > { %v3932_v32 = vpop.f32.mrb[24].mxu1  ;;  %3385 = vst [vmem:[%s5893_s28 + $0x38] sm:$0xff] %v3353_v28 }
 0x319   : > { %v3978_v5 = vadd.f32 %v3932_v32, %v3836_v4  ;;  %v3180_v57 = vpop.f32.mrb[25].mxu1  ;;  %3383 = vst [vmem:[%s5893_s28 + $0x28] sm:$0xff] %v3351_v31 }
 0x31a   : > { %v3979_v3 = vadd.f32 %v3180_v57, %v2664_v54  ;;  %v3933_v19 = vpop.f32.mrb[26].mxu1 }
 0x31b   : > { %v3324_v15 = vadd.f32 %v3978_v5, %v5886_v26  ;;  %v3980_v10 = vadd.f32 %v3933_v19, %v3837_v42  ;;  %v3183_v46 = vpop.f32.mrb[27].mxu1 }
 0x31c   : > { %v3322_v41 = vadd.f32 %v3979_v3, %v5886_v26  ;;  %v3981_v53 = vadd.f32 %v3183_v46, %v2667_v35 }
 0x31d   : > { %v3356_v12 = vmax.f32 %v3324_v15, 0.0  ;;  %v3325_v55 = vadd.f32 %v3980_v10, %v5886_v26 }
 0x31e   : > { %v3354_v23 = vmax.f32 %v3322_v41, 0.0  ;;  %v3323_v4 = vadd.f32 %v3981_v53, %v5886_v26 }
 0x31f   : > { %3388 = vst [vmem:[%s5893_s28 + $0x50] sm:$0xff] %v3356_v12  ;;  %v3357_v43 = vmax.f32 %v3325_v55, 0.0 }
 0x320   : > { %3386 = vst [vmem:[%s5893_s28 + $0x40] sm:$0xff] %v3354_v23  ;;  %v3355_v13 = vmax.f32 %v3323_v4, 0.0  ;;  %v3936_v54 = vpop.f32.mrb[28].mxu1 }
 0x321   : > { %3389 = vst [vmem:[%s5893_s28 + $0x58] sm:$0xff] %v3357_v43  ;;  %v3982_v42 = vadd.f32 %v3936_v54, %v5875_v0  ;;  %v3196_v1 = vpop.f32.mrb[29].mxu1 }
 0x322   : > { %3387 = vst [vmem:[%s5893_s28 + $0x48] sm:$0xff] %v3355_v13  ;;  %v3983_v35 = vadd.f32 %v3196_v1, %v5877_v62  ;;  %v3937_v14 = vpop.f32.mrb[30].mxu1 }
 0x323   : > { %v3328_v18 = vadd.f32 %v3982_v42, %v5886_v26  ;;  %v3984_v58 = vadd.f32 %v3937_v14, %v5879_v30  ;;  %v3199_v33 = vpop.f32.mrb[31].mxu1 }
 0x324   : > { %v3326_v40 = vadd.f32 %v3983_v35, %v5886_v26  ;;  %v3985_v37 = vadd.f32 %v3199_v33, %v5881_v27 }
 0x325   : > { %v3360_v17 = vmax.f32 %v3328_v18, 0.0  ;;  %v3329_v24 = vadd.f32 %v3984_v58, %v5886_v26 }
 0x326   : > { %v3358_v36 = vmax.f32 %v3326_v40, 0.0  ;;  %v3327_v0 = vadd.f32 %v3985_v37, %v5886_v26 }
 0x327   : > { %3392 = vst [vmem:[%s5893_s28 + $0x70] sm:$0xff] %v3360_v17  ;;  %v3361_v62 = vmax.f32 %v3329_v24, 0.0 }
 0x328   : > { %3390 = vst [vmem:[%s5893_s28 + $0x60] sm:$0xff] %v3358_v36  ;;  %v3359_v52 = vmax.f32 %v3327_v0, 0.0 }
 0x329   : > { %v3940_v63 = vpop.f32.mrb[0].mxu1  ;;  %3393 = vst [vmem:[%s5893_s28 + $0x78] sm:$0xff] %v3361_v62 }
 0x32a   : > { %v3986_v30 = vadd.f32 %v3940_v63, %v5843_v44  ;;  %v3212_v47 = vpop.f32.mrb[1].mxu1  ;;  %3391 = vst [vmem:[%s5893_s28 + $0x68] sm:$0xff] %v3359_v52 }
 0x32b   : > { %v3987_v27 = vadd.f32 %v3212_v47, %v5845_v25  ;;  %v3941_v34 = vpop.f32.mrb[2].mxu1 }
 0x32c   : > { %v3332_v22 = vadd.f32 %v3986_v30, %v5886_v26  ;;  %v3988_v60 = vadd.f32 %v3941_v34, %v5847_v49  ;;  %v3215_v56 = vpop.f32.mrb[3].mxu1 }
 0x32d   : > { %v3330_v21 = vadd.f32 %v3987_v27, %v5886_v26  ;;  %v3989_v8 = vadd.f32 %v3215_v56, %v5849_v6 }
 0x32e   : > { %v3364_v7 = vmax.f32 %v3332_v22, 0.0  ;;  %v3333_v44 = vadd.f32 %v3988_v60, %v5886_v26 }
 0x32f   : > { %v3362_v50 = vmax.f32 %v3330_v21, 0.0  ;;  %v3331_v29 = vadd.f32 %v3989_v8, %v5886_v26 }
 0x330   : > { %3396 = vst [vmem:[%s5893_s28 + $0x90] sm:$0xff] %v3364_v7  ;;  %v3365_v28 = vmax.f32 %v3333_v44, 0.0 }
 0x331   : > { %3394 = vst [vmem:[%s5893_s28 + $0x80] sm:$0xff] %v3362_v50  ;;  %v3363_v25 = vmax.f32 %v3331_v29, 0.0  ;;  %v3944_v31 = vpop.f32.mrb[4].mxu1 }
 0x332   : > { %3397 = vst [vmem:[%s5893_s28 + $0x98] sm:$0xff] %v3365_v28  ;;  %v3990_v49 = vadd.f32 %v3944_v31, %v5851_v45  ;;  %v3228_v32 = vpop.f32.mrb[5].mxu1 }
 0x333   : > { %3395 = vst [vmem:[%s5893_s28 + $0x88] sm:$0xff] %v3363_v25  ;;  %v3991_v6 = vadd.f32 %v3228_v32, %v5853_v9  ;;  %v3945_v5 = vpop.f32.mrb[6].mxu1 }
 0x334   : > { %v3336_v57 = vadd.f32 %v3990_v49, %v5886_v26  ;;  %v3992_v3 = vadd.f32 %v3945_v5, %v5855_v59  ;;  %v3231_v19 = vpop.f32.mrb[7].mxu1 }
 0x335   : > { %v3334_v15 = vadd.f32 %v3991_v6, %v5886_v26  ;;  %v3993_v10 = vadd.f32 %v3231_v19, %v5857_v2 }
 0x336   : > { %v3368_v46 = vmax.f32 %v3336_v57, 0.0  ;;  %v3337_v41 = vadd.f32 %v3992_v3, %v5886_v26 }
 0x337   : > { %v3366_v53 = vmax.f32 %v3334_v15, 0.0  ;;  %v3335_v45 = vadd.f32 %v3993_v10, %v5886_v26 }
 0x338   : > { %3400 = vst [vmem:[%s5893_s28 + $0xb0] sm:$0xff] %v3368_v46  ;;  %v3369_v9 = vmax.f32 %v3337_v41, 0.0 }
 0x339   : > { %3398 = vst [vmem:[%s5893_s28 + $0xa0] sm:$0xff] %v3366_v53  ;;  %v3367_v12 = vmax.f32 %v3335_v45, 0.0  ;;  %v3948_v55 = vpop.f32.mrb[8].mxu1 }
 0x33a   : > { %3401 = vst [vmem:[%s5893_s28 + $0xb8] sm:$0xff] %v3369_v9  ;;  %v3994_v59 = vadd.f32 %v3948_v55, %v5859_v11  ;;  %v3244_v23 = vpop.f32.mrb[9].mxu1 }
 0x33b   : > { %3399 = vst [vmem:[%s5893_s28 + $0xa8] sm:$0xff] %v3367_v12  ;;  %v3995_v2 = vadd.f32 %v3244_v23, %v5861_v39  ;;  %v3949_v4 = vpop.f32.mrb[10].mxu1 }
 0x33c   : > { %v3340_v43 = vadd.f32 %v3994_v59, %v5886_v26  ;;  %v3996_v13 = vadd.f32 %v3949_v4, %v5863_v20  ;;  %v3247_v54 = vpop.f32.mrb[11].mxu1 }
 0x33d   : > { %v3338_v42 = vadd.f32 %v3995_v2, %v5886_v26  ;;  %v3997_v1 = vadd.f32 %v3247_v54, %v5865_v16 }
 0x33e   : > { %v3372_v35 = vmax.f32 %v3340_v43, 0.0  ;;  %v3341_v11 = vadd.f32 %v3996_v13, %v5886_v26 }
 0x33f   : > { %v3370_v14 = vmax.f32 %v3338_v42, 0.0  ;;  %v3339_v18 = vadd.f32 %v3997_v1, %v5886_v26 }
 0x340   : > { %3404 = vst [vmem:[%s5893_s28 + $0xd0] sm:$0xff] %v3372_v35  ;;  %v3373_v39 = vmax.f32 %v3341_v11, 0.0 }
 0x341   : > { %3402 = vst [vmem:[%s5893_s28 + $0xc0] sm:$0xff] %v3370_v14  ;;  %v3371_v58 = vmax.f32 %v3339_v18, 0.0 }
 0x342   : > { %3405 = vst [vmem:[%s5893_s28 + $0xd8] sm:$0xff] %v3373_v39  ;;  %v3952_v33 = vpop.f32.mrb[12].mxu1 }
 0x343   : > { %3403 = vst [vmem:[%s5893_s28 + $0xc8] sm:$0xff] %v3371_v58  ;;  %v3998_v20 = vadd.f32 %v3952_v33, %v5867_v38  ;;  %v3260_v40 = vpop.f32.mrb[13].mxu1 }
 0x344   : > { %v3999_v16 = vadd.f32 %v3260_v40, %v5869_v51  ;;  %v3953_v37 = vpop.f32.mrb[14].mxu1 }
 0x345   : > { %v3344_v17 = vadd.f32 %v3998_v20, %v5886_v26  ;;  %v4000_v24 = vadd.f32 %v3953_v37, %v5871_v48  ;;  %v3263_v36 = vpop.f32.mrb[15].mxu1 }
 0x346   : > { %v3342_v0 = vadd.f32 %v3999_v16, %v5886_v26  ;;  %v4001_v62 = vadd.f32 %v3263_v36, %v5873_v61 }
 0x347   : > { %v3376_v38 = vmax.f32 %v3344_v17, 0.0  ;;  %v3345_v51 = vadd.f32 %v4000_v24, %v5886_v26 }
 0x348   : > { %v3374_v52 = vmax.f32 %v3342_v0, 0.0  ;;  %v3343_v63 = vadd.f32 %v4001_v62, %v5886_v26 }
 0x349   : > { %3408 = vst [vmem:[%s5893_s28 + $0xf0] sm:$0xff] %v3376_v38  ;;  %v3377_v30 = vmax.f32 %v3345_v51, 0.0 }
 0x34a   : > { %3406 = vst [vmem:[%s5893_s28 + $0xe0] sm:$0xff] %v3374_v52  ;;  %v3375_v48 = vmax.f32 %v3343_v63, 0.0 }
 0x34b   : > { %3409 = vst [vmem:[%s5893_s28 + $0xf8] sm:$0xff] %v3377_v30 }
 0x34c   : > { %3407 = vst [vmem:[%s5893_s28 + $0xe8] sm:$0xff] %v3375_v48 }
 0x34d   : > { %4296 = shalt.err (!%p4293_p1)
}
 0x34e   : > { %s4297_s24 = scalar_lea.hbm %s5977_s17, 4096  ;;  %s4301_s16 = scalar_lea.hbm %s6031_s5, 8192 }
 0x34f   : > { %p4298_p13 = scmp.ne.s32.totalorder %s5977_s17, %s4297_s24  ;;  %p4302_p4 = scmp.lt.u32.totalorder %s5977_s17, %s6031_s5 }
 0x350   : > { %p4303_p5 = scmp.lt.u32.totalorder %s4301_s16, %s4297_s24  ;;  %p4305_p11 = scmp.lt.u32.totalorder %s4297_s24, %s5977_s17 }
 0x351   : > { %p4299_p6 = pnand %p4298_p13, %p6153_p0 }
 0x352   : > { %p4304_p8 = por %p4303_p5, %p4302_p4 }
 0x353   : > { %p4300_p10 = pneg %p4299_p6 }
 0x354   : > { %p4306_p2 = por %p4305_p11, %p4304_p8 }
 0x356   : > { %p4307_p3 = pnand %p4306_p2, %p4300_p10 }
 0x358   : > { %4310 = shalt.err (!%p4307_p3)
}
 0x359   : > { %s4362_s12 = smov 128   ;;  %s4363_s30 = smov 8  }
 0x35a   : > { %4076 = dma.vmem_to_hbm [thread:$0]  (%p6153_p0), %s5979_s13, 4096, %s5977_s17, %s3411_s22, %s4362_s12, %s4362_s12, %s4363_s30  }
 0x35b PF: > { %s3439_s11 = sand.u32 1, %s4341_s18   ;;  %p6154_p7 = scmp.ne.s32.totalorder %s6068_s25, 0 }
 0x35c   : > { %p6155_p9 = scmp.ge.s32.totalorder %s4353_s21, 2  ;;  %s3440_s7 = scalar_lea.sflag [#allocation5], %s3439_s11 }
 0x35e   : > { %p4090_p12 = pnand %p6155_p9, %p6154_p7 }
 0x360   : > { %4336 = dma.done.wait (!%p4090_p12), %s3440_s7, 4096  }
 0x361   : > { %4338 = vsyncadd (!%p4090_p12), %s3440_s7, 4294963200  ;;  %p19_p1 = scmp.ge.s32.totalorder %s4510_s29, 4   ;;  %s6156_s18 = smov %s4345_s19 }
 0x362   : > { %s6157_s19 = smov %s4349_s20  ;;  %s6158_s20 = smov %s4526_s27 }
 0x363   : > { %s6159_s21 = smov %s4510_s29  ;;  %21 = sbr.rel (!%p19_p1) target bundleno = 6 (0x6), region = 99 }
 0x36a   :  { %3445 = vsyncpa [#allocation4], 1 }
 0x36b   :  { %3447 = vsyncpa [#allocation4 + $0x1], 1 }
 0x36c   :  { %3448 = vsyncpa [#allocation7], 1 }
 0x36d   :  { %3449 = vsyncpa [#allocation5], 1 }
 0x36e   :  { %3451 = vsyncpa [#allocation5 + $0x1], 1 }

</bundles_post_ra>
